<compile_context>
chip_gen: v7x
topology: tpu7x:2x2x1
jax: 0.10.0
libtpu: 0.0.40
codegen_flags: <defaults>
</compile_context>

<pallas_src>
import jax
import jax.numpy as jnp
import numpy as np
from jax import lax
from jax.experimental import pallas as pl
from jax.experimental.pallas import tpu as pltpu

# ----------------------------- model dims ----------------------------------
B = 2            # batch
S = 8            # sequence length
D = 128          # d_model (lane-dense: multiple of 128)
H = 4            # num_heads
DK = D // H      # head dim (32)
DFF = 2048       # d_ff (FeedForward default in the PyTorch module)
DFF_T = 512      # FFN tile along d_ff
N_X = 2          # number of decoder layers (small test depth)
EPS = 1e-5       # nn.LayerNorm default eps
BS = B * S

# PyTorch DotProductAttention scales by sqrt(d_model) (NOT sqrt(d_k)); keep it.
_INV_SCALE = float(1.0 / np.sqrt(D))

# rows of the packed per-layer "vecs" array (all are (D,) vectors)
#  0 bq1  1 bk1  2 bv1  3 bo1
#  4 bq2  5 bk2  6 bv2  7 bo2
#  8 g1   9 be1 10 g2  11 be2 12 g3 13 be3
# 14 bf2  15 zero pad
VEC_ROWS = 16


# ----------------------------- Pallas kernel -------------------------------
def _decoder_kernel(x_ref, enc_ref,
                    wqkv1, wo1, wq2, wkv2, wo2, wf1, bf1, wf2, vecs,
                    out_ref, mask_ref):
    """One grid step == one decoder layer. Activation is carried in out_ref."""
    layer = pl.program_id(0)

    # Layer 0: seed the resident output block with the decoder input and build
    # the layer-invariant causal additive bias once.
    @pl.when(layer == 0)
    def _():
        out_ref[...] = x_ref[...]
        row = lax.broadcasted_iota(jnp.int32, (S, S), 0)
        col = lax.broadcasted_iota(jnp.int32, (S, S), 1)
        mask_ref[...] = jnp.where(col <= row, jnp.float32(0.0),
                                  jnp.float32(-1e30))

    x = out_ref[...]                    # (BS, D) carried activation, f32
    enc = enc_ref[...]                  # (BS, D) encoder output, f32
    mask_bias = mask_ref[...][None, :, :]   # (1, S, S), broadcasts over batch

    def layernorm(v, g_row, b_row):
        g = vecs[g_row:g_row + 1, :]    # (1, D)
        b = vecs[b_row:b_row + 1, :]
        mean = jnp.mean(v, axis=-1, keepdims=True)
        var = jnp.mean((v - mean) ** 2, axis=-1, keepdims=True)
        return (v - mean) * lax.rsqrt(var + EPS) * g + b

    def attention(Q, K, V, wo_ref, bo_row, masked):
        """Q, K, V: (BS, D) f32, heads along lanes. Returns (BS, D) f32."""
        heads = []
        for h in range(H):              # static unroll over 4 heads
            sl = slice(h * DK, (h + 1) * DK)
            # (BS, DK) -> (B, S, DK): leading-dim split only, lane dim unchanged.
            Qh = Q[:, sl].reshape(B, S, DK)
            Kh = K[:, sl].reshape(B, S, DK)
            Vh = V[:, sl].reshape(B, S, DK)
            s = jnp.einsum('bqd,bkd->bqk', Qh, Kh,
                           preferred_element_type=jnp.float32) * _INV_SCALE
            if masked:
                s = s + mask_bias
            s = s - jnp.max(s, axis=-1, keepdims=True)
            p = jnp.exp(s)
            p = p * pl.reciprocal(jnp.sum(p, axis=-1, keepdims=True),
                                  approx=True)
            oh = jnp.einsum('bqk,bkd->bqd', p, Vh,
                            preferred_element_type=jnp.float32)
            heads.append(oh.reshape(BS, DK))
        # Lane-concat the heads, then a single full 128-deep W_o matmul
        # (== concat(heads) @ W_o; replaces 4 K=32 matmuls).
        concat = jnp.concatenate(heads, axis=-1)            # (BS, D)
        wo = wo_ref[...].astype(jnp.float32)                # bf16 -> f32
        return (jnp.dot(concat, wo, preferred_element_type=jnp.float32)
                + vecs[bo_row:bo_row + 1, :])

    # ---- masked self-attention (+ add & norm) ----
    qkv = jnp.dot(x, wqkv1[...].astype(jnp.float32),
                  preferred_element_type=jnp.float32)        # (BS, 3D)
    Q1 = qkv[:, 0 * D:1 * D] + vecs[0:1, :]
    K1 = qkv[:, 1 * D:2 * D] + vecs[1:2, :]
    V1 = qkv[:, 2 * D:3 * D] + vecs[2:3, :]
    a1 = attention(Q1, K1, V1, wo1, 3, masked=True)
    n1 = layernorm(x + a1, 8, 9)

    # ---- cross-attention: Q from decoder, K/V from encoder (+ add & norm) ----
    Q2 = jnp.dot(n1, wq2[...].astype(jnp.float32),
                 preferred_element_type=jnp.float32) + vecs[4:5, :]
    kv = jnp.dot(enc, wkv2[...].astype(jnp.float32),
                 preferred_element_type=jnp.float32)         # (BS, 2D)
    K2 = kv[:, 0 * D:1 * D] + vecs[5:6, :]
    V2 = kv[:, 1 * D:2 * D] + vecs[6:7, :]
    a2 = attention(Q2, K2, V2, wo2, 7, masked=False)
    n2 = layernorm(n1 + a2, 10, 11)

    # ---- feed-forward (+ add & norm), tiled over DFF so the (BS, DFF) f32
    # intermediate is never live in full ----
    acc = jnp.zeros((BS, D), jnp.float32)
    for c in range(DFF // DFF_T):                           # 4 static chunks
        csl = slice(c * DFF_T, (c + 1) * DFF_T)
        w1c = wf1[:, csl].astype(jnp.float32)               # (D, DFF_T)
        hdn = jnp.dot(n2, w1c, preferred_element_type=jnp.float32) + bf1[:, csl]
        hdn = jnp.maximum(hdn, 0.0)
        w2c = wf2[csl, :].astype(jnp.float32)               # (DFF_T, D)
        acc = acc + jnp.dot(hdn, w2c, preferred_element_type=jnp.float32)
    ff = acc + vecs[14:15, :]

    out_ref[...] = layernorm(n2 + ff, 12, 13)


# ----------------------------- wrapper --------------------------------------
def decoder_forward(x, enc, packed):
    """x, enc: (B, S, D) float32. packed: dict of per-layer-stacked weights."""
    x2 = x.reshape(BS, D)
    enc2 = enc.reshape(BS, D)

    names = ["wqkv1", "wo1", "wq2", "wkv2", "wo2", "wf1", "bf1", "wf2", "vecs"]
    ws = [packed[n] for n in names]

    def layer_spec(arr):
        tail = arr.shape[1:]
        nd = len(tail)
        # Leading layer dim is squeezed; grid index picks the layer's slab.
        # For deep stacks (N_X >> 2), add pipeline_mode=pl.Buffered(3) on the
        # wf1/wf2 specs (or a P10 cross-call prefetch of the layer-0 slab) to
        # keep the DMA engine ahead; pointless at N_X=2.
        return pl.BlockSpec((None,) + tail, lambda l: (l,) + (0,) * nd)

    act_spec = pl.BlockSpec((BS, D), lambda l: (0, 0))

    out = pl.pallas_call(
        _decoder_kernel,
        out_shape=jax.ShapeDtypeStruct((BS, D), jnp.float32),
        grid=(N_X,),
        in_specs=[act_spec, act_spec] + [layer_spec(w) for w in ws],
        out_specs=act_spec,
        scratch_shapes=[pltpu.VMEM((S, S), jnp.float32)],   # causal additive bias
        compiler_params=pltpu.CompilerParams(
            dimension_semantics=("arbitrary",),   # layers are sequential (carried state)
            vmem_limit_bytes=16 * 1024 * 1024,    # ~2.6 MiB double-buffered bf16 slabs
        ),
    )(x2, enc2, *ws)
    return out.reshape(B, S, D)


# ----------------------------- param init -----------------------------------
def init_layer_params(key):
    ks = jax.random.split(key, 26)
    it = iter(ks)

    def w(din, dout):
        return jax.random.normal(next(it), (din, dout), jnp.float32) * 0.05

    def vec(dout, scale=0.05, offset=0.0):
        return offset + jax.random.normal(next(it), (dout,), jnp.float32) * scale

    p = {}
    for tag in ("1", "2"):                    # 1: masked self-attn, 2: cross-attn
        for nm in ("q", "k", "v", "o"):
            p[f"w{nm}{tag}"] = w(D, D)        # stored [in, out]: y = x @ W + b
            p[f"b{nm}{tag}"] = vec(D)
    p["wf1"], p["bf1"] = w(D, DFF), vec(DFF)
    p["wf2"], p["bf2"] = w(DFF, D), vec(D)
    for i in (1, 2, 3):                       # LayerNorm affine params
        p[f"g{i}"] = vec(D, 0.05, 1.0)
        p[f"be{i}"] = vec(D, 0.05, 0.0)
    return p


def pack_params(layers):
    """Stack per-layer params with a leading layer dim; fuse QKV; pack vectors.

    Weight matrices are cast to bf16 (halves the streamed HBM bytes); biases,
    LayerNorm params and bf1 stay f32.
    """
    bf16 = jnp.bfloat16

    def stack(fn, dtype=None):
        arr = jnp.stack([fn(p) for p in layers], axis=0)
        return arr.astype(dtype) if dtype is not None else arr

    return {
        "wqkv1": stack(lambda p: jnp.concatenate([p["wq1"], p["wk1"], p["wv1"]], axis=1), bf16),
        "wo1":   stack(lambda p: p["wo1"], bf16),
        "wq2":   stack(lambda p: p["wq2"], bf16),
        "wkv2":  stack(lambda p: jnp.concatenate([p["wk2"], p["wv2"]], axis=1), bf16),
        "wo2":   stack(lambda p: p["wo2"], bf16),
        "wf1":   stack(lambda p: p["wf1"], bf16),
        "bf1":   stack(lambda p: p["bf1"].reshape(1, DFF)),
        "wf2":   stack(lambda p: p["wf2"], bf16),
        "vecs":  stack(lambda p: jnp.stack([
            p["bq1"], p["bk1"], p["bv1"], p["bo1"],
            p["bq2"], p["bk2"], p["bv2"], p["bo2"],
            p["g1"], p["be1"], p["g2"], p["be2"], p["g3"], p["be3"],
            p["bf2"], jnp.zeros((D,), jnp.float32)], axis=0)),
    }


# ----------------------------- pure-JAX reference ---------------------------
_WEIGHT_KEYS = ("wq1", "wk1", "wv1", "wo1", "wq2", "wk2", "wv2", "wo2", "wf1", "wf2")


def quantize_weights_like_kernel(p):
    """bf16-round the weight matrices (what the kernel streams) for the ref."""
    q = dict(p)
    for k in _WEIGHT_KEYS:
        q[k] = p[k].astype(jnp.bfloat16).astype(jnp.float32)
    return q


def _ref_layernorm(v, g, b):
    mean = jnp.mean(v, axis=-1, keepdims=True)
    var = jnp.mean((v - mean) ** 2, axis=-1, keepdims=True)
    return (v - mean) / jnp.sqrt(var + EPS) * g + b


def _ref_mha(q_in, kv_in, wq, bq, wk, bk, wv, bv, wo, bo, masked):
    Bq, Sq, _ = q_in.shape
    Q = (q_in @ wq + bq).reshape(Bq, Sq, H, DK).transpose(0, 2, 1, 3)
    K = (kv_in @ wk + bk).reshape(Bq, Sq, H, DK).transpose(0, 2, 1, 3)
    V = (kv_in @ wv + bv).reshape(Bq, Sq, H, DK).transpose(0, 2, 1, 3)
    s = jnp.einsum("bhqd,bhkd->bhqk", Q, K) / np.sqrt(D)
    if masked:
        m = np.tril(np.ones((Sq, Sq), np.float32))
        s = jnp.where(m == 0, -jnp.inf, s)
    p = jax.nn.softmax(s, axis=-1)
    o = jnp.einsum("bhqk,bhkd->bhqd", p, V).transpose(0, 2, 1, 3).reshape(Bq, Sq, D)
    return o @ wo + bo


def _ref_layer(x, enc, p):
    a1 = _ref_mha(x, x, p["wq1"], p["bq1"], p["wk1"], p["bk1"],
                  p["wv1"], p["bv1"], p["wo1"], p["bo1"], True)
    n1 = _ref_layernorm(x + a1, p["g1"], p["be1"])
    a2 = _ref_mha(n1, enc, p["wq2"], p["bq2"], p["wk2"], p["bk2"],
                  p["wv2"], p["bv2"], p["wo2"], p["bo2"], False)
    n2 = _ref_layernorm(n1 + a2, p["g2"], p["be2"])
    ff = jnp.maximum(n2 @ p["wf1"] + p["bf1"], 0.0) @ p["wf2"] + p["bf2"]
    return _ref_layernorm(n2 + ff, p["g3"], p["be3"])


def decoder_ref(x, enc, layers):
    for p in layers:
        x = _ref_layer(x, enc, p)
    return x


# ----------------------------- main ------------------------------------------
if __name__ == "__main__":
    key = jax.random.PRNGKey(0)
    k_x, k_e, k_p = jax.random.split(key, 3)
    x = jax.random.normal(k_x, (B, S, D), jnp.float32)
    enc = jax.random.normal(k_e, (B, S, D), jnp.float32)

    layer_keys = jax.random.split(k_p, N_X)
    layers = [init_layer_params(k) for k in layer_keys]
    packed = pack_params(layers)

    out = decoder_forward(x, enc, packed)
    out = jax.block_until_ready(out)

    # Reference uses the same bf16-rounded weight values the kernel streams,
    # so the comparison isolates kernel math (approx softmax reciprocal etc.).
    ref = decoder_ref(x, enc, [quantize_weights_like_kernel(p) for p in layers])
    np.testing.assert_allclose(np.asarray(out), np.asarray(ref), rtol=2e-3, atol=2e-3)

    print("KERNEL_OK")
</pallas_src>

<mosaic_0001>
module attributes {stable_mosaic.version = 11 : i64} {
  func.func @_decoder_kernel(%arg0: i32, %arg1: memref<16x128xf32, #tpu.memory_space<vmem>>, %arg2: memref<16x128xf32, #tpu.memory_space<vmem>>, %arg3: memref<1x128x384xbf16, #tpu.memory_space<vmem>>, %arg4: memref<1x128x128xbf16, #tpu.memory_space<vmem>>, %arg5: memref<1x128x128xbf16, #tpu.memory_space<vmem>>, %arg6: memref<1x128x256xbf16, #tpu.memory_space<vmem>>, %arg7: memref<1x128x128xbf16, #tpu.memory_space<vmem>>, %arg8: memref<1x128x2048xbf16, #tpu.memory_space<vmem>>, %arg9: memref<1x1x2048xf32, #tpu.memory_space<vmem>>, %arg10: memref<1x2048x128xbf16, #tpu.memory_space<vmem>>, %arg11: memref<1x16x128xf32, #tpu.memory_space<vmem>>, %arg12: memref<16x128xf32, #tpu.memory_space<vmem>>, %arg13: memref<8x8xf32, #tpu.memory_space<vmem>>) attributes {dimension_semantics = [#tpu.dimension_semantics<arbitrary>], iteration_bounds = array<i64: 2>, scalar_prefetch = 0 : i64, scratch_operands = 1 : i64, tpu.core_type = #tpu.core_type<tc>, window_params = [{pipeline_mode = #tpu.pipeline_mode<synchronous>, transform_indices = @transform_0, window_bounds = array<i64: 16, 128>}, {pipeline_mode = #tpu.pipeline_mode<synchronous>, transform_indices = @transform_1, window_bounds = array<i64: 16, 128>}, {transform_indices = @transform_2, window_bounds = array<i64: 1, 128, 384>}, {transform_indices = @transform_3, window_bounds = array<i64: 1, 128, 128>}, {transform_indices = @transform_4, window_bounds = array<i64: 1, 128, 128>}, {transform_indices = @transform_5, window_bounds = array<i64: 1, 128, 256>}, {transform_indices = @transform_6, window_bounds = array<i64: 1, 128, 128>}, {transform_indices = @transform_7, window_bounds = array<i64: 1, 128, 2048>}, {transform_indices = @transform_8, window_bounds = array<i64: 1, 1, 2048>}, {transform_indices = @transform_9, window_bounds = array<i64: 1, 2048, 128>}, {transform_indices = @transform_10, window_bounds = array<i64: 1, 16, 128>}, {pipeline_mode = #tpu.pipeline_mode<synchronous>, transform_indices = @transform_11, window_bounds = array<i64: 16, 128>}]} {
    %c0_i32 = arith.constant 0 : i32
    %0 = arith.cmpi eq, %arg0, %c0_i32 : i32
    %1 = arith.extui %0 : i1 to i32
    %c0_i32_0 = arith.constant 0 : i32
    %2 = arith.cmpi ne, %1, %c0_i32_0 : i32
    scf.if %2 {
      %c0_159 = arith.constant 0 : index
      %c0_160 = arith.constant 0 : index
      %389 = vector.load %arg1[%c0_159, %c0_160] : memref<16x128xf32, #tpu.memory_space<vmem>>, vector<16x128xf32>
      %c0_161 = arith.constant 0 : index
      %c0_162 = arith.constant 0 : index
      %390 = vector.load %arg12[%c0_161, %c0_162] : memref<16x128xf32, #tpu.memory_space<vmem>>, vector<16x128xf32>
      tpu.vector_store %arg12[%c0_161, %c0_162], %389 {strides = array<i32>} : memref<16x128xf32, #tpu.memory_space<vmem>>, vector<16x128xf32>,
      %391 = tpu.iota {dimensions = array<i32: 0>} : vector<8x8xi32>
      %392 = tpu.iota {dimensions = array<i32: 1>} : vector<8x8xi32>
      %393 = arith.cmpi sle, %392, %391 : vector<8x8xi32>
      %cst_163 = arith.constant 0.000000e+00 : f32
      %cst_164 = arith.constant -1.000000e+30 : f32
      %394 = vector.broadcast %cst_163 : f32 to vector<8x8xf32>
      %395 = vector.broadcast %cst_164 : f32 to vector<8x8xf32>
      %396 = arith.select %393, %394, %395 : vector<8x8xi1>, vector<8x8xf32>
      %c0_165 = arith.constant 0 : index
      %c0_166 = arith.constant 0 : index
      %397 = vector.load %arg13[%c0_165, %c0_166] : memref<8x8xf32, #tpu.memory_space<vmem>>, vector<8x8xf32>
      tpu.vector_store %arg13[%c0_165, %c0_166], %396 {strides = array<i32>} : memref<8x8xf32, #tpu.memory_space<vmem>>, vector<8x8xf32>,
    } else {
    }
    %c0 = arith.constant 0 : index
    %c0_1 = arith.constant 0 : index
    %3 = vector.load %arg12[%c0, %c0_1] : memref<16x128xf32, #tpu.memory_space<vmem>>, vector<16x128xf32>
    %c0_2 = arith.constant 0 : index
    %c0_3 = arith.constant 0 : index
    %4 = vector.load %arg2[%c0_2, %c0_3] : memref<16x128xf32, #tpu.memory_space<vmem>>, vector<16x128xf32>
    %c0_4 = arith.constant 0 : index
    %c0_5 = arith.constant 0 : index
    %5 = vector.load %arg13[%c0_4, %c0_5] : memref<8x8xf32, #tpu.memory_space<vmem>>, vector<8x8xf32>
    %6 = vector.shape_cast %5 : vector<8x8xf32> to vector<1x8x8xf32>
    %c0_6 = arith.constant 0 : index
    %c0_7 = arith.constant 0 : index
    %c0_8 = arith.constant 0 : index
    %7 = vector.load %arg3[%c0_6, %c0_7, %c0_8] : memref<1x128x384xbf16, #tpu.memory_space<vmem>>, vector<1x128x384xbf16>
    %8 = vector.shape_cast %7 : vector<1x128x384xbf16> to vector<128x384xbf16>
    %9 = arith.extf %8 : vector<128x384xbf16> to vector<128x384xf32>
    %cst = arith.constant dense<0.000000e+00> : vector<16x384xf32>
    %10 = tpu.matmul %3, %9, %cst {dimension_numbers = #tpu.dot_dimension_numbers<[1], [0], [0], [1], [0, 0, 1, 1], [], []>} : vector<16x128xf32>, vector<128x384xf32>, vector<16x384xf32> -> vector<16x384xf32>
    %11 = vector.extract_strided_slice %10 {offsets = [0, 0], sizes = [16, 128], strides = [1, 1]} : vector<16x384xf32> to vector<16x128xf32>
    %c0_9 = arith.constant 0 : index
    %c0_10 = arith.constant 0 : index
    %c0_11 = arith.constant 0 : index
    %12 = vector.load %arg11[%c0_9, %c0_10, %c0_11] : memref<1x16x128xf32, #tpu.memory_space<vmem>>, vector<1x1x128xf32>
    %13 = vector.shape_cast %12 : vector<1x1x128xf32> to vector<1x128xf32>
    %14 = vector.broadcast %13 : vector<1x128xf32> to vector<16x128xf32>
    %15 = arith.addf %11, %14 : vector<16x128xf32>
    %16 = vector.extract_strided_slice %10 {offsets = [0, 128], sizes = [16, 128], strides = [1, 1]} : vector<16x384xf32> to vector<16x128xf32>
    %c0_12 = arith.constant 0 : index
    %c1 = arith.constant 1 : index
    %c0_13 = arith.constant 0 : index
    %17 = vector.load %arg11[%c0_12, %c1, %c0_13] : memref<1x16x128xf32, #tpu.memory_space<vmem>>, vector<1x1x128xf32>
    %18 = vector.shape_cast %17 : vector<1x1x128xf32> to vector<1x128xf32>
    %19 = vector.broadcast %18 : vector<1x128xf32> to vector<16x128xf32>
    %20 = arith.addf %16, %19 : vector<16x128xf32>
    %21 = vector.extract_strided_slice %10 {offsets = [0, 256], sizes = [16, 128], strides = [1, 1]} : vector<16x384xf32> to vector<16x128xf32>
    %c0_14 = arith.constant 0 : index
    %c2 = arith.constant 2 : index
    %c0_15 = arith.constant 0 : index
    %22 = vector.load %arg11[%c0_14, %c2, %c0_15] : memref<1x16x128xf32, #tpu.memory_space<vmem>>, vector<1x1x128xf32>
    %23 = vector.shape_cast %22 : vector<1x1x128xf32> to vector<1x128xf32>
    %24 = vector.broadcast %23 : vector<1x128xf32> to vector<16x128xf32>
    %25 = arith.addf %21, %24 : vector<16x128xf32>
    %26 = vector.extract_strided_slice %15 {offsets = [0, 0], sizes = [16, 32], strides = [1, 1]} : vector<16x128xf32> to vector<16x32xf32>
    %27 = vector.shape_cast %26 : vector<16x32xf32> to vector<2x8x32xf32>
    %28 = vector.extract_strided_slice %20 {offsets = [0, 0], sizes = [16, 32], strides = [1, 1]} : vector<16x128xf32> to vector<16x32xf32>
    %29 = vector.shape_cast %28 : vector<16x32xf32> to vector<2x8x32xf32>
    %30 = vector.extract_strided_slice %25 {offsets = [0, 0], sizes = [16, 32], strides = [1, 1]} : vector<16x128xf32> to vector<16x32xf32>
    %31 = vector.shape_cast %30 : vector<16x32xf32> to vector<2x8x32xf32>
    "tpu.trace_start"() <{level = 10 : i32, message = "bqd,bkd->bqk"}> : () -> ()
    %cst_16 = arith.constant dense<0.000000e+00> : vector<2x8x8xf32>
    %32 = tpu.matmul %27, %29, %cst_16 {dimension_numbers = #tpu.dot_dimension_numbers<[2], [2], [1], [1], [0, 0, 0, 1, 1, 1], [0], [0]>} : vector<2x8x32xf32>, vector<2x8x32xf32>, vector<2x8x8xf32> -> vector<2x8x8xf32>
    "tpu.trace_stop"() : () -> ()
    %cst_17 = arith.constant 0.0883883461 : f32
    %33 = vector.broadcast %cst_17 : f32 to vector<2x8x8xf32>
    %34 = arith.mulf %32, %33 : vector<2x8x8xf32>
    %35 = vector.broadcast %6 : vector<1x8x8xf32> to vector<2x8x8xf32>
    %36 = arith.addf %34, %35 : vector<2x8x8xf32>
    %cst_18 = arith.constant dense<0xFF800000> : vector<2x8xf32>
    %37 = vector.multi_reduction <maximumf>, %36, %cst_18 [2] : vector<2x8x8xf32> to vector<2x8xf32>
    %38 = vector.shape_cast %37 : vector<2x8xf32> to vector<2x8x1xf32>
    %39 = vector.broadcast %38 : vector<2x8x1xf32> to vector<2x8x8xf32>
    %40 = arith.subf %36, %39 : vector<2x8x8xf32>
    %41 = math.exp %40 : vector<2x8x8xf32>
    %cst_19 = arith.constant dense<0.000000e+00> : vector<2x8xf32>
    %42 = vector.multi_reduction <add>, %41, %cst_19 [2] : vector<2x8x8xf32> to vector<2x8xf32>
    %43 = vector.shape_cast %42 : vector<2x8xf32> to vector<2x8x1xf32>
    %44 = tpu.reciprocal %43 {approx = true} : vector<2x8x1xf32> -> vector<2x8x1xf32>
    %45 = vector.broadcast %44 : vector<2x8x1xf32> to vector<2x8x8xf32>
    %46 = arith.mulf %41, %45 : vector<2x8x8xf32>
    "tpu.trace_start"() <{level = 10 : i32, message = "bqk,bkd->bqd"}> : () -> ()
    %cst_20 = arith.constant dense<0.000000e+00> : vector<2x8x32xf32>
    %47 = tpu.matmul %46, %31, %cst_20 {dimension_numbers = #tpu.dot_dimension_numbers<[2], [1], [1], [2], [0, 0, 0, 1, 1, 2], [0], [0]>} : vector<2x8x8xf32>, vector<2x8x32xf32>, vector<2x8x32xf32> -> vector<2x8x32xf32>
    "tpu.trace_stop"() : () -> ()
    %48 = vector.shape_cast %47 : vector<2x8x32xf32> to vector<16x32xf32>
    %49 = vector.extract_strided_slice %15 {offsets = [0, 32], sizes = [16, 32], strides = [1, 1]} : vector<16x128xf32> to vector<16x32xf32>
    %50 = vector.shape_cast %49 : vector<16x32xf32> to vector<2x8x32xf32>
    %51 = vector.extract_strided_slice %20 {offsets = [0, 32], sizes = [16, 32], strides = [1, 1]} : vector<16x128xf32> to vector<16x32xf32>
    %52 = vector.shape_cast %51 : vector<16x32xf32> to vector<2x8x32xf32>
    %53 = vector.extract_strided_slice %25 {offsets = [0, 32], sizes = [16, 32], strides = [1, 1]} : vector<16x128xf32> to vector<16x32xf32>
    %54 = vector.shape_cast %53 : vector<16x32xf32> to vector<2x8x32xf32>
    "tpu.trace_start"() <{level = 10 : i32, message = "bqd,bkd->bqk"}> : () -> ()
    %cst_21 = arith.constant dense<0.000000e+00> : vector<2x8x8xf32>
    %55 = tpu.matmul %50, %52, %cst_21 {dimension_numbers = #tpu.dot_dimension_numbers<[2], [2], [1], [1], [0, 0, 0, 1, 1, 1], [0], [0]>} : vector<2x8x32xf32>, vector<2x8x32xf32>, vector<2x8x8xf32> -> vector<2x8x8xf32>
    "tpu.trace_stop"() : () -> ()
    %cst_22 = arith.constant 0.0883883461 : f32
    %56 = vector.broadcast %cst_22 : f32 to vector<2x8x8xf32>
    %57 = arith.mulf %55, %56 : vector<2x8x8xf32>
    %58 = vector.broadcast %6 : vector<1x8x8xf32> to vector<2x8x8xf32>
    %59 = arith.addf %57, %58 : vector<2x8x8xf32>
    %cst_23 = arith.constant dense<0xFF800000> : vector<2x8xf32>
    %60 = vector.multi_reduction <maximumf>, %59, %cst_23 [2] : vector<2x8x8xf32> to vector<2x8xf32>
    %61 = vector.shape_cast %60 : vector<2x8xf32> to vector<2x8x1xf32>
    %62 = vector.broadcast %61 : vector<2x8x1xf32> to vector<2x8x8xf32>
    %63 = arith.subf %59, %62 : vector<2x8x8xf32>
    %64 = math.exp %63 : vector<2x8x8xf32>
    %cst_24 = arith.constant dense<0.000000e+00> : vector<2x8xf32>
    %65 = vector.multi_reduction <add>, %64, %cst_24 [2] : vector<2x8x8xf32> to vector<2x8xf32>
    %66 = vector.shape_cast %65 : vector<2x8xf32> to vector<2x8x1xf32>
    %67 = tpu.reciprocal %66 {approx = true} : vector<2x8x1xf32> -> vector<2x8x1xf32>
    %68 = vector.broadcast %67 : vector<2x8x1xf32> to vector<2x8x8xf32>
    %69 = arith.mulf %64, %68 : vector<2x8x8xf32>
    "tpu.trace_start"() <{level = 10 : i32, message = "bqk,bkd->bqd"}> : () -> ()
    %cst_25 = arith.constant dense<0.000000e+00> : vector<2x8x32xf32>
    %70 = tpu.matmul %69, %54, %cst_25 {dimension_numbers = #tpu.dot_dimension_numbers<[2], [1], [1], [2], [0, 0, 0, 1, 1, 2], [0], [0]>} : vector<2x8x8xf32>, vector<2x8x32xf32>, vector<2x8x32xf32> -> vector<2x8x32xf32>
    "tpu.trace_stop"() : () -> ()
    %71 = vector.shape_cast %70 : vector<2x8x32xf32> to vector<16x32xf32>
    %72 = vector.extract_strided_slice %15 {offsets = [0, 64], sizes = [16, 32], strides = [1, 1]} : vector<16x128xf32> to vector<16x32xf32>
    %73 = vector.shape_cast %72 : vector<16x32xf32> to vector<2x8x32xf32>
    %74 = vector.extract_strided_slice %20 {offsets = [0, 64], sizes = [16, 32], strides = [1, 1]} : vector<16x128xf32> to vector<16x32xf32>
    %75 = vector.shape_cast %74 : vector<16x32xf32> to vector<2x8x32xf32>
    %76 = vector.extract_strided_slice %25 {offsets = [0, 64], sizes = [16, 32], strides = [1, 1]} : vector<16x128xf32> to vector<16x32xf32>
    %77 = vector.shape_cast %76 : vector<16x32xf32> to vector<2x8x32xf32>
    "tpu.trace_start"() <{level = 10 : i32, message = "bqd,bkd->bqk"}> : () -> ()
    %cst_26 = arith.constant dense<0.000000e+00> : vector<2x8x8xf32>
    %78 = tpu.matmul %73, %75, %cst_26 {dimension_numbers = #tpu.dot_dimension_numbers<[2], [2], [1], [1], [0, 0, 0, 1, 1, 1], [0], [0]>} : vector<2x8x32xf32>, vector<2x8x32xf32>, vector<2x8x8xf32> -> vector<2x8x8xf32>
    "tpu.trace_stop"() : () -> ()
    %cst_27 = arith.constant 0.0883883461 : f32
    %79 = vector.broadcast %cst_27 : f32 to vector<2x8x8xf32>
    %80 = arith.mulf %78, %79 : vector<2x8x8xf32>
    %81 = vector.broadcast %6 : vector<1x8x8xf32> to vector<2x8x8xf32>
    %82 = arith.addf %80, %81 : vector<2x8x8xf32>
    %cst_28 = arith.constant dense<0xFF800000> : vector<2x8xf32>
    %83 = vector.multi_reduction <maximumf>, %82, %cst_28 [2] : vector<2x8x8xf32> to vector<2x8xf32>
    %84 = vector.shape_cast %83 : vector<2x8xf32> to vector<2x8x1xf32>
    %85 = vector.broadcast %84 : vector<2x8x1xf32> to vector<2x8x8xf32>
    %86 = arith.subf %82, %85 : vector<2x8x8xf32>
    %87 = math.exp %86 : vector<2x8x8xf32>
    %cst_29 = arith.constant dense<0.000000e+00> : vector<2x8xf32>
    %88 = vector.multi_reduction <add>, %87, %cst_29 [2] : vector<2x8x8xf32> to vector<2x8xf32>
    %89 = vector.shape_cast %88 : vector<2x8xf32> to vector<2x8x1xf32>
    %90 = tpu.reciprocal %89 {approx = true} : vector<2x8x1xf32> -> vector<2x8x1xf32>
    %91 = vector.broadcast %90 : vector<2x8x1xf32> to vector<2x8x8xf32>
    %92 = arith.mulf %87, %91 : vector<2x8x8xf32>
    "tpu.trace_start"() <{level = 10 : i32, message = "bqk,bkd->bqd"}> : () -> ()
    %cst_30 = arith.constant dense<0.000000e+00> : vector<2x8x32xf32>
    %93 = tpu.matmul %92, %77, %cst_30 {dimension_numbers = #tpu.dot_dimension_numbers<[2], [1], [1], [2], [0, 0, 0, 1, 1, 2], [0], [0]>} : vector<2x8x8xf32>, vector<2x8x32xf32>, vector<2x8x32xf32> -> vector<2x8x32xf32>
    "tpu.trace_stop"() : () -> ()
    %94 = vector.shape_cast %93 : vector<2x8x32xf32> to vector<16x32xf32>
    %95 = vector.extract_strided_slice %15 {offsets = [0, 96], sizes = [16, 32], strides = [1, 1]} : vector<16x128xf32> to vector<16x32xf32>
    %96 = vector.shape_cast %95 : vector<16x32xf32> to vector<2x8x32xf32>
    %97 = vector.extract_strided_slice %20 {offsets = [0, 96], sizes = [16, 32], strides = [1, 1]} : vector<16x128xf32> to vector<16x32xf32>
    %98 = vector.shape_cast %97 : vector<16x32xf32> to vector<2x8x32xf32>
    %99 = vector.extract_strided_slice %25 {offsets = [0, 96], sizes = [16, 32], strides = [1, 1]} : vector<16x128xf32> to vector<16x32xf32>
    %100 = vector.shape_cast %99 : vector<16x32xf32> to vector<2x8x32xf32>
    "tpu.trace_start"() <{level = 10 : i32, message = "bqd,bkd->bqk"}> : () -> ()
    %cst_31 = arith.constant dense<0.000000e+00> : vector<2x8x8xf32>
    %101 = tpu.matmul %96, %98, %cst_31 {dimension_numbers = #tpu.dot_dimension_numbers<[2], [2], [1], [1], [0, 0, 0, 1, 1, 1], [0], [0]>} : vector<2x8x32xf32>, vector<2x8x32xf32>, vector<2x8x8xf32> -> vector<2x8x8xf32>
    "tpu.trace_stop"() : () -> ()
    %cst_32 = arith.constant 0.0883883461 : f32
    %102 = vector.broadcast %cst_32 : f32 to vector<2x8x8xf32>
    %103 = arith.mulf %101, %102 : vector<2x8x8xf32>
    %104 = vector.broadcast %6 : vector<1x8x8xf32> to vector<2x8x8xf32>
    %105 = arith.addf %103, %104 : vector<2x8x8xf32>
    %cst_33 = arith.constant dense<0xFF800000> : vector<2x8xf32>
    %106 = vector.multi_reduction <maximumf>, %105, %cst_33 [2] : vector<2x8x8xf32> to vector<2x8xf32>
    %107 = vector.shape_cast %106 : vector<2x8xf32> to vector<2x8x1xf32>
    %108 = vector.broadcast %107 : vector<2x8x1xf32> to vector<2x8x8xf32>
    %109 = arith.subf %105, %108 : vector<2x8x8xf32>
    %110 = math.exp %109 : vector<2x8x8xf32>
    %cst_34 = arith.constant dense<0.000000e+00> : vector<2x8xf32>
    %111 = vector.multi_reduction <add>, %110, %cst_34 [2] : vector<2x8x8xf32> to vector<2x8xf32>
    %112 = vector.shape_cast %111 : vector<2x8xf32> to vector<2x8x1xf32>
    %113 = tpu.reciprocal %112 {approx = true} : vector<2x8x1xf32> -> vector<2x8x1xf32>
    %114 = vector.broadcast %113 : vector<2x8x1xf32> to vector<2x8x8xf32>
    %115 = arith.mulf %110, %114 : vector<2x8x8xf32>
    "tpu.trace_start"() <{level = 10 : i32, message = "bqk,bkd->bqd"}> : () -> ()
    %cst_35 = arith.constant dense<0.000000e+00> : vector<2x8x32xf32>
    %116 = tpu.matmul %115, %100, %cst_35 {dimension_numbers = #tpu.dot_dimension_numbers<[2], [1], [1], [2], [0, 0, 0, 1, 1, 2], [0], [0]>} : vector<2x8x8xf32>, vector<2x8x32xf32>, vector<2x8x32xf32> -> vector<2x8x32xf32>
    "tpu.trace_stop"() : () -> ()
    %117 = vector.shape_cast %116 : vector<2x8x32xf32> to vector<16x32xf32>
    %118 = tpu.concatenate %48, %71, %94, %117 in 1 : vector<16x32xf32>, vector<16x32xf32>, vector<16x32xf32>, vector<16x32xf32> -> vector<16x128xf32>
    %c0_36 = arith.constant 0 : index
    %c0_37 = arith.constant 0 : index
    %c0_38 = arith.constant 0 : index
    %119 = vector.load %arg4[%c0_36, %c0_37, %c0_38] : memref<1x128x128xbf16, #tpu.memory_space<vmem>>, vector<1x128x128xbf16>
    %120 = vector.shape_cast %119 : vector<1x128x128xbf16> to vector<128x128xbf16>
    %121 = arith.extf %120 : vector<128x128xbf16> to vector<128x128xf32>
    %cst_39 = arith.constant dense<0.000000e+00> : vector<16x128xf32>
    %122 = tpu.matmul %118, %121, %cst_39 {dimension_numbers = #tpu.dot_dimension_numbers<[1], [0], [0], [1], [0, 0, 1, 1], [], []>} : vector<16x128xf32>, vector<128x128xf32>, vector<16x128xf32> -> vector<16x128xf32>
    %c0_40 = arith.constant 0 : index
    %c3 = arith.constant 3 : index
    %c0_41 = arith.constant 0 : index
    %123 = vector.load %arg11[%c0_40, %c3, %c0_41] : memref<1x16x128xf32, #tpu.memory_space<vmem>>, vector<1x1x128xf32>
    %124 = vector.shape_cast %123 : vector<1x1x128xf32> to vector<1x128xf32>
    %125 = vector.broadcast %124 : vector<1x128xf32> to vector<16x128xf32>
    %126 = arith.addf %122, %125 : vector<16x128xf32>
    %127 = arith.addf %3, %126 : vector<16x128xf32>
    %c0_42 = arith.constant 0 : index
    %c8 = arith.constant 8 : index
    %c0_43 = arith.constant 0 : index
    %128 = vector.load %arg11[%c0_42, %c8, %c0_43] : memref<1x16x128xf32, #tpu.memory_space<vmem>>, vector<1x1x128xf32>
    %129 = vector.shape_cast %128 : vector<1x1x128xf32> to vector<1x128xf32>
    %c0_44 = arith.constant 0 : index
    %c9 = arith.constant 9 : index
    %c0_45 = arith.constant 0 : index
    %130 = vector.load %arg11[%c0_44, %c9, %c0_45] : memref<1x16x128xf32, #tpu.memory_space<vmem>>, vector<1x1x128xf32>
    %131 = vector.shape_cast %130 : vector<1x1x128xf32> to vector<1x128xf32>
    %cst_46 = arith.constant dense<0.000000e+00> : vector<16xf32>
    %132 = vector.multi_reduction <add>, %127, %cst_46 [1] : vector<16x128xf32> to vector<16xf32>
    %133 = vector.shape_cast %132 : vector<16xf32> to vector<16x1xf32>
    %cst_47 = arith.constant 1.280000e+02 : f32
    %134 = vector.broadcast %cst_47 : f32 to vector<16x1xf32>
    %135 = arith.divf %133, %134 : vector<16x1xf32>
    %136 = vector.broadcast %135 : vector<16x1xf32> to vector<16x128xf32>
    %137 = arith.subf %127, %136 : vector<16x128xf32>
    %138 = arith.mulf %137, %137 : vector<16x128xf32>
    %cst_48 = arith.constant dense<0.000000e+00> : vector<16xf32>
    %139 = vector.multi_reduction <add>, %138, %cst_48 [1] : vector<16x128xf32> to vector<16xf32>
    %140 = vector.shape_cast %139 : vector<16xf32> to vector<16x1xf32>
    %cst_49 = arith.constant 1.280000e+02 : f32
    %141 = vector.broadcast %cst_49 : f32 to vector<16x1xf32>
    %142 = arith.divf %140, %141 : vector<16x1xf32>
    %143 = vector.broadcast %135 : vector<16x1xf32> to vector<16x128xf32>
    %144 = arith.subf %127, %143 : vector<16x128xf32>
    %cst_50 = arith.constant 9.99999974E-6 : f32
    %145 = vector.broadcast %cst_50 : f32 to vector<16x1xf32>
    %146 = arith.addf %142, %145 : vector<16x1xf32>
    %147 = math.rsqrt %146 : vector<16x1xf32>
    %148 = vector.broadcast %147 : vector<16x1xf32> to vector<16x128xf32>
    %149 = arith.mulf %144, %148 : vector<16x128xf32>
    %150 = vector.broadcast %129 : vector<1x128xf32> to vector<16x128xf32>
    %151 = arith.mulf %149, %150 : vector<16x128xf32>
    %152 = vector.broadcast %131 : vector<1x128xf32> to vector<16x128xf32>
    %153 = arith.addf %151, %152 : vector<16x128xf32>
    %c0_51 = arith.constant 0 : index
    %c0_52 = arith.constant 0 : index
    %c0_53 = arith.constant 0 : index
    %154 = vector.load %arg5[%c0_51, %c0_52, %c0_53] : memref<1x128x128xbf16, #tpu.memory_space<vmem>>, vector<1x128x128xbf16>
    %155 = vector.shape_cast %154 : vector<1x128x128xbf16> to vector<128x128xbf16>
    %156 = arith.extf %155 : vector<128x128xbf16> to vector<128x128xf32>
    %cst_54 = arith.constant dense<0.000000e+00> : vector<16x128xf32>
    %157 = tpu.matmul %153, %156, %cst_54 {dimension_numbers = #tpu.dot_dimension_numbers<[1], [0], [0], [1], [0, 0, 1, 1], [], []>} : vector<16x128xf32>, vector<128x128xf32>, vector<16x128xf32> -> vector<16x128xf32>
    %c0_55 = arith.constant 0 : index
    %c4 = arith.constant 4 : index
    %c0_56 = arith.constant 0 : index
    %158 = vector.load %arg11[%c0_55, %c4, %c0_56] : memref<1x16x128xf32, #tpu.memory_space<vmem>>, vector<1x1x128xf32>
    %159 = vector.shape_cast %158 : vector<1x1x128xf32> to vector<1x128xf32>
    %160 = vector.broadcast %159 : vector<1x128xf32> to vector<16x128xf32>
    %161 = arith.addf %157, %160 : vector<16x128xf32>
    %c0_57 = arith.constant 0 : index
    %c0_58 = arith.constant 0 : index
    %c0_59 = arith.constant 0 : index
    %162 = vector.load %arg6[%c0_57, %c0_58, %c0_59] : memref<1x128x256xbf16, #tpu.memory_space<vmem>>, vector<1x128x256xbf16>
    %163 = vector.shape_cast %162 : vector<1x128x256xbf16> to vector<128x256xbf16>
    %164 = arith.extf %163 : vector<128x256xbf16> to vector<128x256xf32>
    %cst_60 = arith.constant dense<0.000000e+00> : vector<16x256xf32>
    %165 = tpu.matmul %4, %164, %cst_60 {dimension_numbers = #tpu.dot_dimension_numbers<[1], [0], [0], [1], [0, 0, 1, 1], [], []>} : vector<16x128xf32>, vector<128x256xf32>, vector<16x256xf32> -> vector<16x256xf32>
    %166 = vector.extract_strided_slice %165 {offsets = [0, 0], sizes = [16, 128], strides = [1, 1]} : vector<16x256xf32> to vector<16x128xf32>
    %c0_61 = arith.constant 0 : index
    %c5 = arith.constant 5 : index
    %c0_62 = arith.constant 0 : index
    %167 = vector.load %arg11[%c0_61, %c5, %c0_62] : memref<1x16x128xf32, #tpu.memory_space<vmem>>, vector<1x1x128xf32>
    %168 = vector.shape_cast %167 : vector<1x1x128xf32> to vector<1x128xf32>
    %169 = vector.broadcast %168 : vector<1x128xf32> to vector<16x128xf32>
    %170 = arith.addf %166, %169 : vector<16x128xf32>
    %171 = vector.extract_strided_slice %165 {offsets = [0, 128], sizes = [16, 128], strides = [1, 1]} : vector<16x256xf32> to vector<16x128xf32>
    %c0_63 = arith.constant 0 : index
    %c6 = arith.constant 6 : index
    %c0_64 = arith.constant 0 : index
    %172 = vector.load %arg11[%c0_63, %c6, %c0_64] : memref<1x16x128xf32, #tpu.memory_space<vmem>>, vector<1x1x128xf32>
    %173 = vector.shape_cast %172 : vector<1x1x128xf32> to vector<1x128xf32>
    %174 = vector.broadcast %173 : vector<1x128xf32> to vector<16x128xf32>
    %175 = arith.addf %171, %174 : vector<16x128xf32>
    %176 = vector.extract_strided_slice %161 {offsets = [0, 0], sizes = [16, 32], strides = [1, 1]} : vector<16x128xf32> to vector<16x32xf32>
    %177 = vector.shape_cast %176 : vector<16x32xf32> to vector<2x8x32xf32>
    %178 = vector.extract_strided_slice %170 {offsets = [0, 0], sizes = [16, 32], strides = [1, 1]} : vector<16x128xf32> to vector<16x32xf32>
    %179 = vector.shape_cast %178 : vector<16x32xf32> to vector<2x8x32xf32>
    %180 = vector.extract_strided_slice %175 {offsets = [0, 0], sizes = [16, 32], strides = [1, 1]} : vector<16x128xf32> to vector<16x32xf32>
    %181 = vector.shape_cast %180 : vector<16x32xf32> to vector<2x8x32xf32>
    "tpu.trace_start"() <{level = 10 : i32, message = "bqd,bkd->bqk"}> : () -> ()
    %cst_65 = arith.constant dense<0.000000e+00> : vector<2x8x8xf32>
    %182 = tpu.matmul %177, %179, %cst_65 {dimension_numbers = #tpu.dot_dimension_numbers<[2], [2], [1], [1], [0, 0, 0, 1, 1, 1], [0], [0]>} : vector<2x8x32xf32>, vector<2x8x32xf32>, vector<2x8x8xf32> -> vector<2x8x8xf32>
    "tpu.trace_stop"() : () -> ()
    %cst_66 = arith.constant 0.0883883461 : f32
    %183 = vector.broadcast %cst_66 : f32 to vector<2x8x8xf32>
    %184 = arith.mulf %182, %183 : vector<2x8x8xf32>
    %cst_67 = arith.constant dense<0xFF800000> : vector<2x8xf32>
    %185 = vector.multi_reduction <maximumf>, %184, %cst_67 [2] : vector<2x8x8xf32> to vector<2x8xf32>
    %186 = vector.shape_cast %185 : vector<2x8xf32> to vector<2x8x1xf32>
    %187 = vector.broadcast %186 : vector<2x8x1xf32> to vector<2x8x8xf32>
    %188 = arith.subf %184, %187 : vector<2x8x8xf32>
    %189 = math.exp %188 : vector<2x8x8xf32>
    %cst_68 = arith.constant dense<0.000000e+00> : vector<2x8xf32>
    %190 = vector.multi_reduction <add>, %189, %cst_68 [2] : vector<2x8x8xf32> to vector<2x8xf32>
    %191 = vector.shape_cast %190 : vector<2x8xf32> to vector<2x8x1xf32>
    %192 = tpu.reciprocal %191 {approx = true} : vector<2x8x1xf32> -> vector<2x8x1xf32>
    %193 = vector.broadcast %192 : vector<2x8x1xf32> to vector<2x8x8xf32>
    %194 = arith.mulf %189, %193 : vector<2x8x8xf32>
    "tpu.trace_start"() <{level = 10 : i32, message = "bqk,bkd->bqd"}> : () -> ()
    %cst_69 = arith.constant dense<0.000000e+00> : vector<2x8x32xf32>
    %195 = tpu.matmul %194, %181, %cst_69 {dimension_numbers = #tpu.dot_dimension_numbers<[2], [1], [1], [2], [0, 0, 0, 1, 1, 2], [0], [0]>} : vector<2x8x8xf32>, vector<2x8x32xf32>, vector<2x8x32xf32> -> vector<2x8x32xf32>
    "tpu.trace_stop"() : () -> ()
    %196 = vector.shape_cast %195 : vector<2x8x32xf32> to vector<16x32xf32>
    %197 = vector.extract_strided_slice %161 {offsets = [0, 32], sizes = [16, 32], strides = [1, 1]} : vector<16x128xf32> to vector<16x32xf32>
    %198 = vector.shape_cast %197 : vector<16x32xf32> to vector<2x8x32xf32>
    %199 = vector.extract_strided_slice %170 {offsets = [0, 32], sizes = [16, 32], strides = [1, 1]} : vector<16x128xf32> to vector<16x32xf32>
    %200 = vector.shape_cast %199 : vector<16x32xf32> to vector<2x8x32xf32>
    %201 = vector.extract_strided_slice %175 {offsets = [0, 32], sizes = [16, 32], strides = [1, 1]} : vector<16x128xf32> to vector<16x32xf32>
    %202 = vector.shape_cast %201 : vector<16x32xf32> to vector<2x8x32xf32>
    "tpu.trace_start"() <{level = 10 : i32, message = "bqd,bkd->bqk"}> : () -> ()
    %cst_70 = arith.constant dense<0.000000e+00> : vector<2x8x8xf32>
    %203 = tpu.matmul %198, %200, %cst_70 {dimension_numbers = #tpu.dot_dimension_numbers<[2], [2], [1], [1], [0, 0, 0, 1, 1, 1], [0], [0]>} : vector<2x8x32xf32>, vector<2x8x32xf32>, vector<2x8x8xf32> -> vector<2x8x8xf32>
    "tpu.trace_stop"() : () -> ()
    %cst_71 = arith.constant 0.0883883461 : f32
    %204 = vector.broadcast %cst_71 : f32 to vector<2x8x8xf32>
    %205 = arith.mulf %203, %204 : vector<2x8x8xf32>
    %cst_72 = arith.constant dense<0xFF800000> : vector<2x8xf32>
    %206 = vector.multi_reduction <maximumf>, %205, %cst_72 [2] : vector<2x8x8xf32> to vector<2x8xf32>
    %207 = vector.shape_cast %206 : vector<2x8xf32> to vector<2x8x1xf32>
    %208 = vector.broadcast %207 : vector<2x8x1xf32> to vector<2x8x8xf32>
    %209 = arith.subf %205, %208 : vector<2x8x8xf32>
    %210 = math.exp %209 : vector<2x8x8xf32>
    %cst_73 = arith.constant dense<0.000000e+00> : vector<2x8xf32>
    %211 = vector.multi_reduction <add>, %210, %cst_73 [2] : vector<2x8x8xf32> to vector<2x8xf32>
    %212 = vector.shape_cast %211 : vector<2x8xf32> to vector<2x8x1xf32>
    %213 = tpu.reciprocal %212 {approx = true} : vector<2x8x1xf32> -> vector<2x8x1xf32>
    %214 = vector.broadcast %213 : vector<2x8x1xf32> to vector<2x8x8xf32>
    %215 = arith.mulf %210, %214 : vector<2x8x8xf32>
    "tpu.trace_start"() <{level = 10 : i32, message = "bqk,bkd->bqd"}> : () -> ()
    %cst_74 = arith.constant dense<0.000000e+00> : vector<2x8x32xf32>
    %216 = tpu.matmul %215, %202, %cst_74 {dimension_numbers = #tpu.dot_dimension_numbers<[2], [1], [1], [2], [0, 0, 0, 1, 1, 2], [0], [0]>} : vector<2x8x8xf32>, vector<2x8x32xf32>, vector<2x8x32xf32> -> vector<2x8x32xf32>
    "tpu.trace_stop"() : () -> ()
    %217 = vector.shape_cast %216 : vector<2x8x32xf32> to vector<16x32xf32>
    %218 = vector.extract_strided_slice %161 {offsets = [0, 64], sizes = [16, 32], strides = [1, 1]} : vector<16x128xf32> to vector<16x32xf32>
    %219 = vector.shape_cast %218 : vector<16x32xf32> to vector<2x8x32xf32>
    %220 = vector.extract_strided_slice %170 {offsets = [0, 64], sizes = [16, 32], strides = [1, 1]} : vector<16x128xf32> to vector<16x32xf32>
    %221 = vector.shape_cast %220 : vector<16x32xf32> to vector<2x8x32xf32>
    %222 = vector.extract_strided_slice %175 {offsets = [0, 64], sizes = [16, 32], strides = [1, 1]} : vector<16x128xf32> to vector<16x32xf32>
    %223 = vector.shape_cast %222 : vector<16x32xf32> to vector<2x8x32xf32>
    "tpu.trace_start"() <{level = 10 : i32, message = "bqd,bkd->bqk"}> : () -> ()
    %cst_75 = arith.constant dense<0.000000e+00> : vector<2x8x8xf32>
    %224 = tpu.matmul %219, %221, %cst_75 {dimension_numbers = #tpu.dot_dimension_numbers<[2], [2], [1], [1], [0, 0, 0, 1, 1, 1], [0], [0]>} : vector<2x8x32xf32>, vector<2x8x32xf32>, vector<2x8x8xf32> -> vector<2x8x8xf32>
    "tpu.trace_stop"() : () -> ()
    %cst_76 = arith.constant 0.0883883461 : f32
    %225 = vector.broadcast %cst_76 : f32 to vector<2x8x8xf32>
    %226 = arith.mulf %224, %225 : vector<2x8x8xf32>
    %cst_77 = arith.constant dense<0xFF800000> : vector<2x8xf32>
    %227 = vector.multi_reduction <maximumf>, %226, %cst_77 [2] : vector<2x8x8xf32> to vector<2x8xf32>
    %228 = vector.shape_cast %227 : vector<2x8xf32> to vector<2x8x1xf32>
    %229 = vector.broadcast %228 : vector<2x8x1xf32> to vector<2x8x8xf32>
    %230 = arith.subf %226, %229 : vector<2x8x8xf32>
    %231 = math.exp %230 : vector<2x8x8xf32>
    %cst_78 = arith.constant dense<0.000000e+00> : vector<2x8xf32>
    %232 = vector.multi_reduction <add>, %231, %cst_78 [2] : vector<2x8x8xf32> to vector<2x8xf32>
    %233 = vector.shape_cast %232 : vector<2x8xf32> to vector<2x8x1xf32>
    %234 = tpu.reciprocal %233 {approx = true} : vector<2x8x1xf32> -> vector<2x8x1xf32>
    %235 = vector.broadcast %234 : vector<2x8x1xf32> to vector<2x8x8xf32>
    %236 = arith.mulf %231, %235 : vector<2x8x8xf32>
    "tpu.trace_start"() <{level = 10 : i32, message = "bqk,bkd->bqd"}> : () -> ()
    %cst_79 = arith.constant dense<0.000000e+00> : vector<2x8x32xf32>
    %237 = tpu.matmul %236, %223, %cst_79 {dimension_numbers = #tpu.dot_dimension_numbers<[2], [1], [1], [2], [0, 0, 0, 1, 1, 2], [0], [0]>} : vector<2x8x8xf32>, vector<2x8x32xf32>, vector<2x8x32xf32> -> vector<2x8x32xf32>
    "tpu.trace_stop"() : () -> ()
    %238 = vector.shape_cast %237 : vector<2x8x32xf32> to vector<16x32xf32>
    %239 = vector.extract_strided_slice %161 {offsets = [0, 96], sizes = [16, 32], strides = [1, 1]} : vector<16x128xf32> to vector<16x32xf32>
    %240 = vector.shape_cast %239 : vector<16x32xf32> to vector<2x8x32xf32>
    %241 = vector.extract_strided_slice %170 {offsets = [0, 96], sizes = [16, 32], strides = [1, 1]} : vector<16x128xf32> to vector<16x32xf32>
    %242 = vector.shape_cast %241 : vector<16x32xf32> to vector<2x8x32xf32>
    %243 = vector.extract_strided_slice %175 {offsets = [0, 96], sizes = [16, 32], strides = [1, 1]} : vector<16x128xf32> to vector<16x32xf32>
    %244 = vector.shape_cast %243 : vector<16x32xf32> to vector<2x8x32xf32>
    "tpu.trace_start"() <{level = 10 : i32, message = "bqd,bkd->bqk"}> : () -> ()
    %cst_80 = arith.constant dense<0.000000e+00> : vector<2x8x8xf32>
    %245 = tpu.matmul %240, %242, %cst_80 {dimension_numbers = #tpu.dot_dimension_numbers<[2], [2], [1], [1], [0, 0, 0, 1, 1, 1], [0], [0]>} : vector<2x8x32xf32>, vector<2x8x32xf32>, vector<2x8x8xf32> -> vector<2x8x8xf32>
    "tpu.trace_stop"() : () -> ()
    %cst_81 = arith.constant 0.0883883461 : f32
    %246 = vector.broadcast %cst_81 : f32 to vector<2x8x8xf32>
    %247 = arith.mulf %245, %246 : vector<2x8x8xf32>
    %cst_82 = arith.constant dense<0xFF800000> : vector<2x8xf32>
    %248 = vector.multi_reduction <maximumf>, %247, %cst_82 [2] : vector<2x8x8xf32> to vector<2x8xf32>
    %249 = vector.shape_cast %248 : vector<2x8xf32> to vector<2x8x1xf32>
    %250 = vector.broadcast %249 : vector<2x8x1xf32> to vector<2x8x8xf32>
    %251 = arith.subf %247, %250 : vector<2x8x8xf32>
    %252 = math.exp %251 : vector<2x8x8xf32>
    %cst_83 = arith.constant dense<0.000000e+00> : vector<2x8xf32>
    %253 = vector.multi_reduction <add>, %252, %cst_83 [2] : vector<2x8x8xf32> to vector<2x8xf32>
    %254 = vector.shape_cast %253 : vector<2x8xf32> to vector<2x8x1xf32>
    %255 = tpu.reciprocal %254 {approx = true} : vector<2x8x1xf32> -> vector<2x8x1xf32>
    %256 = vector.broadcast %255 : vector<2x8x1xf32> to vector<2x8x8xf32>
    %257 = arith.mulf %252, %256 : vector<2x8x8xf32>
    "tpu.trace_start"() <{level = 10 : i32, message = "bqk,bkd->bqd"}> : () -> ()
    %cst_84 = arith.constant dense<0.000000e+00> : vector<2x8x32xf32>
    %258 = tpu.matmul %257, %244, %cst_84 {dimension_numbers = #tpu.dot_dimension_numbers<[2], [1], [1], [2], [0, 0, 0, 1, 1, 2], [0], [0]>} : vector<2x8x8xf32>, vector<2x8x32xf32>, vector<2x8x32xf32> -> vector<2x8x32xf32>
    "tpu.trace_stop"() : () -> ()
    %259 = vector.shape_cast %258 : vector<2x8x32xf32> to vector<16x32xf32>
    %260 = tpu.concatenate %196, %217, %238, %259 in 1 : vector<16x32xf32>, vector<16x32xf32>, vector<16x32xf32>, vector<16x32xf32> -> vector<16x128xf32>
    %c0_85 = arith.constant 0 : index
    %c0_86 = arith.constant 0 : index
    %c0_87 = arith.constant 0 : index
    %261 = vector.load %arg7[%c0_85, %c0_86, %c0_87] : memref<1x128x128xbf16, #tpu.memory_space<vmem>>, vector<1x128x128xbf16>
    %262 = vector.shape_cast %261 : vector<1x128x128xbf16> to vector<128x128xbf16>
    %263 = arith.extf %262 : vector<128x128xbf16> to vector<128x128xf32>
    %cst_88 = arith.constant dense<0.000000e+00> : vector<16x128xf32>
    %264 = tpu.matmul %260, %263, %cst_88 {dimension_numbers = #tpu.dot_dimension_numbers<[1], [0], [0], [1], [0, 0, 1, 1], [], []>} : vector<16x128xf32>, vector<128x128xf32>, vector<16x128xf32> -> vector<16x128xf32>
    %c0_89 = arith.constant 0 : index
    %c7 = arith.constant 7 : index
    %c0_90 = arith.constant 0 : index
    %265 = vector.load %arg11[%c0_89, %c7, %c0_90] : memref<1x16x128xf32, #tpu.memory_space<vmem>>, vector<1x1x128xf32>
    %266 = vector.shape_cast %265 : vector<1x1x128xf32> to vector<1x128xf32>
    %267 = vector.broadcast %266 : vector<1x128xf32> to vector<16x128xf32>
    %268 = arith.addf %264, %267 : vector<16x128xf32>
    %269 = arith.addf %153, %268 : vector<16x128xf32>
    %c0_91 = arith.constant 0 : index
    %c10 = arith.constant 10 : index
    %c0_92 = arith.constant 0 : index
    %270 = vector.load %arg11[%c0_91, %c10, %c0_92] : memref<1x16x128xf32, #tpu.memory_space<vmem>>, vector<1x1x128xf32>
    %271 = vector.shape_cast %270 : vector<1x1x128xf32> to vector<1x128xf32>
    %c0_93 = arith.constant 0 : index
    %c11 = arith.constant 11 : index
    %c0_94 = arith.constant 0 : index
    %272 = vector.load %arg11[%c0_93, %c11, %c0_94] : memref<1x16x128xf32, #tpu.memory_space<vmem>>, vector<1x1x128xf32>
    %273 = vector.shape_cast %272 : vector<1x1x128xf32> to vector<1x128xf32>
    %cst_95 = arith.constant dense<0.000000e+00> : vector<16xf32>
    %274 = vector.multi_reduction <add>, %269, %cst_95 [1] : vector<16x128xf32> to vector<16xf32>
    %275 = vector.shape_cast %274 : vector<16xf32> to vector<16x1xf32>
    %cst_96 = arith.constant 1.280000e+02 : f32
    %276 = vector.broadcast %cst_96 : f32 to vector<16x1xf32>
    %277 = arith.divf %275, %276 : vector<16x1xf32>
    %278 = vector.broadcast %277 : vector<16x1xf32> to vector<16x128xf32>
    %279 = arith.subf %269, %278 : vector<16x128xf32>
    %280 = arith.mulf %279, %279 : vector<16x128xf32>
    %cst_97 = arith.constant dense<0.000000e+00> : vector<16xf32>
    %281 = vector.multi_reduction <add>, %280, %cst_97 [1] : vector<16x128xf32> to vector<16xf32>
    %282 = vector.shape_cast %281 : vector<16xf32> to vector<16x1xf32>
    %cst_98 = arith.constant 1.280000e+02 : f32
    %283 = vector.broadcast %cst_98 : f32 to vector<16x1xf32>
    %284 = arith.divf %282, %283 : vector<16x1xf32>
    %285 = vector.broadcast %277 : vector<16x1xf32> to vector<16x128xf32>
    %286 = arith.subf %269, %285 : vector<16x128xf32>
    %cst_99 = arith.constant 9.99999974E-6 : f32
    %287 = vector.broadcast %cst_99 : f32 to vector<16x1xf32>
    %288 = arith.addf %284, %287 : vector<16x1xf32>
    %289 = math.rsqrt %288 : vector<16x1xf32>
    %290 = vector.broadcast %289 : vector<16x1xf32> to vector<16x128xf32>
    %291 = arith.mulf %286, %290 : vector<16x128xf32>
    %292 = vector.broadcast %271 : vector<1x128xf32> to vector<16x128xf32>
    %293 = arith.mulf %291, %292 : vector<16x128xf32>
    %294 = vector.broadcast %273 : vector<1x128xf32> to vector<16x128xf32>
    %295 = arith.addf %293, %294 : vector<16x128xf32>
    %cst_100 = arith.constant 0.000000e+00 : f32
    %296 = vector.broadcast %cst_100 : f32 to vector<16x128xf32>
    %c0_101 = arith.constant 0 : index
    %c0_102 = arith.constant 0 : index
    %c0_103 = arith.constant 0 : index
    %297 = vector.load %arg8[%c0_101, %c0_102, %c0_103] : memref<1x128x2048xbf16, #tpu.memory_space<vmem>>, vector<1x128x512xbf16>
    %298 = vector.shape_cast %297 : vector<1x128x512xbf16> to vector<128x512xbf16>
    %299 = arith.extf %298 : vector<128x512xbf16> to vector<128x512xf32>
    %cst_104 = arith.constant dense<0.000000e+00> : vector<16x512xf32>
    %300 = tpu.matmul %295, %299, %cst_104 {dimension_numbers = #tpu.dot_dimension_numbers<[1], [0], [0], [1], [0, 0, 1, 1], [], []>} : vector<16x128xf32>, vector<128x512xf32>, vector<16x512xf32> -> vector<16x512xf32>
    %c0_105 = arith.constant 0 : index
    %c0_106 = arith.constant 0 : index
    %c0_107 = arith.constant 0 : index
    %301 = vector.load %arg9[%c0_105, %c0_106, %c0_107] : memref<1x1x2048xf32, #tpu.memory_space<vmem>>, vector<1x1x512xf32>
    %302 = vector.shape_cast %301 : vector<1x1x512xf32> to vector<1x512xf32>
    %303 = vector.broadcast %302 : vector<1x512xf32> to vector<16x512xf32>
    %304 = arith.addf %300, %303 : vector<16x512xf32>
    %cst_108 = arith.constant 0.000000e+00 : f32
    %305 = vector.broadcast %cst_108 : f32 to vector<16x512xf32>
    %306 = arith.maximumf %304, %305 : vector<16x512xf32>
    %c0_109 = arith.constant 0 : index
    %c0_110 = arith.constant 0 : index
    %c0_111 = arith.constant 0 : index
    %307 = vector.load %arg10[%c0_109, %c0_110, %c0_111] : memref<1x2048x128xbf16, #tpu.memory_space<vmem>>, vector<1x512x128xbf16>
    %308 = vector.shape_cast %307 : vector<1x512x128xbf16> to vector<512x128xbf16>
    %309 = arith.extf %308 : vector<512x128xbf16> to vector<512x128xf32>
    %cst_112 = arith.constant dense<0.000000e+00> : vector<16x128xf32>
    %310 = tpu.matmul %306, %309, %cst_112 {dimension_numbers = #tpu.dot_dimension_numbers<[1], [0], [0], [1], [0, 0, 1, 1], [], []>} : vector<16x512xf32>, vector<512x128xf32>, vector<16x128xf32> -> vector<16x128xf32>
    %311 = arith.addf %296, %310 : vector<16x128xf32>
    %c0_113 = arith.constant 0 : index
    %c0_114 = arith.constant 0 : index
    %c512 = arith.constant 512 : index
    %312 = vector.load %arg8[%c0_113, %c0_114, %c512] : memref<1x128x2048xbf16, #tpu.memory_space<vmem>>, vector<1x128x512xbf16>
    %313 = vector.shape_cast %312 : vector<1x128x512xbf16> to vector<128x512xbf16>
    %314 = arith.extf %313 : vector<128x512xbf16> to vector<128x512xf32>
    %cst_115 = arith.constant dense<0.000000e+00> : vector<16x512xf32>
    %315 = tpu.matmul %295, %314, %cst_115 {dimension_numbers = #tpu.dot_dimension_numbers<[1], [0], [0], [1], [0, 0, 1, 1], [], []>} : vector<16x128xf32>, vector<128x512xf32>, vector<16x512xf32> -> vector<16x512xf32>
    %c0_116 = arith.constant 0 : index
    %c0_117 = arith.constant 0 : index
    %c512_118 = arith.constant 512 : index
    %316 = vector.load %arg9[%c0_116, %c0_117, %c512_118] : memref<1x1x2048xf32, #tpu.memory_space<vmem>>, vector<1x1x512xf32>
    %317 = vector.shape_cast %316 : vector<1x1x512xf32> to vector<1x512xf32>
    %318 = vector.broadcast %317 : vector<1x512xf32> to vector<16x512xf32>
    %319 = arith.addf %315, %318 : vector<16x512xf32>
    %cst_119 = arith.constant 0.000000e+00 : f32
    %320 = vector.broadcast %cst_119 : f32 to vector<16x512xf32>
    %321 = arith.maximumf %319, %320 : vector<16x512xf32>
    %c0_120 = arith.constant 0 : index
    %c512_121 = arith.constant 512 : index
    %c0_122 = arith.constant 0 : index
    %322 = vector.load %arg10[%c0_120, %c512_121, %c0_122] : memref<1x2048x128xbf16, #tpu.memory_space<vmem>>, vector<1x512x128xbf16>
    %323 = vector.shape_cast %322 : vector<1x512x128xbf16> to vector<512x128xbf16>
    %324 = arith.extf %323 : vector<512x128xbf16> to vector<512x128xf32>
    %cst_123 = arith.constant dense<0.000000e+00> : vector<16x128xf32>
    %325 = tpu.matmul %321, %324, %cst_123 {dimension_numbers = #tpu.dot_dimension_numbers<[1], [0], [0], [1], [0, 0, 1, 1], [], []>} : vector<16x512xf32>, vector<512x128xf32>, vector<16x128xf32> -> vector<16x128xf32>
    %326 = arith.addf %311, %325 : vector<16x128xf32>
    %c0_124 = arith.constant 0 : index
    %c0_125 = arith.constant 0 : index
    %c1024 = arith.constant 1024 : index
    %327 = vector.load %arg8[%c0_124, %c0_125, %c1024] : memref<1x128x2048xbf16, #tpu.memory_space<vmem>>, vector<1x128x512xbf16>
    %328 = vector.shape_cast %327 : vector<1x128x512xbf16> to vector<128x512xbf16>
    %329 = arith.extf %328 : vector<128x512xbf16> to vector<128x512xf32>
    %cst_126 = arith.constant dense<0.000000e+00> : vector<16x512xf32>
    %330 = tpu.matmul %295, %329, %cst_126 {dimension_numbers = #tpu.dot_dimension_numbers<[1], [0], [0], [1], [0, 0, 1, 1], [], []>} : vector<16x128xf32>, vector<128x512xf32>, vector<16x512xf32> -> vector<16x512xf32>
    %c0_127 = arith.constant 0 : index
    %c0_128 = arith.constant 0 : index
    %c1024_129 = arith.constant 1024 : index
    %331 = vector.load %arg9[%c0_127, %c0_128, %c1024_129] : memref<1x1x2048xf32, #tpu.memory_space<vmem>>, vector<1x1x512xf32>
    %332 = vector.shape_cast %331 : vector<1x1x512xf32> to vector<1x512xf32>
    %333 = vector.broadcast %332 : vector<1x512xf32> to vector<16x512xf32>
    %334 = arith.addf %330, %333 : vector<16x512xf32>
    %cst_130 = arith.constant 0.000000e+00 : f32
    %335 = vector.broadcast %cst_130 : f32 to vector<16x512xf32>
    %336 = arith.maximumf %334, %335 : vector<16x512xf32>
    %c0_131 = arith.constant 0 : index
    %c1024_132 = arith.constant 1024 : index
    %c0_133 = arith.constant 0 : index
    %337 = vector.load %arg10[%c0_131, %c1024_132, %c0_133] : memref<1x2048x128xbf16, #tpu.memory_space<vmem>>, vector<1x512x128xbf16>
    %338 = vector.shape_cast %337 : vector<1x512x128xbf16> to vector<512x128xbf16>
    %339 = arith.extf %338 : vector<512x128xbf16> to vector<512x128xf32>
    %cst_134 = arith.constant dense<0.000000e+00> : vector<16x128xf32>
    %340 = tpu.matmul %336, %339, %cst_134 {dimension_numbers = #tpu.dot_dimension_numbers<[1], [0], [0], [1], [0, 0, 1, 1], [], []>} : vector<16x512xf32>, vector<512x128xf32>, vector<16x128xf32> -> vector<16x128xf32>
    %341 = arith.addf %326, %340 : vector<16x128xf32>
    %c0_135 = arith.constant 0 : index
    %c0_136 = arith.constant 0 : index
    %c1536 = arith.constant 1536 : index
    %342 = vector.load %arg8[%c0_135, %c0_136, %c1536] : memref<1x128x2048xbf16, #tpu.memory_space<vmem>>, vector<1x128x512xbf16>
    %343 = vector.shape_cast %342 : vector<1x128x512xbf16> to vector<128x512xbf16>
    %344 = arith.extf %343 : vector<128x512xbf16> to vector<128x512xf32>
    %cst_137 = arith.constant dense<0.000000e+00> : vector<16x512xf32>
    %345 = tpu.matmul %295, %344, %cst_137 {dimension_numbers = #tpu.dot_dimension_numbers<[1], [0], [0], [1], [0, 0, 1, 1], [], []>} : vector<16x128xf32>, vector<128x512xf32>, vector<16x512xf32> -> vector<16x512xf32>
    %c0_138 = arith.constant 0 : index
    %c0_139 = arith.constant 0 : index
    %c1536_140 = arith.constant 1536 : index
    %346 = vector.load %arg9[%c0_138, %c0_139, %c1536_140] : memref<1x1x2048xf32, #tpu.memory_space<vmem>>, vector<1x1x512xf32>
    %347 = vector.shape_cast %346 : vector<1x1x512xf32> to vector<1x512xf32>
    %348 = vector.broadcast %347 : vector<1x512xf32> to vector<16x512xf32>
    %349 = arith.addf %345, %348 : vector<16x512xf32>
    %cst_141 = arith.constant 0.000000e+00 : f32
    %350 = vector.broadcast %cst_141 : f32 to vector<16x512xf32>
    %351 = arith.maximumf %349, %350 : vector<16x512xf32>
    %c0_142 = arith.constant 0 : index
    %c1536_143 = arith.constant 1536 : index
    %c0_144 = arith.constant 0 : index
    %352 = vector.load %arg10[%c0_142, %c1536_143, %c0_144] : memref<1x2048x128xbf16, #tpu.memory_space<vmem>>, vector<1x512x128xbf16>
    %353 = vector.shape_cast %352 : vector<1x512x128xbf16> to vector<512x128xbf16>
    %354 = arith.extf %353 : vector<512x128xbf16> to vector<512x128xf32>
    %cst_145 = arith.constant dense<0.000000e+00> : vector<16x128xf32>
    %355 = tpu.matmul %351, %354, %cst_145 {dimension_numbers = #tpu.dot_dimension_numbers<[1], [0], [0], [1], [0, 0, 1, 1], [], []>} : vector<16x512xf32>, vector<512x128xf32>, vector<16x128xf32> -> vector<16x128xf32>
    %356 = arith.addf %341, %355 : vector<16x128xf32>
    %c0_146 = arith.constant 0 : index
    %c14 = arith.constant 14 : index
    %c0_147 = arith.constant 0 : index
    %357 = vector.load %arg11[%c0_146, %c14, %c0_147] : memref<1x16x128xf32, #tpu.memory_space<vmem>>, vector<1x1x128xf32>
    %358 = vector.shape_cast %357 : vector<1x1x128xf32> to vector<1x128xf32>
    %359 = vector.broadcast %358 : vector<1x128xf32> to vector<16x128xf32>
    %360 = arith.addf %356, %359 : vector<16x128xf32>
    %361 = arith.addf %295, %360 : vector<16x128xf32>
    %c0_148 = arith.constant 0 : index
    %c12 = arith.constant 12 : index
    %c0_149 = arith.constant 0 : index
    %362 = vector.load %arg11[%c0_148, %c12, %c0_149] : memref<1x16x128xf32, #tpu.memory_space<vmem>>, vector<1x1x128xf32>
    %363 = vector.shape_cast %362 : vector<1x1x128xf32> to vector<1x128xf32>
    %c0_150 = arith.constant 0 : index
    %c13 = arith.constant 13 : index
    %c0_151 = arith.constant 0 : index
    %364 = vector.load %arg11[%c0_150, %c13, %c0_151] : memref<1x16x128xf32, #tpu.memory_space<vmem>>, vector<1x1x128xf32>
    %365 = vector.shape_cast %364 : vector<1x1x128xf32> to vector<1x128xf32>
    %cst_152 = arith.constant dense<0.000000e+00> : vector<16xf32>
    %366 = vector.multi_reduction <add>, %361, %cst_152 [1] : vector<16x128xf32> to vector<16xf32>
    %367 = vector.shape_cast %366 : vector<16xf32> to vector<16x1xf32>
    %cst_153 = arith.constant 1.280000e+02 : f32
    %368 = vector.broadcast %cst_153 : f32 to vector<16x1xf32>
    %369 = arith.divf %367, %368 : vector<16x1xf32>
    %370 = vector.broadcast %369 : vector<16x1xf32> to vector<16x128xf32>
    %371 = arith.subf %361, %370 : vector<16x128xf32>
    %372 = arith.mulf %371, %371 : vector<16x128xf32>
    %cst_154 = arith.constant dense<0.000000e+00> : vector<16xf32>
    %373 = vector.multi_reduction <add>, %372, %cst_154 [1] : vector<16x128xf32> to vector<16xf32>
    %374 = vector.shape_cast %373 : vector<16xf32> to vector<16x1xf32>
    %cst_155 = arith.constant 1.280000e+02 : f32
    %375 = vector.broadcast %cst_155 : f32 to vector<16x1xf32>
    %376 = arith.divf %374, %375 : vector<16x1xf32>
    %377 = vector.broadcast %369 : vector<16x1xf32> to vector<16x128xf32>
    %378 = arith.subf %361, %377 : vector<16x128xf32>
    %cst_156 = arith.constant 9.99999974E-6 : f32
    %379 = vector.broadcast %cst_156 : f32 to vector<16x1xf32>
    %380 = arith.addf %376, %379 : vector<16x1xf32>
    %381 = math.rsqrt %380 : vector<16x1xf32>
    %382 = vector.broadcast %381 : vector<16x1xf32> to vector<16x128xf32>
    %383 = arith.mulf %378, %382 : vector<16x128xf32>
    %384 = vector.broadcast %363 : vector<1x128xf32> to vector<16x128xf32>
    %385 = arith.mulf %383, %384 : vector<16x128xf32>
    %386 = vector.broadcast %365 : vector<1x128xf32> to vector<16x128xf32>
    %387 = arith.addf %385, %386 : vector<16x128xf32>
    %c0_157 = arith.constant 0 : index
    %c0_158 = arith.constant 0 : index
    %388 = vector.load %arg12[%c0_157, %c0_158] : memref<16x128xf32, #tpu.memory_space<vmem>>, vector<16x128xf32>
    tpu.vector_store %arg12[%c0_157, %c0_158], %387 {strides = array<i32>} : memref<16x128xf32, #tpu.memory_space<vmem>>, vector<16x128xf32>,
    return
  }
  func.func @transform_0(%arg0: i32) -> (i32, i32) {
    %c0_i32 = arith.constant 0 : i32
    %c0_i32_0 = arith.constant 0 : i32
    %c0_i32_1 = arith.constant 0 : i32
    return %c0_i32, %c0_i32_0 : i32, i32
  }
  func.func @transform_1(%arg0: i32) -> (i32, i32) {
    %c0_i32 = arith.constant 0 : i32
    %c0_i32_0 = arith.constant 0 : i32
    %c0_i32_1 = arith.constant 0 : i32
    return %c0_i32, %c0_i32_0 : i32, i32
  }
  func.func @transform_2(%arg0: i32) -> (i32, i32, i32) {
    %c0_i32 = arith.constant 0 : i32
    %c0_i32_0 = arith.constant 0 : i32
    %c0_i32_1 = arith.constant 0 : i32
    return %arg0, %c0_i32, %c0_i32_0 : i32, i32, i32
  }
  func.func @transform_3(%arg0: i32) -> (i32, i32, i32) {
    %c0_i32 = arith.constant 0 : i32
    %c0_i32_0 = arith.constant 0 : i32
    %c0_i32_1 = arith.constant 0 : i32
    return %arg0, %c0_i32, %c0_i32_0 : i32, i32, i32
  }
  func.func @transform_4(%arg0: i32) -> (i32, i32, i32) {
    %c0_i32 = arith.constant 0 : i32
    %c0_i32_0 = arith.constant 0 : i32
    %c0_i32_1 = arith.constant 0 : i32
    return %arg0, %c0_i32, %c0_i32_0 : i32, i32, i32
  }
  func.func @transform_5(%arg0: i32) -> (i32, i32, i32) {
    %c0_i32 = arith.constant 0 : i32
    %c0_i32_0 = arith.constant 0 : i32
    %c0_i32_1 = arith.constant 0 : i32
    return %arg0, %c0_i32, %c0_i32_0 : i32, i32, i32
  }
  func.func @transform_6(%arg0: i32) -> (i32, i32, i32) {
    %c0_i32 = arith.constant 0 : i32
    %c0_i32_0 = arith.constant 0 : i32
    %c0_i32_1 = arith.constant 0 : i32
    return %arg0, %c0_i32, %c0_i32_0 : i32, i32, i32
  }
  func.func @transform_7(%arg0: i32) -> (i32, i32, i32) {
    %c0_i32 = arith.constant 0 : i32
    %c0_i32_0 = arith.constant 0 : i32
    %c0_i32_1 = arith.constant 0 : i32
    return %arg0, %c0_i32, %c0_i32_0 : i32, i32, i32
  }
  func.func @transform_8(%arg0: i32) -> (i32, i32, i32) {
    %c0_i32 = arith.constant 0 : i32
    %c0_i32_0 = arith.constant 0 : i32
    %c0_i32_1 = arith.constant 0 : i32
    return %arg0, %c0_i32, %c0_i32_0 : i32, i32, i32
  }
  func.func @transform_9(%arg0: i32) -> (i32, i32, i32) {
    %c0_i32 = arith.constant 0 : i32
    %c0_i32_0 = arith.constant 0 : i32
    %c0_i32_1 = arith.constant 0 : i32
    return %arg0, %c0_i32, %c0_i32_0 : i32, i32, i32
  }
  func.func @transform_10(%arg0: i32) -> (i32, i32, i32) {
    %c0_i32 = arith.constant 0 : i32
    %c0_i32_0 = arith.constant 0 : i32
    %c0_i32_1 = arith.constant 0 : i32
    return %arg0, %c0_i32, %c0_i32_0 : i32, i32, i32
  }
  func.func @transform_11(%arg0: i32) -> (i32, i32) {
    %c0_i32 = arith.constant 0 : i32
    %c0_i32_0 = arith.constant 0 : i32
    %c0_i32_1 = arith.constant 0 : i32
    return %c0_i32, %c0_i32_0 : i32, i32
  }
}

</mosaic_0001>

<bundles_post_ra>
// kernel: tpu_custom_call.1
= control target key start
LH: loop header
LB: loop body
LE: loop exit
PB: predicated region body
PF: predicated region fallthrough
CT: control target
= control target key end

     0   :  { %s11291_s0 = inlined_call_operand.hbm [shape: f32[16,128], index: 0, kind: input, shape index: {}]   ;;  %s11292_s1 = inlined_call_operand.hbm [shape: f32[16,128], index: 1, kind: input, shape index: {}]   ;;  %s11293_s2 = inlined_call_operand.hbm [shape: bf16[2,128,384], index: 2, kind: input, shape index: {}]   ;;  %s11294_s3 = inlined_call_operand.hbm [shape: bf16[2,128,128], index: 3, kind: input, shape index: {}]   ;;  %s11295_s4 = inlined_call_operand.hbm [shape: bf16[2,128,128], index: 4, kind: input, shape index: {}]   ;;  %s11296_s5 = inlined_call_operand.hbm [shape: bf16[2,128,256], index: 5, kind: input, shape index: {}]   ;;  %s11297_s6 = inlined_call_operand.hbm [shape: bf16[2,128,128], index: 6, kind: input, shape index: {}]   ;;  %s11298_s7 = inlined_call_operand.hbm [shape: bf16[2,128,2048], index: 7, kind: input, shape index: {}]   ;;  %s11299_s8 = inlined_call_operand.hbm [shape: f32[2,1,2048], index: 8, kind: input, shape index: {}]   ;;  %s11300_s9 = inlined_call_operand.hbm [shape: bf16[2,2048,128], index: 9, kind: input, shape index: {}]   ;;  %s11301_s10 = inlined_call_operand.vmem [shape: f32[2,16,128], index: 10, kind: input, shape index: {}]   ;;  %s11302_s11 = inlined_call_operand.hbm [shape: f32[16,128], index: 11, kind: output, shape index: {}]  }
   0x1   :  { %11329 = sst [smem:[#allocation25_spill]] %s11291_s0 }
   0x2   :  { %11330 = sst [smem:[#allocation26_spill]] %s11293_s2 }
   0x3   :  { %11331 = sst [smem:[#allocation27_spill]] %s11294_s3 }
   0x4   :  { %11332 = sst [smem:[#allocation28_spill]] %s11295_s4 }
   0x5   :  { %11333 = sst [smem:[#allocation29_spill]] %s11296_s5 }
   0x6   :  { %11334 = sst [smem:[#allocation30_spill]] %s11301_s10 }
   0x7   :  { %11335 = sst [smem:[#allocation31_spill]] %s11302_s11 }
   0x8   :  { %16 = vsyncpa [#allocation4], 0 }
   0x9   :  { %17 = vsyncpa [#allocation7], 0 }
   0xa   :  { %18 = vsyncpa [#allocation5], 0  ;;  %s9977_s17 = smov 0   ;;  %s9979_s18 = smov 0  }
   0xb   :  { %s9981_s19 = smov 0   ;;  %s9983_s20 = smov 0  }
   0xc LB: > { %11336 = sst [smem:[#allocation21_spill]] %s9885_s19  ;;  %s9996_s21 = sadd.s32 4294967295, %s9889_s20   ;;  %s9889_s20 = sphi %s9983_s20, %s11375_s20   ;;  %s9885_s19 = sphi %s9981_s19, %s11377_s19   ;;  %s9881_s18 = sphi %s9979_s18, %s11379_s18   ;;  %s9877_s17 = sphi %s9977_s17, %s11378_s17  }
   0xd   : > { %s9999_s22 = sadd.s32 1, %s9889_s20   ;;  %s73_s24 = sadd.s32 1, %s9885_s19 }
   0xe   : > { %11337 = sst [smem:[#allocation22_spill]] %s9999_s22  ;;  %s70_s23 = ssub.s32 %s9889_s20, %s9999_s22 }
   0xf   : > { %p71_p0 = scmp.eq.s32.totalorder %s70_s23, 0  ;;  %p80_p1 = scmp.ne.s32.totalorder %s9885_s19, %s9881_s18 }
  0x10   : > { %p81_p2 = scmp.eq.s32.totalorder %s9889_s20, 0  ;;  %p86_p3 = scmp.ne.s32.totalorder %s9881_s18, %s9877_s17 }
  0x11   : > { %s10009_s25 = scalar_select %p71_p0, %s9885_s19, %s73_s24  }
  0x12   : > { %p10011_p4 = por %p81_p2, %p80_p1  ;;  %p11303_p5 = scmp.eq.s32.totalorder %s9996_s21, 0 }
  0x13   : > { %11338 = sst [smem:[#allocation23_spill]] %s10009_s25  ;;  %p6749_p6 = scmp.ge.s32.totalorder %s9889_s20, 1 }
  0x14   : > { %p326_p7 = scmp.lt.s32.totalorder %s9889_s20, 3  ;;  %p10020_p8 = por %p11303_p5, %p86_p3 }
  0x15   : > { %s9891_s29 = smov [#allocation3]   ;;  %p9304_p13 = scmp.lt.s32.totalorder %s9889_s20, 2 }
  0x16   : > { %s11340_s27 = scalar_select %p10020_p8, 1, 0 }
  0x17   : > { %p10025_p10 = pnand %p6749_p6, %p326_p7  ;;  %s338_s30 = sshll.u32 %s9891_s29, 4  ;;  %s339_s30 = int_to_ptr.vmem [resolvable:$true] %s338_s30 }
  0x18   : > { %11341 = sst [smem:[#allocation24_spill]] %s11340_s27  ;;  %s10040_s14 = sand.u32 1, %s9885_s19  }
  0x19   : > { %s11342_s28 = scalar_select %p10025_p10, 1, 0 }
  0x1a   : > { %p9270_p11 = pneg %p10025_p10  ;;  %p10044_p0 = pnand %p9304_p13, %p10011_p4 }
  0x1b   : > { %s11345_s0 = sld [smem:[#allocation25_spill]] }
  0x1c   : > { %p10033_p12 = pnand %p9270_p11, %p11303_p5 }
  0x1d   : > { %s11344_s15 = scalar_select %p10044_p0, 1, 0 }
  0x1e   : > { %s11343_s12 = scalar_select %p10033_p12, 1, 0 }
  0x1f   : > { %p11313_p2 = pneg %p10033_p12 }
  0x21   : > { %s9521_s23 = scalar_lea.hbm %s11345_s0, 256 }
  0x22   : > { %p9522_p1 = scmp.ne.s32.totalorder %s11345_s0, %s9521_s23  ;;  %p9528_p4 = scmp.lt.u32.totalorder %s9521_s23, %s11345_s0 }
  0x24   : > { %p9524_p3 = pnand %p11313_p2, %p9522_p1 }
  0x26   : > { %p9525_p6 = pneg %p9524_p3 }
  0x28   : > { %p9530_p7 = pnand %p9528_p4, %p9525_p6 }
  0x2a   : > { %9533 = shalt.err (!%p9530_p7)
}
  0x2b   : > { %s9534_s25 = scalar_lea.vmem %s339_s30, 256  ;;  %p9542_p5 = scmp.lt.s32.totalorder %s339_s30, %s339_s30 }
  0x2c   : > { %p9535_p11 = scmp.ne.s32.totalorder %s339_s30, %s9534_s25  ;;  %p9543_p8 = scmp.lt.s32.totalorder %s9534_s25, %s9534_s25 }
  0x2e   : > { %p9537_p13 = pnand %p9535_p11, %p11313_p2  ;;  %p9544_p10 = por %p9543_p8, %p9542_p5 }
  0x30   : > { %p9538_p9 = pneg %p9537_p13 }
  0x32   : > { %p9545_p0 = pnand %p9544_p10, %p9538_p9 }
  0x34   : > { %9548 = shalt.err (!%p9545_p0)
}
  0x35   : > { %s11316_s16 = smov 128   ;;  %s11318_s13 = smov 8  }
  0x36   : > { %9273 = dma.hbm_to_vmem [thread:$0]  (!%p10033_p12), %s11345_s0, 256, %s339_s30, [#allocation4], %s11316_s16, %s11316_s16, %s11318_s13  }
  0x37   : > { %s9239_s25 = smul.u32 192, %s10040_s14  ;;  %s10076_s29 = sshll.u32 %s10040_s14, 6 }
  0x38   : > { %s9240_s24 = smul.u32 3072, %s9889_s20  ;;  %s11346_s2 = sld [smem:[#allocation26_spill]] }
  0x39   : > { %s369_s11 = scalar_lea.vmem [#allocation8], %s9239_s25  ;;  %s11347_s27 = sand.u32 1, %s9889_s20  }
  0x3a   : > { %s376_s10 = sshll.u32 %s369_s11, 4  ;;  %s10087_s17 = scalar_lea.sflag [#allocation4], %s11347_s27  ;;  %s10083_s10 = int_to_ptr.vmem [resolvable:$true] %s376_s10 }
  0x3b   : > { %p11348_p8 = scmp.ne.s32.totalorder %s11344_s15, 0 }
  0x3d   : > { %p10093_p9 = pneg %p11348_p8 }
  0x3e   : > { %s10081_s22 = scalar_lea.hbm %s11346_s2, %s9240_s24  ;;  %s9554_s11 = scalar_lea.hbm %s11346_s2, 6144 }
  0x3f   : > { %s9549_s30 = scalar_lea.hbm %s10081_s22, 3072  ;;  %p9555_p1 = scmp.lt.u32.totalorder %s10081_s22, %s11346_s2 }
  0x40   : > { %p9550_p5 = scmp.ne.s32.totalorder %s10081_s22, %s9549_s30  ;;  %p9556_p3 = scmp.lt.u32.totalorder %s9554_s11, %s9549_s30 }
  0x41   : > { %s11349_s23 = scalar_select %p10093_p9, 1, 0 }
  0x42   : > { %p9552_p10 = pnand %p10093_p9, %p9550_p5  ;;  %p9557_p6 = por %p9556_p3, %p9555_p1 }
  0x43   : > { %p9558_p4 = scmp.lt.u32.totalorder %s9549_s30, %s10081_s22 }
  0x44   : > { %p9553_p0 = pneg %p9552_p10 }
  0x45   : > { %p9559_p7 = por %p9558_p4, %p9557_p6 }
  0x47   : > { %p9560_p11 = pnand %p9559_p7, %p9553_p0 }
  0x49   : > { %9563 = shalt.err (!%p9560_p11)
}
  0x4a   : > { %s9564_s27 = scalar_lea.vmem %s10083_s10, 3072  ;;  %s9894_s19 = smov [#allocation8]  }
  0x4b   : > { %p9565_p13 = scmp.ne.s32.totalorder %s10083_s10, %s9564_s27  ;;  %s9569_s24 = sshll.u32 %s9894_s19, 4  ;;  %s9570_s24 = int_to_ptr.vmem [resolvable:$false] %s9569_s24 }
  0x4c   : > { %s9571_s25 = scalar_lea.vmem %s9570_s24, 6144  ;;  %p9572_p2 = scmp.lt.s32.totalorder %s10083_s10, %s9570_s24 }
  0x4d   : > { %p9567_p5 = pnand %p9565_p13, %p10093_p9  ;;  %p9573_p12 = scmp.lt.s32.totalorder %s9571_s25, %s9564_s27 }
  0x4f   : > { %p9568_p10 = pneg %p9567_p5  ;;  %p9574_p1 = por %p9573_p12, %p9572_p2 }
  0x51   : > { %p9575_p3 = pnand %p9574_p1, %p9568_p10 }
  0x53   : > { %9578 = shalt.err (!%p9575_p3)
}
  0x54   : > { %s9895_s30 = smov 192   ;;  %s9896_s11 = smov 12  }
  0x55   : > { %9280 = dma.hbm_to_vmem [thread:$0]  (!%p11348_p8), %s10081_s22, 3072, %s10083_s10, %s10087_s17, %s9895_s30, %s9895_s30, %s9896_s11  }
  0x56   : > { %s10118_s26 = sshll.u32 %s9889_s20, 10  ;;  %s390_s19 = scalar_lea.vmem [#allocation9], %s10076_s29 }
  0x57   : > { %s397_s24 = sshll.u32 %s390_s19, 4  ;;  %s11350_s3 = sld [smem:[#allocation27_spill]]  ;;  %s10127_s24 = int_to_ptr.vmem [resolvable:$true] %s397_s24 }
  0x5d   : > { %s10125_s16 = scalar_lea.hbm %s11350_s3, %s10118_s26  ;;  %s9584_s30 = scalar_lea.hbm %s11350_s3, 2048 }
  0x5e   : > { %s9579_s13 = scalar_lea.hbm %s10125_s16, 1024  ;;  %p9585_p6 = scmp.lt.u32.totalorder %s10125_s16, %s11350_s3 }
  0x5f   : > { %p9580_p12 = scmp.ne.s32.totalorder %s10125_s16, %s9579_s13  ;;  %p9586_p4 = scmp.lt.u32.totalorder %s9584_s30, %s9579_s13 }
  0x60   : > { %p9588_p11 = scmp.lt.u32.totalorder %s9579_s13, %s10125_s16 }
  0x61   : > { %p9582_p2 = pnand %p9580_p12, %p10093_p9  ;;  %p9587_p7 = por %p9586_p4, %p9585_p6 }
  0x63   : > { %p9583_p0 = pneg %p9582_p2  ;;  %p9589_p13 = por %p9588_p11, %p9587_p7 }
  0x65   : > { %p9590_p5 = pnand %p9589_p13, %p9583_p0 }
  0x67   : > { %9593 = shalt.err (!%p9590_p5)
}
  0x68   : > { %s9594_s27 = scalar_lea.vmem %s10127_s24, 1024  ;;  %s9897_s25 = smov [#allocation9]  }
  0x69   : > { %p9595_p10 = scmp.ne.s32.totalorder %s10127_s24, %s9594_s27  ;;  %s9599_s10 = sshll.u32 %s9897_s25, 4  ;;  %s9600_s10 = int_to_ptr.vmem [resolvable:$false] %s9599_s10 }
  0x6a   : > { %s9601_s22 = scalar_lea.vmem %s9600_s10, 2048  ;;  %p9602_p12 = scmp.lt.s32.totalorder %s10127_s24, %s9600_s10 }
  0x6b   : > { %p9597_p1 = pnand %p9595_p10, %p10093_p9  ;;  %p9603_p2 = scmp.lt.s32.totalorder %s9601_s22, %s9594_s27 }
  0x6d   : > { %p9598_p3 = pneg %p9597_p1  ;;  %p9604_p6 = por %p9603_p2, %p9602_p12 }
  0x6f   : > { %p9605_p4 = pnand %p9604_p6, %p9598_p3 }
  0x71   : > { %9608 = shalt.err (!%p9605_p4)
}
  0x72   : > { %s11320_s13 = smov 64   ;;  %s11322_s30 = smov 4  }
  0x73   : > { %9283 = dma.hbm_to_vmem [thread:$0]  (!%p11348_p8), %s10125_s16, 1024, %s10127_s24, %s10087_s17, %s11320_s13, %s11320_s13, %s11322_s30  }
  0x74   : > { %s11351_s4 = sld [smem:[#allocation28_spill]]  ;;  %s411_s25 = scalar_lea.vmem [#allocation10], %s10076_s29 }
  0x75   : > { %s418_s10 = sshll.u32 %s411_s25, 4  ;;  %s6760_s22 = sshll.u32 %s10040_s14, 7  ;;  %s10162_s10 = int_to_ptr.vmem [resolvable:$true] %s418_s10 }
  0x7a   : > { %s10158_s27 = scalar_lea.hbm %s11351_s4, %s10118_s26  ;;  %s9614_s11 = scalar_lea.hbm %s11351_s4, 2048 }
  0x7b   : > { %s9609_s0 = scalar_lea.hbm %s10158_s27, 1024  ;;  %p9615_p13 = scmp.lt.u32.totalorder %s10158_s27, %s11351_s4 }
  0x7c   : > { %p9610_p0 = scmp.ne.s32.totalorder %s10158_s27, %s9609_s0  ;;  %p9616_p5 = scmp.lt.u32.totalorder %s9614_s11, %s9609_s0 }
  0x7d   : > { %p9618_p1 = scmp.lt.u32.totalorder %s9609_s0, %s10158_s27 }
  0x7e   : > { %p9612_p7 = pnand %p9610_p0, %p10093_p9  ;;  %p9617_p10 = por %p9616_p5, %p9615_p13 }
  0x80   : > { %p9613_p11 = pneg %p9612_p7  ;;  %p9619_p3 = por %p9618_p1, %p9617_p10 }
  0x82   : > { %p9620_p12 = pnand %p9619_p3, %p9613_p11 }
  0x84   : > { %9623 = shalt.err (!%p9620_p12)
}
  0x85   : > { %s9624_s25 = scalar_lea.vmem %s10162_s10, 1024  ;;  %s9900_s16 = smov [#allocation10]  }
  0x86   : > { %p9625_p2 = scmp.ne.s32.totalorder %s10162_s10, %s9624_s25  ;;  %s9629_s24 = sshll.u32 %s9900_s16, 4  ;;  %s9630_s24 = int_to_ptr.vmem [resolvable:$false] %s9629_s24 }
  0x87   : > { %s9631_s13 = scalar_lea.vmem %s9630_s24, 2048  ;;  %p9632_p0 = scmp.lt.s32.totalorder %s10162_s10, %s9630_s24 }
  0x88   : > { %p9627_p6 = pnand %p9625_p2, %p10093_p9  ;;  %p9633_p7 = scmp.lt.s32.totalorder %s9631_s13, %s9624_s25 }
  0x8a   : > { %p9628_p4 = pneg %p9627_p6  ;;  %p9634_p13 = por %p9633_p7, %p9632_p0 }
  0x8c   : > { %p9635_p5 = pnand %p9634_p13, %p9628_p4 }
  0x8e   : > { %9638 = shalt.err (!%p9635_p5)
}
  0x8f   : > { %s11352_s0 = smov 64   ;;  %s6857_s11 = sshll.u32 %s9889_s20, 11 }
  0x90   : > { %9286 = dma.hbm_to_vmem [thread:$0]  (!%p11348_p8), %s10158_s27, 1024, %s10162_s10, %s10087_s17, %s11352_s0, %s11352_s0, %s11322_s30  }
  0x91   : > { %s432_s19 = scalar_lea.vmem [#allocation11], %s6760_s22  ;;  %s11353_s5 = sld [smem:[#allocation29_spill]] }
  0x92   : > { %s439_s16 = sshll.u32 %s432_s19, 4  ;;  %s10197_s16 = int_to_ptr.vmem [resolvable:$true] %s439_s16 }
  0x97   : > { %s10195_s13 = scalar_lea.hbm %s11353_s5, %s6857_s11  ;;  %s9644_s22 = scalar_lea.hbm %s11353_s5, 4096 }
  0x98   : > { %s9639_s2 = scalar_lea.hbm %s10195_s13, 2048  ;;  %p9645_p3 = scmp.lt.u32.totalorder %s10195_s13, %s11353_s5 }
  0x99   : > { %p9640_p11 = scmp.ne.s32.totalorder %s10195_s13, %s9639_s2  ;;  %p9646_p12 = scmp.lt.u32.totalorder %s9644_s22, %s9639_s2 }
  0x9a   : > { %p9648_p6 = scmp.lt.u32.totalorder %s9639_s2, %s10195_s13 }
  0x9b   : > { %p9642_p10 = pnand %p9640_p11, %p10093_p9  ;;  %p9647_p2 = por %p9646_p12, %p9645_p3 }
  0x9d   : > { %p9643_p1 = pneg %p9642_p10  ;;  %p9649_p4 = por %p9648_p6, %p9647_p2 }
  0x9f   : > { %p9650_p0 = pnand %p9649_p4, %p9643_p1 }
  0xa1   : > { %9653 = shalt.err (!%p9650_p0)
}
  0xa2   : > { %s9654_s11 = scalar_lea.vmem %s10197_s16, 2048  ;;  %s9901_s25 = smov [#allocation11]  }
  0xa3   : > { %p9655_p7 = scmp.ne.s32.totalorder %s10197_s16, %s9654_s11  ;;  %s9659_s24 = sshll.u32 %s9901_s25, 4  ;;  %s9660_s24 = int_to_ptr.vmem [resolvable:$false] %s9659_s24 }
  0xa4   : > { %s9661_s30 = scalar_lea.vmem %s9660_s24, 4096  ;;  %p9662_p11 = scmp.lt.s32.totalorder %s10197_s16, %s9660_s24 }
  0xa5   : > { %p9657_p13 = pnand %p9655_p7, %p10093_p9  ;;  %p9663_p10 = scmp.lt.s32.totalorder %s9661_s30, %s9654_s11 }
  0xa7   : > { %p9658_p5 = pneg %p9657_p13  ;;  %p9664_p3 = por %p9663_p10, %p9662_p11 }
  0xa9   : > { %p9665_p12 = pnand %p9664_p3, %p9658_p5 }
  0xab   : > { %9668 = shalt.err (!%p9665_p12)
}
  0xac   : > { %s11354_s2 = smov 8   ;;  %s11355_s27 = smov 128  }
  0xad   : > { %9289 = dma.hbm_to_vmem [thread:$0]  (!%p11348_p8), %s10195_s13, 2048, %s10197_s16, %s10087_s17, %s11355_s27, %s11355_s27, %s11354_s2  }
  0xae   : > { %s10228_s19 = scalar_lea.hbm %s11297_s6, %s10118_s26  ;;  %s453_s11 = scalar_lea.vmem [#allocation12], %s10076_s29 }
  0xaf   : > { %s460_s25 = sshll.u32 %s453_s11, 4  ;;  %s11324_s24 = sshll.u32 %s10040_s14, 10  ;;  %s10232_s25 = int_to_ptr.vmem [resolvable:$true] %s460_s25 }
  0xb0   : > { %s9669_s30 = scalar_lea.hbm %s10228_s19, 1024  ;;  %s9674_s10 = scalar_lea.hbm %s11297_s6, 2048 }
  0xb1   : > { %p9670_p1 = scmp.ne.s32.totalorder %s10228_s19, %s9669_s30  ;;  %p9675_p4 = scmp.lt.u32.totalorder %s10228_s19, %s11297_s6 }
  0xb2   : > { %p9676_p0 = scmp.lt.u32.totalorder %s9674_s10, %s9669_s30  ;;  %p9678_p13 = scmp.lt.u32.totalorder %s9669_s30, %s10228_s19 }
  0xb3   : > { %p9672_p2 = pnand %p9670_p1, %p10093_p9 }
  0xb4   : > { %p9677_p7 = por %p9676_p0, %p9675_p4 }
  0xb5   : > { %p9673_p6 = pneg %p9672_p2 }
  0xb6   : > { %p9679_p5 = por %p9678_p13, %p9677_p7 }
  0xb8   : > { %p9680_p11 = pnand %p9679_p5, %p9673_p6 }
  0xba   : > { %9683 = shalt.err (!%p9680_p11)
}
  0xbb   : > { %s9684_s29 = scalar_lea.vmem %s10232_s25, 1024  ;;  %s9902_s11 = smov [#allocation12]  }
  0xbc   : > { %p9685_p10 = scmp.ne.s32.totalorder %s10232_s25, %s9684_s29  ;;  %s9689_s16 = sshll.u32 %s9902_s11, 4  ;;  %s9690_s16 = int_to_ptr.vmem [resolvable:$false] %s9689_s16 }
  0xbd   : > { %s9691_s13 = scalar_lea.vmem %s9690_s16, 2048  ;;  %p9692_p1 = scmp.lt.s32.totalorder %s10232_s25, %s9690_s16 }
  0xbe   : > { %p9687_p3 = pnand %p9685_p10, %p10093_p9  ;;  %p9693_p2 = scmp.lt.s32.totalorder %s9691_s13, %s9684_s29 }
  0xc0   : > { %p9688_p12 = pneg %p9687_p3  ;;  %p9694_p4 = por %p9693_p2, %p9692_p1 }
  0xc2   : > { %p9695_p0 = pnand %p9694_p4, %p9688_p12 }
  0xc4   : > { %9698 = shalt.err (!%p9695_p0)
}
  0xc5   : > { %s11356_s30 = smov 4   ;;  %s11325_s10 = sshll.u32 %s9889_s20, 14 }
  0xc6   : > { %9292 = dma.hbm_to_vmem [thread:$0]  (!%p11348_p8), %s10228_s19, 1024, %s10232_s25, %s10087_s17, %s11352_s0, %s11352_s0, %s11356_s30  }
  0xc7   : > { %s474_s26 = scalar_lea.vmem [#allocation13], %s11324_s24  ;;  %s10267_s16 = scalar_lea.hbm %s11298_s7, %s11325_s10 }
  0xc8   : > { %s481_s22 = sshll.u32 %s474_s26, 4  ;;  %s6769_s13 = sshll.u32 %s10040_s14, 4  ;;  %s10269_s22 = int_to_ptr.vmem [resolvable:$true] %s481_s22 }
  0xc9   : > { %s9699_s3 = scalar_lea.hbm %s10267_s16, 16384  ;;  %s9704_s26 = scalar_lea.hbm %s11298_s7, 32768 }
  0xca   : > { %p9700_p6 = scmp.ne.s32.totalorder %s10267_s16, %s9699_s3  ;;  %p9705_p5 = scmp.lt.u32.totalorder %s10267_s16, %s11298_s7 }
  0xcb   : > { %p9706_p11 = scmp.lt.u32.totalorder %s9704_s26, %s9699_s3  ;;  %p9708_p3 = scmp.lt.u32.totalorder %s9699_s3, %s10267_s16 }
  0xcc   : > { %p9702_p7 = pnand %p9700_p6, %p10093_p9 }
  0xcd   : > { %p9707_p10 = por %p9706_p11, %p9705_p5 }
  0xce   : > { %p9703_p13 = pneg %p9702_p7 }
  0xcf   : > { %p9709_p12 = por %p9708_p3, %p9707_p10 }
  0xd1   : > { %p9710_p1 = pnand %p9709_p12, %p9703_p13 }
  0xd3   : > { %9713 = shalt.err (!%p9710_p1)
}
  0xd4   : > { %s9714_s11 = scalar_lea.vmem %s10269_s22, 16384  ;;  %s9903_s19 = smov [#allocation13]  }
  0xd5   : > { %p9715_p2 = scmp.ne.s32.totalorder %s10269_s22, %s9714_s11  ;;  %s9719_s25 = sshll.u32 %s9903_s19, 4  ;;  %s9720_s25 = int_to_ptr.vmem [resolvable:$false] %s9719_s25 }
  0xd6   : > { %s9721_s24 = scalar_lea.vmem %s9720_s25, 32768  ;;  %p9722_p6 = scmp.lt.s32.totalorder %s10269_s22, %s9720_s25 }
  0xd7   : > { %p9717_p4 = pnand %p9715_p2, %p10093_p9  ;;  %p9723_p7 = scmp.lt.s32.totalorder %s9721_s24, %s9714_s11 }
  0xd9   : > { %p9718_p0 = pneg %p9717_p4  ;;  %p9724_p5 = por %p9723_p7, %p9722_p6 }
  0xdb   : > { %p9725_p11 = pnand %p9724_p5, %p9718_p0 }
  0xdd   : > { %9728 = shalt.err (!%p9725_p11)
}
  0xde   : > { %s9904_s3 = smov 1024   ;;  %s6860_s26 = sshll.u32 %s9889_s20, 8 }
  0xdf   : > { %9295 = dma.hbm_to_vmem [thread:$0]  (!%p11348_p8), %s10267_s16, 16384, %s10269_s22, %s10087_s17, %s9904_s3, %s9904_s3, %s11352_s0  }
  0xe0   : > { %s10299_s25 = scalar_lea.hbm %s11299_s8, %s6860_s26  ;;  %s495_s11 = scalar_lea.vmem [#allocation14], %s6769_s13 }
  0xe1   : > { %s503_s24 = sshll.u32 %s495_s11, 4  ;;  %s9729_s10 = scalar_lea.hbm %s10299_s25, 256  ;;  %s504_s24 = int_to_ptr.vmem [resolvable:$true] %s503_s24 }
  0xe2   : > { %p9730_p13 = scmp.ne.s32.totalorder %s10299_s25, %s9729_s10  ;;  %s9734_s3 = scalar_lea.hbm %s11299_s8, 512 }
  0xe3   : > { %p9735_p12 = scmp.lt.u32.totalorder %s10299_s25, %s11299_s8  ;;  %p9736_p1 = scmp.lt.u32.totalorder %s9734_s3, %s9729_s10 }
  0xe4   : > { %p9732_p10 = pnand %p9730_p13, %p10093_p9  ;;  %p9738_p4 = scmp.lt.u32.totalorder %s9729_s10, %s10299_s25 }
  0xe5   : > { %p9737_p2 = por %p9736_p1, %p9735_p12 }
  0xe6   : > { %p9733_p3 = pneg %p9732_p10 }
  0xe7   : > { %p9739_p0 = por %p9738_p4, %p9737_p2 }
  0xe9   : > { %p9740_p6 = pnand %p9739_p0, %p9733_p3 }
  0xeb   : > { %9743 = shalt.err (!%p9740_p6)
}
  0xec   : > { %s9744_s13 = scalar_lea.vmem %s504_s24, 256  ;;  %s9905_s19 = smov [#allocation14]  }
  0xed   : > { %p9745_p7 = scmp.ne.s32.totalorder %s504_s24, %s9744_s13  ;;  %s9749_s11 = sshll.u32 %s9905_s19, 4  ;;  %s9750_s11 = int_to_ptr.vmem [resolvable:$false] %s9749_s11 }
  0xee   : > { %s9751_s22 = scalar_lea.vmem %s9750_s11, 512  ;;  %p9752_p13 = scmp.lt.s32.totalorder %s504_s24, %s9750_s11 }
  0xef   : > { %p9747_p5 = pnand %p9745_p7, %p10093_p9  ;;  %p9753_p10 = scmp.lt.s32.totalorder %s9751_s22, %s9744_s13 }
  0xf1   : > { %p9748_p11 = pneg %p9747_p5  ;;  %p9754_p8 = por %p9753_p10, %p9752_p13 }
  0xf3   : > { %p9755_p1 = pnand %p9754_p8, %p9748_p11 }
  0xf5   : > { %9758 = shalt.err (!%p9755_p1)
}
  0xf6   : > { %p11357_p12 = scmp.ne.s32.totalorder %s11344_s15, 0  ;;  %s9906_s10 = smov [#allocation6]  }
  0xf7   : > { %s351_s16 = sshll.u32 %s9906_s10, 4  ;;  %s11358_s3 = sshll.u32 %s9889_s20, 14  ;;  %s352_s16 = int_to_ptr.vmem [resolvable:$true] %s351_s16 }
  0xf8   : > { %9298 = dma.hbm_to_vmem [thread:$0]  (!%p11357_p12), %s10299_s25, 256, %s504_s24, %s10087_s17  }
  0xf9   : > { %s10326_s19 = scalar_lea.hbm %s11300_s9, %s11358_s3  ;;  %s9759_s22 = scalar_lea.hbm %s11292_s1, 256 }
  0xfa   : > { %p9760_p8 = scmp.ne.s32.totalorder %s11292_s1, %s9759_s22  ;;  %p11359_p3 = scmp.ne.s32.totalorder %s11343_s12, 0 }
  0xfb   : > { %p9766_p6 = scmp.lt.u32.totalorder %s9759_s22, %s11292_s1 }
  0xfc   : > { %p11360_p2 = pneg %p11359_p3 }
  0xfe   : > { %p9762_p4 = pnand %p9760_p8, %p11360_p2 }
 0x100   : > { %p9763_p0 = pneg %p9762_p4 }
 0x102   : > { %p9768_p7 = pnand %p9766_p6, %p9763_p0 }
 0x104   : > { %9771 = shalt.err (!%p9768_p7)
}
 0x105   : > { %s9772_s20 = scalar_lea.vmem %s352_s16, 256  ;;  %p11361_p11 = pmov %p11360_p2 }
 0x106   : > { %p9773_p5 = scmp.ne.s32.totalorder %s352_s16, %s9772_s20  ;;  %p9780_p1 = scmp.lt.s32.totalorder %s352_s16, %s352_s16 }
 0x107   : > { %p9781_p12 = scmp.lt.s32.totalorder %s9772_s20, %s9772_s20 }
 0x108   : > { %p9775_p13 = pnand %p9773_p5, %p11361_p11 }
 0x109   : > { %p9782_p9 = por %p9781_p12, %p9780_p1 }
 0x10a   : > { %p9776_p10 = pneg %p9775_p13 }
 0x10c   : > { %p9783_p2 = pnand %p9782_p9, %p9776_p10 }
 0x10e   : > { %9786 = shalt.err (!%p9783_p2)
}
 0x10f   : > { %9276 = dma.hbm_to_vmem [thread:$0]  (!%p11359_p3), %s11292_s1, 256, %s352_s16, [#allocation7], %s11355_s27, %s11355_s27, %s11354_s2  }
 0x110   : > { %s11362_s10 = sshll.u32 %s10040_s14, 10  ;;  %s9787_s26 = scalar_lea.hbm %s10326_s19, 16384 }
 0x111   : > { %s514_s3 = scalar_lea.vmem [#allocation15], %s11362_s10  ;;  %p9788_p9 = scmp.ne.s32.totalorder %s10326_s19, %s9787_s26 }
 0x112   : > { %s521_s29 = sshll.u32 %s514_s3, 4  ;;  %p11363_p12 = scmp.ne.s32.totalorder %s11349_s23, 0  ;;  %s10353_s29 = int_to_ptr.vmem [resolvable:$true] %s521_s29 }
 0x113   : > { %s9792_s11 = scalar_lea.hbm %s11300_s9, 32768  ;;  %p9793_p0 = scmp.lt.u32.totalorder %s10326_s19, %s11300_s9 }
 0x114   : > { %p9790_p8 = pnand %p9788_p9, %p11363_p12  ;;  %p9794_p6 = scmp.lt.u32.totalorder %s9792_s11, %s9787_s26 }
 0x115   : > { %p9796_p7 = scmp.lt.u32.totalorder %s9787_s26, %s10326_s19 }
 0x116   : > { %p9791_p4 = pneg %p9790_p8  ;;  %p9795_p3 = por %p9794_p6, %p9793_p0 }
 0x118   : > { %p9797_p5 = por %p9796_p7, %p9795_p3 }
 0x11a   : > { %p9798_p11 = pnand %p9797_p5, %p9791_p4 }
 0x11c   : > { %9801 = shalt.err (!%p9798_p11)
}
 0x11d   : > { %s9802_s14 = scalar_lea.vmem %s10353_s29, 16384  ;;  %s9907_s2 = smov [#allocation15]  }
 0x11e   : > { %p9803_p13 = scmp.ne.s32.totalorder %s10353_s29, %s9802_s14  ;;  %s9807_s27 = sshll.u32 %s9907_s2, 4  ;;  %s9808_s27 = int_to_ptr.vmem [resolvable:$false] %s9807_s27 }
 0x11f   : > { %s9809_s16 = scalar_lea.vmem %s9808_s27, 32768  ;;  %p9810_p2 = scmp.lt.s32.totalorder %s10353_s29, %s9808_s27 }
 0x120   : > { %p9805_p10 = pnand %p9803_p13, %p11363_p12  ;;  %p9811_p9 = scmp.lt.s32.totalorder %s9809_s16, %s9802_s14 }
 0x122   : > { %p9806_p1 = pneg %p9805_p10  ;;  %p9812_p8 = por %p9811_p9, %p9810_p2 }
 0x124   : > { %p9813_p0 = pnand %p9812_p8, %p9806_p1 }
 0x126   : > { %9816 = shalt.err (!%p9813_p0)
}
 0x127   : > { %p11364_p4 = scmp.ne.s32.totalorder %s11344_s15, 0  ;;  %p11365_p12 = scmp.ne.s32.totalorder %s11342_s28, 0 }
 0x128   : > { %p11366_p6 = scmp.eq.s32.totalorder (!%p11365_p12), %s9996_s21, 0 }
 0x129   : > { %9301 = dma.hbm_to_vmem [thread:$0]  (!%p11364_p4), %s10326_s19, 16384, %s10353_s29, %s10087_s17, %s11352_s0, %s11352_s0, %s11356_s30  }
 0x12a   : > { %541 = sbr.rel (%p11365_p12) target bundleno = 8202 (0x200a), region = 64 }
 0x131   : > { %9860 = dma.done.wait (%p11366_p6), [#allocation4], 256   ;;  %p11367_p3 = pmov %p11366_p6 }
 0x133   : > { %9862 = vsyncadd (%p11367_p3), [#allocation4], 4294967040  ;;  %p11368_p7 = pmov %p11367_p3 }
 0x134   : > { %p11369_p5 = pmov %p11367_p3 }
 0x135   : > { %9864 = dma.done.wait (%p11368_p7), [#allocation7], 256  }
 0x136   : > { %9866 = vsyncadd (%p11369_p5), [#allocation7], 4294967040  ;;  %s11370_s15 = sld [smem:[#allocation24_spill]]  ;;  %s551_s23 = sand.u32 1, %s9996_s21  }
 0x137   : > { %s553_s17 = sand.u32 1, %s9881_s18   ;;  %s552_s28 = scalar_lea.sflag [#allocation4], %s551_s23 }
 0x138   : > { %s9241_s0 = smul.u32 192, %s553_s17 }
 0x13a   : > { %s10392_s30 = scalar_lea.vmem [#allocation8], %s9241_s0 }
 0x13c   : > { %p11371_p11 = scmp.ne.s32.totalorder %s11370_s15, 0 }
 0x13e   : > { %9868 = dma.done.wait (%p11371_p11), %s552_s28, 41216  }
 0x13f   : > { %9870 = vsyncadd (%p11371_p11), %s552_s28, 4294926080  ;;  %s6778_s19 = sshll.u32 %s553_s17, 6  ;;  %s6780_s24 = sshll.u32 %s553_s17, 7 }
 0x140   : > { %s6782_s20 = sshll.u32 %s553_s17, 10  ;;  %s6783_s4 = sshll.u32 %s553_s17, 4 }
 0x141   : > { %p692_p13 = scmp.lt.s32.totalorder %s9996_s21, 1  ;;  %s11372_s26 = sld [smem:[#allocation30_spill]] }
 0x142   : > { %s10405_s13 = scalar_lea.vmem [#allocation9], %s6778_s19  ;;  %s10407_s11 = scalar_lea.vmem [#allocation10], %s6778_s19 }
 0x143   : > { %s693_s5 = scalar_select %p692_p13, %s9996_s21, 1 }
 0x144   : > { %s10409_s22 = scalar_lea.vmem [#allocation11], %s6780_s24  ;;  %s10411_s25 = scalar_lea.vmem [#allocation12], %s6778_s19 }
 0x145   : > { %s6862_s10 = sshll.u32 %s693_s5, 4  ;;  %s10413_s14 = scalar_lea.vmem [#allocation13], %s6782_s20 }
 0x146   : > { %s10415_s2 = scalar_lea.vmem [#allocation14], %s6783_s4  ;;  %s10417_s27 = scalar_lea.vmem [#allocation15], %s6782_s20 }
 0x147   : > { %s10403_s12 = scalar_lea.vmem %s11372_s26, %s6862_s10  ;;  %p11373_p10 = scmp.ne.s32.totalorder %s9996_s21, 0 }
 0x148   : > { %v701_v0 = vld [vmem:[#allocation3] sm:$0xff] (!%p11373_p10)  ;;  %v702_v1 = vld [vmem:[#allocation3 + $0x8] sm:$0xff] (!%p11373_p10)  ;;  %v705_v2 = vlaneseq (!%p11373_p10)  ;;  %vm711_vm0 = vcmask (!%p11373_p10), 64512   ;;  %v9908_v5 = vmov (!%p11373_p10), -1e+30  }
 0x149   : > { %700 = sbr.rel (%p11373_p10) target bundleno = 336 (0x150), region = 108  ;;  %703 = vst [vmem:[#allocation16] sm:$0xff] (!%p11373_p10), %v701_v0  ;;  %704 = vst [vmem:[#allocation16 + $0x8] sm:$0xff] (!%p11373_p10), %v702_v1 }
 0x14a   : > { %v706_v3 = vshrl.u32 (!%p11373_p10), %v705_v2, 7  ;;  %v708_v4 = vand.u32 (!%p11373_p10), 127, %v705_v2 }
 0x14c   : > { %vm709_vm1 = vcmp.le.s32.totalorder (!%p11373_p10), %v708_v4, %v706_v3 }
 0x14d   : > { %v710_v6 = vsel (!%p11373_p10), %vm709_vm1, 0.0, %v9908_v5 }
 0x14e   : > { %712 = vst.msk [vmem:[#allocation2] sm:$0xff] (!%p11373_p10), %vm711_vm0, %v710_v6 }
 0x150 PF: > { %v9389_v7 = vld [vmem:[%s10392_s30 + $0x4] ss:$12 sps:$4 sm:$0xff]   ;;  %v9391_v8 = vld [vmem:[%s10392_s30] ss:$12 sps:$4 sm:$0xff]   ;;  %v9909_v9 = vmov 0.0   ;;  %vm9910_vm2 = vmmov 0  }
 0x151   : > { %862 = vmatprep.mubr.f32.mxu0 %v9909_v9  ;;  %8360 = vmatprep.subr.bf16.mxu0 %v9389_v7  ;;  %v9392_v10 = vld [vmem:[%s10392_s30 + $0x1c] ss:$12 sps:$4 sm:$0xff]   ;;  %v9394_v11 = vld [vmem:[%s10392_s30 + $0x18] ss:$12 sps:$4 sm:$0xff]   ;;  %v9395_v12 = vld [vmem:[%s10392_s30 + $0x34] ss:$12 sps:$4 sm:$0xff]  }
 0x152   : > { %8362 = vmatpush1.bf16.msra.mxu0 %v9391_v8  ;;  %v9397_v13 = vld [vmem:[%s10392_s30 + $0x30] ss:$12 sps:$4 sm:$0xff]   ;;  %v9398_v14 = vld [vmem:[%s10392_s30 + $0x4c] ss:$12 sps:$4 sm:$0xff]   ;;  %v9400_v15 = vld [vmem:[%s10392_s30 + $0x48] ss:$12 sps:$4 sm:$0xff]  }
 0x153   : > { %8364 = vmatprep.subr.bf16.mxu0 %v9392_v10  ;;  %v10430_v16 = vld [vmem:[#allocation16] sm:$0xff]  ;;  %v9413_v18 = vld [vmem:[%s10392_s30 + $0x8] ss:$12 sps:$4 sm:$0xff]   ;;  %v9416_v25 = vld [vmem:[%s10392_s30 + $0x50] ss:$12 sps:$4 sm:$0xff]   ;;  %vm971_vm3 = vcmask 261120  }
 0x154   : > { %v9401_v17 = vld [vmem:[%s10392_s30 + $0x64] ss:$12 sps:$4 sm:$0xff]   ;;  %8091 = vmatprep.mubr.f32.mxu1 %v10430_v16  ;;  %v9414_v19 = vld [vmem:[%s10392_s30 + $0x20] ss:$12 sps:$4 sm:$0xff]   ;;  %8392 = vmatprep.subr.bf16.mxu1 %v9413_v18  ;;  %v9404_v21 = vld [vmem:[%s10392_s30 + $0x7c] ss:$12 sps:$4 sm:$0xff]  }
 0x155   : > { %v9403_v20 = vld [vmem:[%s10392_s30 + $0x60] ss:$12 sps:$4 sm:$0xff]   ;;  %8394 = vmatpush3.bf16.msra.mxu1 %v9413_v18  ;;  %v9415_v22 = vld [vmem:[%s10392_s30 + $0x38] ss:$12 sps:$4 sm:$0xff]   ;;  %v9409_v26 = vld [vmem:[%s10392_s30 + $0x90] ss:$12 sps:$4 sm:$0xff]  }
 0x156   : > { %8366 = vmatpush1.bf16.msra.mxu0 %v9394_v11  ;;  %8396 = vmatprep.subr.bf16.mxu1 %v9414_v19  ;;  %v9406_v23 = vld [vmem:[%s10392_s30 + $0x78] ss:$12 sps:$4 sm:$0xff]   ;;  %v9407_v24 = vld [vmem:[%s10392_s30 + $0x94] ss:$12 sps:$4 sm:$0xff]   ;;  %v10451_v32 = vld [vmem:[#allocation16 + $0x8] sm:$0xff]  ;;  %s9911_s16 = smov 96  }
 0x157   : > { %8368 = vmatprep.subr.bf16.mxu0 %v9395_v12  ;;  %v9410_v27 = vld [vmem:[%s10392_s30 + $0xac] ss:$12 sps:$4 sm:$0xff]   ;;  %v9417_v28 = vld [vmem:[%s10392_s30 + $0x68] ss:$12 sps:$4 sm:$0xff]   ;;  %v9420_v33 = vld [vmem:[%s10392_s30 + $0xb0] ss:$12 sps:$4 sm:$0xff]  }
 0x158   : > { %v9412_v29 = vld [vmem:[%s10392_s30 + $0xa8] ss:$12 sps:$4 sm:$0xff]   ;;  %v9418_v30 = vld [vmem:[%s10392_s30 + $0x80] ss:$12 sps:$4 sm:$0xff]   ;;  %v9419_v31 = vld [vmem:[%s10392_s30 + $0x98] ss:$12 sps:$4 sm:$0xff]  }
 0x159   : > { %8398 = vmatpush3.bf16.msra.mxu1 %v9414_v19  ;;  %v6788_v34 = vld [vmem:[%s10403_s12] ss:$0 sm:$0xff]  ;;  %v6789_v35 = vld [vmem:[%s10403_s12 + $0x1] ss:$0 sm:$0xff]  ;;  %v6790_v44 = vld [vmem:[%s10403_s12 + $0x2] ss:$0 sm:$0xff] }
 0x15a   : > { %8370 = vmatpush1.bf16.msra.mxu0 %v9397_v13  ;;  %8400 = vmatprep.subr.bf16.mxu1 %v9415_v22  ;;  %v10494_v50 = vld [vmem:[#allocation2] sm:$0xff]  ;;  %vm1128_vm4 = vcmask 64512   ;;  %s9912_s15 = smov 64   ;;  %s9913_s23 = smov 32   ;;  %vm2327_vm5 = vcmask 523264   ;;  %vm2330_vm6 = vcmask 785408  }
 0x15b   : > { %8372 = vmatprep.subr.bf16.mxu0 %v9398_v14  ;;  %s9914_s17 = smov [#allocation16]   ;;  %p9307_p1 = scmp.eq.s32.totalorder %s9996_s21, 1 }
 0x15c   : > { %s6524_s0 = sshll.u32 %s9914_s17, 4  ;;  %s6525_s0 = int_to_ptr.vmem [resolvable:$true] %s6524_s0 }
 0x15d   : > { %8402 = vmatpush3.bf16.msra.mxu1 %v9415_v22  ;;  %s9817_s28 = scalar_lea.vmem %s6525_s0, 256  ;;  %p9824_p0 = scmp.lt.s32.totalorder %s6525_s0, %s6525_s0 }
 0x15e   : > { %8374 = vmatpush1.bf16.msra.mxu0 %v9400_v15  ;;  %8404 = vmatprep.subr.bf16.mxu1 %v9416_v25  ;;  %p9818_p2 = scmp.ne.s32.totalorder %s6525_s0, %s9817_s28  ;;  %p9825_p4 = scmp.lt.s32.totalorder %s9817_s28, %s9817_s28 }
 0x15f   : > { %8376 = vmatprep.subr.bf16.mxu0 %v9401_v17 }
 0x160   : > { %p9819_p9 = pnand %p9818_p2, %p9307_p1  ;;  %p9826_p12 = por %p9825_p4, %p9824_p0 }
 0x161   : > { %8406 = vmatpush3.bf16.msra.mxu1 %v9416_v25 }
 0x162   : > { %8378 = vmatpush1.bf16.msra.mxu0 %v9403_v20  ;;  %8408 = vmatprep.subr.bf16.mxu1 %v9417_v28  ;;  %p9820_p8 = pneg %p9819_p9 }
 0x163   : > { %8380 = vmatprep.subr.bf16.mxu0 %v9404_v21 }
 0x164   : > { %p9827_p6 = pnand %p9826_p12, %p9820_p8 }
 0x165   : > { %8410 = vmatpush3.bf16.msra.mxu1 %v9417_v28 }
 0x166   : > { %8382 = vmatpush1.bf16.msra.mxu0 %v9406_v23  ;;  %8412 = vmatprep.subr.bf16.mxu1 %v9418_v30 }
 0x167   : > { %8384 = vmatprep.subr.bf16.mxu0 %v9407_v24 }
 0x169   : > { %8414 = vmatpush3.bf16.msra.mxu1 %v9418_v30 }
 0x16a   : > { %8386 = vmatpush1.bf16.msra.mxu0 %v9409_v26  ;;  %8416 = vmatprep.subr.bf16.mxu1 %v9419_v31 }
 0x16b   : > { %8388 = vmatprep.subr.bf16.mxu0 %v9410_v27 }
 0x16d   : > { %8418 = vmatpush3.bf16.msra.mxu1 %v9419_v31 }
 0x16e   : > { %8390 = vmatpush1.bf16.msra.mxu0 %v9412_v29  ;;  %8420 = vmatprep.subr.bf16.mxu1 %v9420_v33 }
 0x16f   : > { %8139 = vmatprep.subr.mxu0 %v9909_v9 }
 0x171   : > { %863 = vmatmul.mubr.f32.vlgmr.msra.gmra.mrb[0].mxu0 %v10430_v16  ;;  %8422 = vmatpush3.bf16.msra.mxu1 %v9420_v33 }
 0x172   : > { %868 = vmatprep.mubr.f32.mxu0 %v9909_v9  ;;  %8094 = vmatprep.subr.mxu1 %v9909_v9 }
 0x174   : > { %8092 = vmatmul.mubr.f32.vlgmr.msra.gmra.mrb[0].mxu1 %v10451_v32 }
 0x175   : > { %869 = vmatmul.mubr.f32.gmra.mrb[2].mxu0 %v10451_v32  ;;  %8096 = vmatprep.mubr.msk.f32.mxu1 %vm9910_vm2, %v9909_v9 }
 0x176   : > { %8141 = vmatprep.mubr.msk.f32.mxu0 %vm9910_vm2, %v9909_v9 }
 0x244   : > { %v864_v36 = vpop.f32.mrb[0].mxu0 }
 0x245   : > { %v10463_v37 = vadd.f32 %v6788_v34, %v864_v36  ;;  %v866_v38 = vpop.f32.mrb[1].mxu0 }
 0x246   : > { %v10465_v39 = vadd.f32 %v6789_v35, %v866_v38 }
 0x247   : > { %1297 = vrot.lane.b32.xlu1 %v10463_v37, %s9911_s16  ;;  %v8093_v45 = vpop.f32.mrb[0].mxu1 }
 0x248   : > { %v870_v40 = vpop.f32.mrb[2].mxu0  ;;  %8095 = vmatpush3.xpose.msk.msra.mxu1 %vm971_vm3, %v10465_v39  ;;  %v10488_v46 = vadd.f32 %v8093_v45, %v6790_v44  ;;  %v941_v47 = vpop.f32.mrb[1].mxu1 }
 0x249   : > { %v872_v41 = vpop.f32.mrb[3].mxu0  ;;  %8099 = vmatprep.subr.mxu1 %v9909_v9  ;;  %v10480_v43 = vadd.f32 %v6788_v34, %v870_v40  ;;  %v10490_v48 = vadd.f32 %v6790_v44, %v941_v47 }
 0x24a   : > { %v10472_v42 = vadd.f32 %v6789_v35, %v872_v41 }
 0x24b   : > { %8097 = vmatmul.mubr.msk.f32.vlgmr.msra.gmra.mrb[2].mxu1 %vm971_vm3, %v10463_v37 }
 0x24c   : > { %8100 = vmatpush3.xpose.msk.msra.mxu1 %vm971_vm3, %v10472_v42  ;;  %8101 = vmatprep.mubr.msk.f32.mxu1 %vm9910_vm2, %v9909_v9 }
 0x24d   : > { %8104 = vmatprep.subr.mxu1 %v9909_v9 }
 0x24f   : > { %8102 = vmatmul.mubr.msk.f32.vlgmr.msra.gmra.mrb[4].mxu1 %vm971_vm3, %v10480_v43 }
 0x250   : > { %8106 = vmatprep.mubr.msk.f32.mxu1 %vm9910_vm2, %v9909_v9  ;;  %8105 = vmatpush3.msra.mxu1 %v10490_v48 }
 0x251   : > { %8109 = vmatprep.subr.mxu1 %v9909_v9 }
 0x2b9   : > { %v1298_v6 = vpop.permute.xlu1 %1297 }
 0x31e   : > { %v1044_v49 = vpop.f32.mrb[2].mxu1 }
 0x31f   : > { %v1124_v51 = vmul.f32 0.088388346, %v1044_v49  ;;  %v8098_v52 = vpop.f32.mrb[3].mxu1 }
 0x321   : > { %v1126_v53 = vadd.f32 %v1124_v51, %v10494_v50 }
 0x322   : > { %v1120_v54 = vpop.f32.mrb[4].mxu1 }
 0x323   : > { %v1125_v55 = vmul.f32 0.088388346, %v1120_v54  ;;  %v8103_v56 = vpop.f32.mrb[5].mxu1  ;;  %v1129_v57 = vsel %vm1128_vm4, %v1126_v53, -inf }
 0x324   : > { %1130 = vmax.xlane.f32.xlu0 %v1129_v57 }
 0x325   : > { %v1127_v58 = vadd.f32 %v1125_v55, %v10494_v50 }
 0x327   : > { %v1132_v59 = vsel %vm1128_vm4, %v1127_v58, -inf }
 0x328   : > { %1133 = vmax.xlane.f32.xlu0 %v1132_v59 }
 0x33e   : > { %1299 = vrot.lane.b32.xlu0 %v10465_v39, %s9911_s16 }
 0x3b1   : > { %v1131_v60 = vpop.xlane.xlu0 %1130 }
 0x3b2   : > { %v1135_v61 = vsub.f32 %v1126_v53, %v1131_v60 }
 0x3b4   : > { %v1137_v62 = vmul.f32 1.442695, %v1135_v61 }
 0x3b5   : > { %v1134_v63 = vpop.xlane.xlu0 %1133 }
 0x3b6   : > { %9445 = vpow2.f32 %v1137_v62  ;;  %v1136_v0 = vsub.f32 %v1127_v58, %v1134_v63 }
 0x3b8   : > { %v1139_v1 = vmul.f32 1.442695, %v1136_v0 }
 0x3b9   : > { %v1300_v14 = vpop.permute.xlu0 %1299 }
 0x3ba   : > { %9447 = vpow2.f32 %v1139_v1 }
 0x3c0   : > { %v9446_v2 = vpop.eup %9445 }
 0x3c1   : > { %v1141_v3 = vsel %vm1128_vm4, %v9446_v2, 0.0 }
 0x3c2   : > { %1142 = vadd.xlane.f32.xlu1 %v1141_v3 }
 0x3c4   : > { %v9448_v4 = vpop.eup %9447 }
 0x3c5   : > { %v1144_v5 = vsel %vm1128_vm4, %v9448_v4, 0.0 }
 0x3c6   : > { %1145 = vadd.xlane.f32.xlu1 %v1144_v5 }
 0x3d7   : > { %1377 = vrot.lane.b32.xlu1 %v10472_v42, %s9911_s16 }
 0x3db   : > { %1375 = vrot.lane.b32.xlu1 %v10480_v43, %s9911_s16 }
 0x44f   : > { %v1143_v7 = vpop.xlane.xlu1 %1142 }
 0x450   : > { %9449 = vrcp.f32 %v1143_v7 }
 0x453   : > { %v1146_v8 = vpop.xlane.xlu1 %1145 }
 0x454   : > { %9451 = vrcp.f32 %v1146_v8 }
 0x457   : > { %v1378_v15 = vpop.permute.xlu1 %1377 }
 0x45a   : > { %v9450_v10 = vpop.eup %9449 }
 0x45b   : > { %v1149_v11 = vmul.f32 %v9450_v10, %v9446_v2  ;;  %v1376_v17 = vpop.permute.xlu1 %1375 }
 0x45d   : > { %8107 = vmatmul.mubr.msk.f32.vlgmr.msra.gmra.mrb[6].mxu1 %vm1128_vm4, %v1149_v11 }
 0x45e   : > { %v9452_v12 = vpop.eup %9451  ;;  %8110 = vmatpush3.msra.mxu1 %v10488_v46  ;;  %8111 = vmatprep.mubr.msk.f32.mxu1 %vm9910_vm2, %v9909_v9 }
 0x45f   : > { %v1150_v13 = vmul.f32 %v9452_v12, %v9448_v4  ;;  %8114 = vmatprep.subr.mxu1 %v9909_v9 }
 0x461   : > { %8112 = vmatmul.mubr.msk.f32.vlgmr.msra.gmra.mrb[8].mxu1 %vm1128_vm4, %v1150_v13 }
 0x462   : > { %8116 = vmatprep.mubr.msk.f32.mxu1 %vm9910_vm2, %v9909_v9 }
 0x465   : > { %8115 = vmatpush3.xpose.msk.msra.mxu1 %vm971_vm3, %v1300_v14 }
 0x466   : > { %8119 = vmatprep.subr.mxu1 %v9909_v9 }
 0x468   : > { %8117 = vmatmul.mubr.msk.f32.vlgmr.msra.gmra.mrb[10].mxu1 %vm971_vm3, %v1298_v6 }
 0x469   : > { %8120 = vmatpush3.xpose.msk.msra.mxu1 %vm971_vm3, %v1378_v15  ;;  %8121 = vmatprep.mubr.msk.f32.mxu1 %vm9910_vm2, %v9909_v9 }
 0x46a   : > { %8124 = vmatprep.subr.mxu1 %v9909_v9 }
 0x46c   : > { %8122 = vmatmul.mubr.msk.f32.vlgmr.msra.gmra.mrb[12].mxu1 %vm971_vm3, %v1376_v17 }
 0x46d   : > { %8126 = vmatprep.mubr.msk.f32.mxu1 %vm9910_vm2, %v9909_v9 }
 0x530   : > { %v10526_v18 = vpop.f32.mrb[6].mxu1 }
 0x531   : > { %v8108_v19 = vpop.f32.mrb[7].mxu1 }
 0x534   : > { %v10528_v20 = vpop.f32.mrb[8].mxu1 }
 0x535   : > { %v8113_v21 = vpop.f32.mrb[9].mxu1 }
 0x53b   : > { %v1371_v22 = vpop.f32.mrb[10].mxu1 }
 0x53c   : > { %v1453_v23 = vmul.f32 0.088388346, %v1371_v22  ;;  %v8118_v24 = vpop.f32.mrb[11].mxu1 }
 0x53e   : > { %v1455_v25 = vadd.f32 %v1453_v23, %v10494_v50 }
 0x53f   : > { %v1449_v26 = vpop.f32.mrb[12].mxu1 }
 0x540   : > { %v1454_v27 = vmul.f32 0.088388346, %v1449_v26  ;;  %v8123_v28 = vpop.f32.mrb[13].mxu1  ;;  %v1457_v29 = vsel %vm1128_vm4, %v1455_v25, -inf }
 0x541   : > { %1458 = vmax.xlane.f32.xlu0 %v1457_v29 }
 0x542   : > { %v1456_v30 = vadd.f32 %v1454_v27, %v10494_v50 }
 0x544   : > { %v1460_v31 = vsel %vm1128_vm4, %v1456_v30, -inf }
 0x545   : > { %1461 = vmax.xlane.f32.xlu1 %v1460_v31 }
 0x556   : > { %1557 = vrot.lane.b32.xlu1 %v10488_v46, %s9911_s16 }
 0x55a   : > { %1635 = vrot.lane.b32.xlu1 %v10465_v39, %s9912_s15 }
 0x55e   : > { %1713 = vrot.lane.b32.xlu1 %v10472_v42, %s9912_s15 }
 0x562   : > { %1711 = vrot.lane.b32.xlu1 %v10480_v43, %s9912_s15 }
 0x5ce   : > { %v1459_v33 = vpop.xlane.xlu0 %1458 }
 0x5cf   : > { %v1463_v34 = vsub.f32 %v1455_v25, %v1459_v33 }
 0x5d1   : > { %v1465_v35 = vmul.f32 1.442695, %v1463_v34 }
 0x5d2   : > { %v1462_v36 = vpop.xlane.xlu1 %1461 }
 0x5d3   : > { %9453 = vpow2.f32 %v1465_v35  ;;  %v1464_v49 = vsub.f32 %v1456_v30, %v1462_v36 }
 0x5d5   : > { %v1467_v51 = vmul.f32 1.442695, %v1464_v49 }
 0x5d6   : > { %v1558_v38 = vpop.permute.xlu1 %1557 }
 0x5d7   : > { %9455 = vpow2.f32 %v1467_v51 }
 0x5da   : > { %v1636_v40 = vpop.permute.xlu1 %1635 }
 0x5dd   : > { %v9454_v41 = vpop.eup %9453 }
 0x5de   : > { %v1714_v44 = vpop.permute.xlu1 %1713  ;;  %v1469_v45 = vsel %vm1128_vm4, %v9454_v41, 0.0 }
 0x5df   : > { %1470 = vadd.xlane.f32.xlu0 %v1469_v45  ;;  %8140 = vmatpush3.xpose.msk.msra.mxu0 %vm971_vm3, %v1714_v44 }
 0x5e0   : > { %8149 = vmatprep.subr.mxu0 %v9909_v9 }
 0x5e1   : > { %v9456_v52 = vpop.eup %9455 }
 0x5e2   : > { %v1712_v47 = vpop.permute.xlu1 %1711  ;;  %v1472_v53 = vsel %vm1128_vm4, %v9456_v52, 0.0 }
 0x5e3   : > { %8142 = vmatmul.mubr.msk.f32.vlgmr.msra.gmra.mrb[4].mxu0 %vm971_vm3, %v1712_v47 }
 0x5e4   : > { %8151 = vmatprep.mubr.msk.f32.mxu0 %vm9910_vm2, %v9909_v9 }
 0x5f5   : > { %1480 = vrot.lane.b32.xlu0 %v10490_v48, %s9911_s16 }
 0x614   : > { %1473 = vadd.xlane.f32.xlu0 %v1472_v53 }
 0x62a   : > { %1633 = vrot.lane.b32.xlu0 %v10463_v37, %s9912_s15 }
 0x66c   : > { %v1471_v54 = vpop.xlane.xlu0 %1470 }
 0x66d   : > { %9457 = vrcp.f32 %v1471_v54 }
 0x670   : > { %v1481_v55 = vpop.permute.xlu0 %1480 }
 0x671   : > { %8125 = vmatpush3.msra.mxu1 %v1481_v55 }
 0x672   : > { %8129 = vmatprep.subr.mxu1 %v9909_v9 }
 0x677   : > { %v9458_v56 = vpop.eup %9457 }
 0x678   : > { %v1477_v57 = vmul.f32 %v9458_v56, %v9454_v41 }
 0x67a   : > { %8127 = vmatmul.mubr.msk.f32.vlgmr.msra.gmra.mrb[14].mxu1 %vm1128_vm4, %v1477_v57 }
 0x67b   : > { %8130 = vmatpush3.msra.mxu1 %v1558_v38  ;;  %8131 = vmatprep.mubr.msk.f32.mxu1 %vm9910_vm2, %v9909_v9 }
 0x67c   : > { %8134 = vmatprep.subr.mxu1 %v9909_v9 }
 0x6a1   : > { %v1474_v58 = vpop.xlane.xlu0 %1473 }
 0x6a2   : > { %9459 = vrcp.f32 %v1474_v58 }
 0x6a5   : > { %v1634_v61 = vpop.permute.xlu0 %1633 }
 0x6ac   : > { %v9460_v59 = vpop.eup %9459 }
 0x6ad   : > { %v1478_v60 = vmul.f32 %v9460_v59, %v9456_v52 }
 0x6af   : > { %8132 = vmatmul.mubr.msk.f32.vlgmr.msra.gmra.mrb[16].mxu1 %vm1128_vm4, %v1478_v60 }
 0x6b0   : > { %8135 = vmatpush3.xpose.msk.msra.mxu1 %vm971_vm3, %v1636_v40  ;;  %8136 = vmatprep.mubr.msk.f32.mxu1 %vm9910_vm2, %v9909_v9 }
 0x6b1   : > { %8144 = vmatprep.subr.mxu1 %v9909_v9 }
 0x6b3   : > { %8137 = vmatmul.mubr.msk.f32.vlgmr.msra.gmra.mrb[18].mxu1 %vm971_vm3, %v1634_v61 }
 0x6b4   : > { %8146 = vmatprep.mubr.msk.f32.mxu1 %vm9910_vm2, %v9909_v9 }
 0x6b6   : > { %v1785_v62 = vpop.f32.mrb[4].mxu0 }
 0x6b7   : > { %v1790_v63 = vmul.f32 0.088388346, %v1785_v62  ;;  %v8143_v0 = vpop.f32.mrb[5].mxu0 }
 0x6b9   : > { %v1792_v1 = vadd.f32 %v1790_v63, %v10494_v50 }
 0x6bb   : > { %v1796_v2 = vsel %vm1128_vm4, %v1792_v1, -inf }
 0x6bc   : > { %1797 = vmax.xlane.f32.xlu1 %v1796_v2 }
 0x6cd   : > { %1891 = vrot.lane.b32.xlu1 %v10488_v46, %s9912_s15 }
 0x6d1   : > { %1969 = vrot.lane.b32.xlu1 %v10465_v39, %s9913_s23 }
 0x6d5   : > { %2047 = vrot.lane.b32.xlu1 %v10472_v42, %s9913_s23 }
 0x6d9   : > { %2045 = vrot.lane.b32.xlu1 %v10480_v43, %s9913_s23 }
 0x749   : > { %v1798_v3 = vpop.xlane.xlu1 %1797 }
 0x74a   : > { %v1800_v7 = vsub.f32 %v1792_v1, %v1798_v3 }
 0x74c   : > { %v1803_v8 = vmul.f32 1.442695, %v1800_v7 }
 0x74d   : > { %v1892_v4 = vpop.permute.xlu1 %1891  ;;  %v10576_v5 = vpop.f32.mrb[14].mxu1 }
 0x74e   : > { %v8128_v6 = vpop.f32.mrb[15].mxu1  ;;  %8150 = vmatpush3.msra.mxu0 %v1892_v4  ;;  %9461 = vpow2.f32 %v1803_v8 }
 0x74f   : > { %8159 = vmatprep.subr.mxu0 %v9909_v9 }
 0x751   : > { %v1970_v25 = vpop.permute.xlu1 %1969 }
 0x755   : > { %v2048_v28 = vpop.permute.xlu1 %2047 }
 0x758   : > { %v9462_v15 = vpop.eup %9461 }
 0x759   : > { %v1808_v17 = vsel %vm1128_vm4, %v9462_v15, 0.0  ;;  %v2046_v31 = vpop.permute.xlu1 %2045 }
 0x782   : > { %v1629_v10 = vpop.f32.mrb[16].mxu1 }
 0x783   : > { %v9359_v39 = vpack.i.bf16 %v1629_v10, %v10576_v5  ;;  %v8133_v11 = vpop.f32.mrb[17].mxu1 }
 0x786   : > { %v1707_v12 = vpop.f32.mrb[18].mxu1 }
 0x787   : > { %v1789_v42 = vmul.f32 0.088388346, %v1707_v12  ;;  %v8138_v13 = vpop.f32.mrb[19].mxu1  ;;  %v6864_v12 = vld [vmem:[%s10405_s13] sm:$0xff]  }
 0x788   : > { %v7473_v13 = vld [vmem:[%s10405_s13 + $0x18] sm:$0xff]  }
 0x789   : > { %v1791_v43 = vadd.f32 %v1789_v42, %v10494_v50  ;;  %v7471_v42 = vld [vmem:[%s10405_s13 + $0x8] sm:$0xff]  }
 0x78b   : > { %v1793_v14 = vsel %vm1128_vm4, %v1791_v43, -inf }
 0x78c   : > { %1794 = vmax.xlane.f32.xlu0 %v1793_v14  ;;  %v7475_v14 = vld [vmem:[%s10405_s13 + $0x28] sm:$0xff]  }
 0x790   : > { %1809 = vadd.xlane.f32.xlu0 %v1808_v17  ;;  %v7477_v17 = vld [vmem:[%s10405_s13 + $0x38] sm:$0xff]  }
 0x7a6   : > { %1815 = vrot.lane.b32.xlu0 %v10490_v48, %s9912_s15 }
 0x819   : > { %v1795_v19 = vpop.xlane.xlu0 %1794 }
 0x81a   : > { %v1799_v21 = vsub.f32 %v1791_v43, %v1795_v19  ;;  %v7474_v43 = vld [vmem:[%s10405_s13 + $0x20] sm:$0xff]  }
 0x81c   : > { %v1801_v22 = vmul.f32 1.442695, %v1799_v21 }
 0x81d   : > { %v1810_v23 = vpop.xlane.xlu0 %1809 }
 0x81e   : > { %9463 = vpow2.f32 %v1801_v22 }
 0x81f   : > { %9465 = vrcp.f32 %v1810_v23 }
 0x821   : > { %v1816_v24 = vpop.permute.xlu0 %1815 }
 0x822   : > { %8145 = vmatpush3.msra.mxu1 %v1816_v24 }
 0x823   : > { %8154 = vmatprep.subr.mxu1 %v9909_v9 }
 0x828   : > { %v9464_v26 = vpop.eup %9463 }
 0x829   : > { %v9466_v27 = vpop.eup %9465  ;;  %v1805_v29 = vsel %vm1128_vm4, %v9464_v26, 0.0 }
 0x82a   : > { %v1814_v30 = vmul.f32 %v9466_v27, %v9462_v15  ;;  %1806 = vadd.xlane.f32.xlu0 %v1805_v29  ;;  %v7476_v15 = vld [vmem:[%s10405_s13 + $0x30] sm:$0xff]  }
 0x82c   : > { %8152 = vmatmul.mubr.msk.f32.vlgmr.msra.gmra.mrb[6].mxu0 %vm1128_vm4, %v1814_v30 }
 0x82d   : > { %8160 = vmatpush3.xpose.msk.msra.mxu0 %vm971_vm3, %v2048_v28  ;;  %8161 = vmatprep.mubr.msk.f32.mxu0 %vm9910_vm2, %v9909_v9 }
 0x82e   : > { %8169 = vmatprep.subr.mxu0 %v9909_v9 }
 0x830   : > { %8162 = vmatmul.mubr.msk.f32.vlgmr.msra.gmra.mrb[8].mxu0 %vm971_vm3, %v2046_v31 }
 0x831   : > { %8171 = vmatprep.mubr.msk.f32.mxu0 %vm9910_vm2, %v9909_v9 }
 0x840   : > { %1967 = vrot.lane.b32.xlu0 %v10463_v37, %s9913_s23 }
 0x8b7   : > { %v1807_v33 = vpop.xlane.xlu0 %1806 }
 0x8b8   : > { %9467 = vrcp.f32 %v1807_v33 }
 0x8bb   : > { %v1968_v36 = vpop.permute.xlu0 %1967 }
 0x8c2   : > { %v9468_v34 = vpop.eup %9467 }
 0x8c3   : > { %v1813_v35 = vmul.f32 %v9468_v34, %v9464_v26 }
 0x8c5   : > { %8147 = vmatmul.mubr.msk.f32.vlgmr.msra.gmra.mrb[20].mxu1 %vm1128_vm4, %v1813_v35 }
 0x8c6   : > { %8155 = vmatpush3.xpose.msk.msra.mxu1 %vm971_vm3, %v1970_v25  ;;  %8156 = vmatprep.mubr.msk.f32.mxu1 %vm9910_vm2, %v9909_v9 }
 0x8c7   : > { %8164 = vmatprep.subr.mxu1 %v9909_v9 }
 0x8c9   : > { %8157 = vmatmul.mubr.msk.f32.vlgmr.msra.gmra.mrb[22].mxu1 %vm971_vm3, %v1968_v36 }
 0x8ca   : > { %8166 = vmatprep.mubr.msk.f32.mxu1 %vm9910_vm2, %v9909_v9 }
 0x8ff   : > { %v1963_v37 = vpop.f32.mrb[6].mxu0 }
 0x900   : > { %v8153_v38 = vpop.f32.mrb[7].mxu0 }
 0x903   : > { %v2119_v40 = vpop.f32.mrb[8].mxu0 }
 0x904   : > { %v2124_v41 = vmul.f32 0.088388346, %v2119_v40  ;;  %v8163_v44 = vpop.f32.mrb[9].mxu0 }
 0x906   : > { %v2126_v45 = vadd.f32 %v2124_v41, %v10494_v50 }
 0x908   : > { %v2130_v47 = vsel %vm1128_vm4, %v2126_v45, -inf }
 0x909   : > { %2131 = vmax.xlane.f32.xlu1 %v2130_v47 }
 0x91a   : > { %2225 = vrot.lane.b32.xlu1 %v10488_v46, %s9913_s23 }
 0x91e   : > { %9360 = vrot.lane.b32.xlu1 %v9359_v39, %s9913_s23 }
 0x996   : > { %v2132_v49 = vpop.xlane.xlu1 %2131 }
 0x997   : > { %v2134_v51 = vsub.f32 %v2126_v45, %v2132_v49  ;;  %v9421_v49 = vld [vmem:[%s10409_s22 + $0x4] ss:$8 sps:$4 sm:$0xff]  }
 0x998   : > { %v1887_v52 = vpop.f32.mrb[20].mxu1 }
 0x999   : > { %v2137_v53 = vmul.f32 1.442695, %v2134_v51  ;;  %v9364_v54 = vpack.i.bf16 %v1963_v37, %v1887_v52  ;;  %v8148_v55 = vpop.f32.mrb[21].mxu1  ;;  %v9423_v51 = vld [vmem:[%s10409_s22] ss:$8 sps:$4 sm:$0xff]  }
 0x99a   : > { %v2226_v56 = vpop.permute.xlu1 %2225  ;;  %v6896_v52 = vld [vmem:[%s10407_s11] sm:$0xff]   ;;  %v9426_v55 = vld [vmem:[%s10409_s22 + $0x10] ss:$8 sps:$4 sm:$0xff]  }
 0x99b   : > { %9469 = vpow2.f32 %v2137_v53  ;;  %8170 = vmatpush3.msra.mxu0 %v2226_v56  ;;  %9365 = vrot.lane.b32.xlu1 %v9364_v54, %s9912_s15  ;;  %v9424_v53 = vld [vmem:[%s10409_s22 + $0x14] ss:$8 sps:$4 sm:$0xff]   ;;  %v7478_v54 = vld [vmem:[%s10407_s11 + $0x8] sm:$0xff]  }
 0x99c   : > { %v2041_v57 = vpop.f32.mrb[22].mxu1  ;;  %8456 = vmatprep.subr.bf16.mxu0 %v6896_v52  ;;  %v9427_v56 = vld [vmem:[%s10409_s22 + $0x24] ss:$8 sps:$4 sm:$0xff]  }
 0x99d   : > { %v2123_v58 = vmul.f32 0.088388346, %v2041_v57  ;;  %v8158_v59 = vpop.f32.mrb[23].mxu1 }
 0x99e   : > { %v9361_v23 = vpop.permute.xlu1 %9360 }
 0x99f   : > { %v2125_v60 = vadd.f32 %v2123_v58, %v10494_v50  ;;  %v9363_v25 = vunpack.i.h.bf16 %v9361_v23  ;;  %v9362_v26 = vunpack.i.l.bf16 %v9361_v23  ;;  %v6816_v23 = vld [vmem:[%s10403_s12 + $0x8] ss:$0 sm:$0xff] }
 0x9a1   : > { %v2127_v46 = vsel %vm1128_vm4, %v2125_v60, -inf  ;;  %v2326_v30 = vsel %vm971_vm3, %v10528_v20, %v9363_v25  ;;  %v2325_v34 = vsel %vm971_vm3, %v10526_v18, %v9362_v26  ;;  %v6815_v20 = vld [vmem:[%s10403_s12 + $0x3] ss:$0 sm:$0xff]  ;;  %v6817_v25 = vld [vmem:[%s10403_s12 + $0x9] ss:$0 sm:$0xff] }
 0x9a2   : > { %2128 = vmax.xlane.f32.xlu0 %v2127_v46 }
 0x9a5   : > { %v9470_v61 = vpop.eup %9469 }
 0x9a6   : > { %v2142_v62 = vsel %vm1128_vm4, %v9470_v61, 0.0 }
 0x9a7   : > { %2143 = vadd.xlane.f32.xlu0 %v2142_v62 }
 0xa0d   : > { %v9366_v24 = vpop.permute.xlu1 %9365 }
 0xa0e   : > { %v9368_v27 = vunpack.i.h.bf16 %v9366_v24  ;;  %v9367_v28 = vunpack.i.l.bf16 %v9366_v24 }
 0xa10   : > { %v2328_v35 = vsel %vm2327_vm5, %v2325_v34, %v9367_v28  ;;  %v2329_v36 = vsel %vm2327_vm5, %v2326_v30, %v9368_v27 }
 0xa2f   : > { %v2129_v63 = vpop.xlane.xlu0 %2128 }
 0xa30   : > { %v2133_v0 = vsub.f32 %v2125_v60, %v2129_v63  ;;  %v7479_v63 = vld [vmem:[%s10407_s11 + $0x10] sm:$0xff]  }
 0xa32   : > { %v2135_v1 = vmul.f32 1.442695, %v2133_v0  ;;  %v9430_v0 = vld [vmem:[%s10409_s22 + $0x34] ss:$8 sps:$4 sm:$0xff]  }
 0xa34   : > { %9471 = vpow2.f32 %v2135_v1  ;;  %v2144_v2 = vpop.xlane.xlu0 %2143  ;;  %v9432_v1 = vld [vmem:[%s10409_s22 + $0x30] ss:$8 sps:$4 sm:$0xff]  }
 0xa35   : > { %9473 = vrcp.f32 %v2144_v2  ;;  %v7480_v2 = vld [vmem:[%s10407_s11 + $0x18] sm:$0xff]  }
 0xa3e   : > { %v9472_v3 = vpop.eup %9471 }
 0xa3f   : > { %v9474_v4 = vpop.eup %9473  ;;  %v2139_v5 = vsel %vm1128_vm4, %v9472_v3, 0.0 }
 0xa40   : > { %v2148_v50 = vmul.f32 %v9474_v4, %v9470_v61  ;;  %2140 = vadd.xlane.f32.xlu0 %v2139_v5  ;;  %v9435_v4 = vld [vmem:[%s10409_s22 + $0x40] ss:$8 sps:$4 sm:$0xff]  }
 0xa41   : > { %v7481_v5 = vld [vmem:[%s10407_s11 + $0x20] sm:$0xff]  }
 0xa42   : > { %8172 = vmatmul.mubr.msk.f32.vlgmr.msra.gmra.mrb[10].mxu0 %vm1128_vm4, %v2148_v50  ;;  %v9436_v50 = vld [vmem:[%s10409_s22 + $0x54] ss:$8 sps:$4 sm:$0xff]  }
 0xa43   : > { %8458 = vmatpush3.bf16.msra.mxu0 %v6896_v52 }
 0xa44   : > { %8460 = vmatprep.subr.bf16.mxu0 %v7478_v54 }
 0xa47   : > { %8462 = vmatpush3.bf16.msra.mxu0 %v7478_v54 }
 0xa48   : > { %8464 = vmatprep.subr.bf16.mxu0 %v7479_v63 }
 0xa4b   : > { %8466 = vmatpush3.bf16.msra.mxu0 %v7479_v63 }
 0xa4c   : > { %8468 = vmatprep.subr.bf16.mxu0 %v7480_v2 }
 0xa4f   : > { %8470 = vmatpush3.bf16.msra.mxu0 %v7480_v2 }
 0xa50   : > { %8472 = vmatprep.subr.bf16.mxu0 %v7481_v5 }
 0xa53   : > { %8474 = vmatpush3.bf16.msra.mxu0 %v7481_v5 }
 0xa56   : > { %2149 = vrot.lane.b32.xlu0 %v10490_v48, %s9913_s23  ;;  %v7472_v48 = vld [vmem:[%s10405_s13 + $0x10] sm:$0xff]  }
 0xacd   : > { %v2141_v6 = vpop.xlane.xlu0 %2140 }
 0xace   : > { %9475 = vrcp.f32 %v2141_v6  ;;  %v9438_v6 = vld [vmem:[%s10409_s22 + $0x50] ss:$8 sps:$4 sm:$0xff]  }
 0xad1   : > { %v2150_v7 = vpop.permute.xlu0 %2149 }
 0xad2   : > { %8165 = vmatpush3.msra.mxu1 %v2150_v7  ;;  %v7482_v7 = vld [vmem:[%s10407_s11 + $0x28] sm:$0xff]  }
 0xad3   : > { %8424 = vmatprep.subr.bf16.mxu1 %v6864_v12  ;;  %8476 = vmatprep.subr.bf16.mxu0 %v7482_v7 }
 0xad4   : > { %8478 = vmatpush3.bf16.msra.mxu0 %v7482_v7 }
 0xad8   : > { %v9476_v8 = vpop.eup %9475 }
 0xad9   : > { %v2147_v10 = vmul.f32 %v9476_v8, %v9472_v3  ;;  %v9433_v3 = vld [vmem:[%s10409_s22 + $0x44] ss:$8 sps:$4 sm:$0xff]  }
 0xada   : > { %v9439_v8 = vld [vmem:[%s10409_s22 + $0x64] ss:$8 sps:$4 sm:$0xff]  }
 0xadb   : > { %8167 = vmatmul.mubr.msk.f32.vlgmr.msra.gmra.mrb[24].mxu1 %vm1128_vm4, %v2147_v10  ;;  %v9441_v10 = vld [vmem:[%s10409_s22 + $0x60] ss:$8 sps:$4 sm:$0xff]  }
 0xadc   : > { %8426 = vmatpush3.bf16.msra.mxu1 %v6864_v12  ;;  %v9444_v12 = vld [vmem:[%s10409_s22 + $0x70] ss:$8 sps:$4 sm:$0xff]  }
 0xadd   : > { %8428 = vmatprep.subr.bf16.mxu1 %v7471_v42 }
 0xae0   : > { %8430 = vmatpush3.bf16.msra.mxu1 %v7471_v42  ;;  %v7484_v42 = vld [vmem:[%s10407_s11 + $0x38] sm:$0xff]  }
 0xae1   : > { %8432 = vmatprep.subr.bf16.mxu1 %v7472_v48 }
 0xae4   : > { %8434 = vmatpush3.bf16.msra.mxu1 %v7472_v48  ;;  %v715_v48 = vld [vmem:[#allocation6] sm:$0xff] }
 0xae5   : > { %8436 = vmatprep.subr.bf16.mxu1 %v7473_v13 }
 0xae8   : > { %8438 = vmatpush3.bf16.msra.mxu1 %v7473_v13  ;;  %v716_v13 = vld [vmem:[#allocation6 + $0x8] sm:$0xff] }
 0xae9   : > { %8440 = vmatprep.subr.bf16.mxu1 %v7474_v43 }
 0xaec   : > { %8442 = vmatpush3.bf16.msra.mxu1 %v7474_v43 }
 0xaed   : > { %8444 = vmatprep.subr.bf16.mxu1 %v7475_v14 }
 0xaf0   : > { %8446 = vmatpush3.bf16.msra.mxu1 %v7475_v14 }
 0xaf1   : > { %8448 = vmatprep.subr.bf16.mxu1 %v7476_v15 }
 0xaf4   : > { %8450 = vmatpush3.bf16.msra.mxu1 %v7476_v15 }
 0xaf5   : > { %8452 = vmatprep.subr.bf16.mxu1 %v7477_v17 }
 0xaf8   : > { %8454 = vmatpush3.bf16.msra.mxu1 %v7477_v17 }
 0xaf9   : > { %8488 = vmatprep.subr.bf16.mxu1 %v9421_v49 }
 0xb15   : > { %v2297_v39 = vpop.f32.mrb[10].mxu0 }
 0xb16   : > { %v8173_v11 = vpop.f32.mrb[11].mxu0 }
 0xb17   : > { %v9442_v11 = vld [vmem:[%s10409_s22 + $0x74] ss:$8 sps:$4 sm:$0xff]  }
 0xbae   : > { %v2221_v19 = vpop.f32.mrb[24].mxu1 }
 0xbaf   : > { %v9369_v21 = vpack.i.bf16 %v2297_v39, %v2221_v19  ;;  %v8168_v22 = vpop.f32.mrb[25].mxu1  ;;  %v7483_v39 = vld [vmem:[%s10407_s11 + $0x30] sm:$0xff]  }
 0xbb0   : > { %8480 = vmatprep.subr.bf16.mxu0 %v7483_v39 }
 0xbb1   : > { %9370 = vrot.lane.b32.xlu0 %v9369_v21, %s9911_s16  ;;  %8482 = vmatpush3.bf16.msra.mxu0 %v7483_v39 }
 0xbb2   : > { %8484 = vmatprep.subr.bf16.mxu0 %v7484_v42 }
 0xbb5   : > { %8486 = vmatpush3.bf16.msra.mxu0 %v7484_v42 }
 0xbb6   : > { %8244 = vmatprep.subr.mxu0 %v9909_v9 }
 0xc23   : > { %v9371_v29 = vpop.permute.xlu0 %9370 }
 0xc24   : > { %v9373_v31 = vunpack.i.h.bf16 %v9371_v29  ;;  %v9372_v33 = vunpack.i.l.bf16 %v9371_v29 }
 0xc26   : > { %v2331_v37 = vsel %vm2330_vm6, %v2328_v35, %v9372_v33  ;;  %v2332_v38 = vsel %vm2330_vm6, %v2329_v36, %v9373_v31  ;;  %v6819_v33 = vld [vmem:[%s10403_s12 + $0x5] ss:$0 sm:$0xff] }
 0xc27   : > { %8206 = vmatprep.mubr.f32.mxu1 %v2331_v37 }
 0xc28   : > { %8207 = vmatmul.mubr.f32.vlgmr.msra.gmra.mrb[26].mxu1 %v2332_v38  ;;  %v6820_v38 = vld [vmem:[%s10403_s12 + $0x6] ss:$0 sm:$0xff] }
 0xc29   : > { %2708 = vmatprep.mubr.f32.mxu1 %v9909_v9  ;;  %8490 = vmatpush1.bf16.msra.mxu1 %v9423_v51 }
 0xc2a   : > { %8492 = vmatprep.subr.bf16.mxu1 %v9424_v53 }
 0xc2d   : > { %8494 = vmatpush1.bf16.msra.mxu1 %v9426_v55 }
 0xc2e   : > { %8496 = vmatprep.subr.bf16.mxu1 %v9427_v56 }
 0xcfb   : > { %v8208_v40 = vpop.f32.mrb[26].mxu1 }
 0xcfc   : > { %v2442_v18 = vadd.f32 %v8208_v40, %v6815_v20  ;;  %v2436_v41 = vpop.f32.mrb[27].mxu1 }
 0xcfd   : > { %v2437_v44 = vadd.f32 %v6815_v20, %v2436_v41  ;;  %v6818_v41 = vld [vmem:[%s10403_s12 + $0x4] ss:$0 sm:$0xff] }
 0xcfe   : > { %v2446_v45 = vadd.f32 %v2442_v18, %v10451_v32 }
 0xcff   : > { %v2445_v47 = vadd.f32 %v2437_v44, %v10430_v16  ;;  %v9429_v16 = vld [vmem:[%s10409_s22 + $0x20] ss:$8 sps:$4 sm:$0xff]  }
 0xd00   : > { %2451 = vadd.xlane.f32.xlu0 %v2446_v45  ;;  %8498 = vmatpush1.bf16.msra.mxu1 %v9429_v16 }
 0xd01   : > { %2449 = vadd.xlane.f32.xlu1 %v2445_v47  ;;  %8500 = vmatprep.subr.bf16.mxu1 %v9430_v0 }
 0xd04   : > { %8502 = vmatpush1.bf16.msra.mxu1 %v9432_v1 }
 0xd05   : > { %8504 = vmatprep.subr.bf16.mxu1 %v9433_v3 }
 0xd08   : > { %8506 = vmatpush1.bf16.msra.mxu1 %v9435_v4 }
 0xd09   : > { %8508 = vmatprep.subr.bf16.mxu1 %v9436_v50 }
 0xd0c   : > { %8510 = vmatpush1.bf16.msra.mxu1 %v9438_v6 }
 0xd0d   : > { %8512 = vmatprep.subr.bf16.mxu1 %v9439_v8 }
 0xd10   : > { %8514 = vmatpush1.bf16.msra.mxu1 %v9441_v10 }
 0xd11   : > { %8516 = vmatprep.subr.bf16.mxu1 %v9442_v11 }
 0xd14   : > { %8518 = vmatpush1.bf16.msra.mxu1 %v9444_v12 }
 0xd15   : > { %8289 = vmatprep.subr.mxu1 %v9909_v9 }
 0xd17   : > { %2709 = vmatmul.mubr.f32.vlgmr.msra.gmra.mrb[28].mxu1 %v715_v48 }
 0xd18   : > { %2714 = vmatprep.mubr.f32.mxu1 %v9909_v9 }
 0xd1b   : > { %2715 = vmatmul.mubr.f32.gmra.mrb[30].mxu1 %v716_v13 }
 0xd1c   : > { %8291 = vmatprep.mubr.msk.f32.mxu1 %vm9910_vm2, %v9909_v9 }
 0xd8d   : > { %v2452_v32 = vpop.xlane.xlu0 %2451 }
 0xd8e   : > { %v2450_v57 = vpop.xlane.xlu1 %2449  ;;  %v2455_v58 = vmul.f32 0.0078125, %v2452_v32 }
 0xd8f   : > { %v2454_v59 = vmul.f32 0.0078125, %v2450_v57 }
 0xd90   : > { %v10648_v46 = vsub.f32 %v2446_v45, %v2455_v58 }
 0xd91   : > { %v2456_v60 = vsub.f32 %v2445_v47, %v2454_v59 }
 0xd92   : > { %v2459_v62 = vmul.f32 %v10648_v46, %v10648_v46 }
 0xd93   : > { %v2458_v61 = vmul.f32 %v2456_v60, %v2456_v60 }
 0xd95   : > { %2460 = vadd.xlane.f32.xlu0 %v2458_v61 }
 0xd99   : > { %2462 = vadd.xlane.f32.xlu0 %v2459_v62 }
 0xdea   : > { %v2710_v34 = vpop.f32.mrb[28].mxu1 }
 0xdeb   : > { %v10685_v35 = vadd.f32 %v6819_v33, %v2710_v34  ;;  %v2712_v36 = vpop.f32.mrb[29].mxu1 }
 0xdec   : > { %v10707_v51 = vadd.f32 %v6820_v38, %v2712_v36 }
 0xdee   : > { %v2716_v37 = vpop.f32.mrb[30].mxu1 }
 0xdef   : > { %v10691_v20 = vadd.f32 %v6819_v33, %v2716_v37  ;;  %v2718_v40 = vpop.f32.mrb[31].mxu1 }
 0xdf0   : > { %v10693_v18 = vadd.f32 %v6820_v38, %v2718_v40 }
 0xe22   : > { %v2461_v43 = vpop.xlane.xlu0 %2460 }
 0xe23   : > { %v2464_v14 = vmul.f32 0.0078125, %v2461_v43 }
 0xe25   : > { %v2466_v15 = vadd.f32 1e-05, %v2464_v14 }
 0xe26   : > { %v2463_v17 = vpop.xlane.xlu0 %2462 }
 0xe27   : > { %9477 = vrsqrt.f32 %v2466_v15  ;;  %v2465_v19 = vmul.f32 0.0078125, %v2463_v17 }
 0xe29   : > { %v2467_v21 = vadd.f32 1e-05, %v2465_v19 }
 0xe2b   : > { %9479 = vrsqrt.f32 %v2467_v21 }
 0xe31   : > { %v9478_v22 = vpop.eup %9477 }
 0xe32   : > { %v2470_v24 = vmul.f32 %v9478_v22, %v2456_v60 }
 0xe34   : > { %v2476_v26 = vmul.f32 %v6816_v23, %v2470_v24 }
 0xe35   : > { %v9480_v27 = vpop.eup %9479 }
 0xe36   : > { %v2471_v28 = vmul.f32 %v9480_v27, %v10648_v46  ;;  %v10676_v29 = vadd.f32 %v6817_v25, %v2476_v26 }
 0xe38   : > { %v2477_v30 = vmul.f32 %v6816_v23, %v2471_v28  ;;  %8241 = vmatprep.mubr.f32.mxu0 %v10676_v29 }
 0xe3a   : > { %v10679_v31 = vadd.f32 %v6817_v25, %v2477_v30 }
 0xe3c   : > { %8242 = vmatmul.mubr.f32.vlgmr.msra.gmra.mrb[12].mxu0 %v10679_v31 }
 0xe3d   : > { %8246 = vmatprep.mubr.msk.f32.mxu0 %vm9910_vm2, %v9909_v9  ;;  %8245 = vmatpush3.xpose.msk.msra.mxu0 %vm971_vm3, %v10685_v35 }
 0xe3e   : > { %8249 = vmatprep.subr.mxu0 %v9909_v9 }
 0xf0f   : > { %v8243_v44 = vpop.f32.mrb[12].mxu0 }
 0xf10   : > { %v2587_v45 = vpop.f32.mrb[13].mxu0  ;;  %v10704_v49 = vadd.f32 %v8243_v44, %v6818_v41 }
 0xf11   : > { %v10696_v47 = vadd.f32 %v6818_v41, %v2587_v45 }
 0xf13   : > { %8247 = vmatmul.mubr.msk.f32.vlgmr.msra.gmra.mrb[14].mxu0 %vm971_vm3, %v10696_v47 }
 0xf14   : > { %8250 = vmatpush3.xpose.msk.msra.mxu0 %vm971_vm3, %v10691_v20  ;;  %8251 = vmatprep.mubr.msk.f32.mxu0 %vm9910_vm2, %v9909_v9 }
 0xf15   : > { %8254 = vmatprep.subr.mxu0 %v9909_v9 }
 0xf17   : > { %8252 = vmatmul.mubr.msk.f32.vlgmr.msra.gmra.mrb[16].mxu0 %vm971_vm3, %v10704_v49 }
 0xf18   : > { %8255 = vmatpush3.msra.mxu0 %v10707_v51  ;;  %8256 = vmatprep.mubr.msk.f32.mxu0 %vm9910_vm2, %v9909_v9 }
 0xf19   : > { %8259 = vmatprep.subr.mxu0 %v9909_v9 }
 0xfe6   : > { %v2807_v52 = vpop.f32.mrb[14].mxu0 }
 0xfe7   : > { %v2887_v53 = vmul.f32 0.088388346, %v2807_v52  ;;  %v8248_v54 = vpop.f32.mrb[15].mxu0 }
 0xfe9   : > { %v2889_v55 = vsel %vm1128_vm4, %v2887_v53, -inf }
 0xfea   : > { %2890 = vmax.xlane.f32.xlu1 %v2889_v55  ;;  %v2883_v56 = vpop.f32.mrb[16].mxu0 }
 0xfeb   : > { %v2888_v16 = vmul.f32 0.088388346, %v2883_v56  ;;  %v8253_v32 = vpop.f32.mrb[17].mxu0 }
 0xfed   : > { %v2892_v57 = vsel %vm1128_vm4, %v2888_v16, -inf }
 0xfee   : > { %2893 = vmax.xlane.f32.xlu0 %v2892_v57 }
0x1077   : > { %v2891_v58 = vpop.xlane.xlu1 %2890 }
0x1078   : > { %v2895_v59 = vsub.f32 %v2887_v53, %v2891_v58 }
0x107a   : > { %v2897_v60 = vmul.f32 1.442695, %v2895_v59 }
0x107b   : > { %v2894_v46 = vpop.xlane.xlu0 %2893 }
0x107c   : > { %9481 = vpow2.f32 %v2897_v60  ;;  %v2896_v61 = vsub.f32 %v2888_v16, %v2894_v46 }
0x107e   : > { %v2899_v62 = vmul.f32 1.442695, %v2896_v61 }
0x1080   : > { %9483 = vpow2.f32 %v2899_v62 }
0x1086   : > { %v9482_v63 = vpop.eup %9481 }
0x1087   : > { %v2901_v0 = vsel %vm1128_vm4, %v9482_v63, 0.0 }
0x1088   : > { %2902 = vadd.xlane.f32.xlu1 %v2901_v0 }
0x108a   : > { %v9484_v1 = vpop.eup %9483 }
0x108b   : > { %v2904_v2 = vsel %vm1128_vm4, %v9484_v1, 0.0 }
0x108c   : > { %2905 = vadd.xlane.f32.xlu0 %v2904_v2 }
0x1099   : > { %3059 = vrot.lane.b32.xlu1 %v10685_v35, %s9911_s16 }
0x109d   : > { %3137 = vrot.lane.b32.xlu1 %v10691_v20, %s9911_s16 }
0x10a1   : > { %3135 = vrot.lane.b32.xlu1 %v10704_v49, %s9911_s16 }
0x10a2   : > { %3057 = vrot.lane.b32.xlu0 %v10696_v47, %s9911_s16 }
0x1115   : > { %v2903_v3 = vpop.xlane.xlu1 %2902 }
0x1116   : > { %9485 = vrcp.f32 %v2903_v3 }
0x1119   : > { %v2906_v4 = vpop.xlane.xlu0 %2905  ;;  %v3060_v7 = vpop.permute.xlu1 %3059 }
0x111a   : > { %9487 = vrcp.f32 %v2906_v4 }
0x111d   : > { %v3138_v10 = vpop.permute.xlu1 %3137  ;;  %v3058_v39 = vpop.permute.xlu0 %3057 }
0x1120   : > { %v9486_v5 = vpop.eup %9485 }
0x1121   : > { %v2909_v50 = vmul.f32 %v9486_v5, %v9482_v63  ;;  %v3136_v11 = vpop.permute.xlu1 %3135 }
0x1123   : > { %8257 = vmatmul.mubr.msk.f32.vlgmr.msra.gmra.mrb[18].mxu0 %vm1128_vm4, %v2909_v50 }
0x1124   : > { %v9488_v6 = vpop.eup %9487  ;;  %8260 = vmatpush3.msra.mxu0 %v10693_v18  ;;  %8261 = vmatprep.mubr.msk.f32.mxu0 %vm9910_vm2, %v9909_v9 }
0x1125   : > { %v2910_v8 = vmul.f32 %v9488_v6, %v9484_v1  ;;  %8264 = vmatprep.subr.mxu0 %v9909_v9 }
0x1127   : > { %8262 = vmatmul.mubr.msk.f32.vlgmr.msra.gmra.mrb[20].mxu0 %vm1128_vm4, %v2910_v8 }
0x1128   : > { %8266 = vmatprep.mubr.msk.f32.mxu0 %vm9910_vm2, %v9909_v9 }
0x112b   : > { %8265 = vmatpush3.xpose.msk.msra.mxu0 %vm971_vm3, %v3060_v7 }
0x112c   : > { %8269 = vmatprep.subr.mxu0 %v9909_v9 }
0x112e   : > { %8267 = vmatmul.mubr.msk.f32.vlgmr.msra.gmra.mrb[22].mxu0 %vm971_vm3, %v3058_v39 }
0x112f   : > { %8270 = vmatpush3.xpose.msk.msra.mxu0 %vm971_vm3, %v3138_v10  ;;  %8271 = vmatprep.mubr.msk.f32.mxu0 %vm9910_vm2, %v9909_v9 }
0x1130   : > { %8274 = vmatprep.subr.mxu0 %v9909_v9 }
0x1132   : > { %8272 = vmatmul.mubr.msk.f32.vlgmr.msra.gmra.mrb[24].mxu0 %vm971_vm3, %v3136_v11 }
0x1133   : > { %8276 = vmatprep.mubr.msk.f32.mxu0 %vm9910_vm2, %v9909_v9 }
0x11f6   : > { %v10745_v12 = vpop.f32.mrb[18].mxu0 }
0x11f7   : > { %v8258_v42 = vpop.f32.mrb[19].mxu0 }
0x11fa   : > { %v10747_v48 = vpop.f32.mrb[20].mxu0 }
0x11fb   : > { %v8263_v13 = vpop.f32.mrb[21].mxu0 }
0x1201   : > { %v3131_v43 = vpop.f32.mrb[22].mxu0 }
0x1202   : > { %v3213_v14 = vmul.f32 0.088388346, %v3131_v43  ;;  %v8268_v15 = vpop.f32.mrb[23].mxu0 }
0x1204   : > { %v3215_v17 = vsel %vm1128_vm4, %v3213_v14, -inf }
0x1205   : > { %3216 = vmax.xlane.f32.xlu1 %v3215_v17  ;;  %v3209_v19 = vpop.f32.mrb[24].mxu0 }
0x1206   : > { %v3214_v21 = vmul.f32 0.088388346, %v3209_v19  ;;  %v8273_v22 = vpop.f32.mrb[25].mxu0 }
0x1208   : > { %v3218_v23 = vsel %vm1128_vm4, %v3214_v21, -inf }
0x1209   : > { %3219 = vmax.xlane.f32.xlu0 %v3218_v23 }
0x1216   : > { %3238 = vrot.lane.b32.xlu1 %v10707_v51, %s9911_s16 }
0x121a   : > { %3393 = vrot.lane.b32.xlu1 %v10685_v35, %s9912_s15 }
0x121e   : > { %3471 = vrot.lane.b32.xlu1 %v10691_v20, %s9912_s15 }
0x1222   : > { %3391 = vrot.lane.b32.xlu1 %v10696_v47, %s9912_s15 }
0x1292   : > { %v3217_v24 = vpop.xlane.xlu1 %3216 }
0x1293   : > { %v3221_v25 = vsub.f32 %v3213_v14, %v3217_v24 }
0x1295   : > { %v3223_v26 = vmul.f32 1.442695, %v3221_v25 }
0x1296   : > { %v3239_v27 = vpop.permute.xlu1 %3238  ;;  %v3220_v28 = vpop.xlane.xlu0 %3219 }
0x1297   : > { %9489 = vpow2.f32 %v3223_v26  ;;  %v3222_v30 = vsub.f32 %v3214_v21, %v3220_v28  ;;  %8275 = vmatpush3.msra.mxu0 %v3239_v27 }
0x1298   : > { %8279 = vmatprep.subr.mxu0 %v9909_v9 }
0x1299   : > { %v3225_v33 = vmul.f32 1.442695, %v3222_v30 }
0x129a   : > { %v3394_v34 = vpop.permute.xlu1 %3393 }
0x129b   : > { %9491 = vpow2.f32 %v3225_v33 }
0x129e   : > { %v3472_v36 = vpop.permute.xlu1 %3471 }
0x129f   : > { %8290 = vmatpush3.xpose.msk.msra.mxu1 %vm971_vm3, %v3472_v36 }
0x12a0   : > { %8299 = vmatprep.subr.mxu1 %v9909_v9 }
0x12a1   : > { %v9490_v37 = vpop.eup %9489 }
0x12a2   : > { %v3227_v38 = vsel %vm1128_vm4, %v9490_v37, 0.0  ;;  %v3392_v32 = vpop.permute.xlu1 %3391 }
0x12a3   : > { %3228 = vadd.xlane.f32.xlu0 %v3227_v38 }
0x12a5   : > { %v9492_v40 = vpop.eup %9491 }
0x12a6   : > { %v3230_v41 = vsel %vm1128_vm4, %v9492_v40, 0.0 }
0x12a7   : > { %3231 = vadd.xlane.f32.xlu0 %v3230_v41 }
0x12bd   : > { %3315 = vrot.lane.b32.xlu0 %v10693_v18, %s9911_s16 }
0x12c1   : > { %3469 = vrot.lane.b32.xlu0 %v10704_v49, %s9912_s15 }
0x1330   : > { %v3229_v44 = vpop.xlane.xlu0 %3228 }
0x1331   : > { %9493 = vrcp.f32 %v3229_v44 }
0x1334   : > { %v3232_v45 = vpop.xlane.xlu0 %3231 }
0x1335   : > { %9495 = vrcp.f32 %v3232_v45 }
0x1338   : > { %v3316_v52 = vpop.permute.xlu0 %3315 }
0x133b   : > { %v9494_v53 = vpop.eup %9493 }
0x133c   : > { %v3235_v54 = vmul.f32 %v9494_v53, %v9490_v37  ;;  %v3470_v55 = vpop.permute.xlu0 %3469 }
0x133d   : > { %8292 = vmatmul.mubr.msk.f32.vlgmr.msra.gmra.mrb[32].mxu1 %vm971_vm3, %v3470_v55 }
0x133e   : > { %8277 = vmatmul.mubr.msk.f32.vlgmr.msra.gmra.mrb[26].mxu0 %vm1128_vm4, %v3235_v54  ;;  %8301 = vmatprep.mubr.msk.f32.mxu1 %vm9910_vm2, %v9909_v9 }
0x133f   : > { %v9496_v56 = vpop.eup %9495  ;;  %8280 = vmatpush3.msra.mxu0 %v3316_v52  ;;  %8281 = vmatprep.mubr.msk.f32.mxu0 %vm9910_vm2, %v9909_v9 }
0x1340   : > { %v3236_v16 = vmul.f32 %v9496_v56, %v9492_v40  ;;  %8284 = vmatprep.subr.mxu0 %v9909_v9 }
0x1342   : > { %8282 = vmatmul.mubr.msk.f32.vlgmr.msra.gmra.mrb[28].mxu0 %vm1128_vm4, %v3236_v16 }
0x1343   : > { %8286 = vmatprep.mubr.msk.f32.mxu0 %vm9910_vm2, %v9909_v9 }
0x1346   : > { %8285 = vmatpush3.xpose.msk.msra.mxu0 %vm971_vm3, %v3394_v34 }
0x1347   : > { %8294 = vmatprep.subr.mxu0 %v9909_v9 }
0x1349   : > { %8287 = vmatmul.mubr.msk.f32.vlgmr.msra.gmra.mrb[30].mxu0 %vm971_vm3, %v3392_v32 }
0x134a   : > { %8296 = vmatprep.mubr.msk.f32.mxu0 %vm9910_vm2, %v9909_v9 }
0x1410   : > { %v3543_v57 = vpop.f32.mrb[32].mxu1 }
0x1411   : > { %v3548_v58 = vmul.f32 0.088388346, %v3543_v57  ;;  %v10783_v59 = vpop.f32.mrb[26].mxu0  ;;  %v8293_v60 = vpop.f32.mrb[33].mxu1 }
0x1412   : > { %v8278_v46 = vpop.f32.mrb[27].mxu0 }
0x1413   : > { %v3552_v61 = vsel %vm1128_vm4, %v3548_v58, -inf }
0x1414   : > { %3553 = vmax.xlane.f32.xlu0 %v3552_v61 }
0x1415   : > { %v10786_v62 = vpop.f32.mrb[28].mxu0 }
0x1416   : > { %v9374_v63 = vpack.i.bf16 %v10786_v62, %v10783_v59  ;;  %v8283_v0 = vpop.f32.mrb[29].mxu0 }
0x1417   : > { %v7485_v0 = vld [vmem:[%s10411_s25 + $0x8] sm:$0xff]  }
0x141c   : > { %v3465_v1 = vpop.f32.mrb[30].mxu0 }
0x141d   : > { %v3547_v2 = vmul.f32 0.088388346, %v3465_v1  ;;  %v8288_v3 = vpop.f32.mrb[31].mxu0  ;;  %v7486_v1 = vld [vmem:[%s10411_s25 + $0x10] sm:$0xff]  }
0x141e   : > { %v7488_v3 = vld [vmem:[%s10411_s25 + $0x20] sm:$0xff]  }
0x141f   : > { %v3549_v4 = vsel %vm1128_vm4, %v3547_v2, -inf }
0x1420   : > { %3550 = vmax.xlane.f32.xlu1 %v3549_v4  ;;  %v7489_v4 = vld [vmem:[%s10411_s25 + $0x28] sm:$0xff]  }
0x1431   : > { %3571 = vrot.lane.b32.xlu1 %v10707_v51, %s9912_s15 }
0x1435   : > { %3725 = vrot.lane.b32.xlu1 %v10685_v35, %s9913_s23 }
0x1439   : > { %3803 = vrot.lane.b32.xlu1 %v10691_v20, %s9913_s23 }
0x143d   : > { %3723 = vrot.lane.b32.xlu1 %v10696_v47, %s9913_s23 }
0x14a1   : > { %v3554_v5 = vpop.xlane.xlu0 %3553 }
0x14a2   : > { %v3556_v50 = vsub.f32 %v3548_v58, %v3554_v5  ;;  %v7490_v5 = vld [vmem:[%s10411_s25 + $0x30] sm:$0xff]  }
0x14a4   : > { %v3559_v6 = vmul.f32 1.442695, %v3556_v50  ;;  %v7491_v50 = vld [vmem:[%s10411_s25 + $0x38] sm:$0xff]  }
0x14a6   : > { %9497 = vpow2.f32 %v3559_v6 }
0x14ad   : > { %v3551_v7 = vpop.xlane.xlu1 %3550 }
0x14ae   : > { %v3555_v8 = vsub.f32 %v3547_v2, %v3551_v7  ;;  %v7487_v2 = vld [vmem:[%s10411_s25 + $0x18] sm:$0xff]  }
0x14b0   : > { %v9498_v10 = vpop.eup %9497  ;;  %v3557_v39 = vmul.f32 1.442695, %v3555_v8 }
0x14b1   : > { %v3572_v11 = vpop.permute.xlu1 %3571  ;;  %v3564_v42 = vsel %vm1128_vm4, %v9498_v10, 0.0 }
0x14b2   : > { %9499 = vpow2.f32 %v3557_v39  ;;  %8295 = vmatpush3.msra.mxu0 %v3572_v11  ;;  %3565 = vadd.xlane.f32.xlu0 %v3564_v42 }
0x14b3   : > { %8304 = vmatprep.subr.mxu0 %v9909_v9 }
0x14b5   : > { %v3726_v17 = vpop.permute.xlu1 %3725 }
0x14b9   : > { %v3804_v21 = vpop.permute.xlu1 %3803 }
0x14bc   : > { %v9500_v35 = vpop.eup %9499 }
0x14bd   : > { %v3561_v20 = vsel %vm1128_vm4, %v9500_v35, 0.0  ;;  %v3724_v23 = vpop.permute.xlu1 %3723 }
0x14be   : > { %3562 = vadd.xlane.f32.xlu0 %v3561_v20 }
0x14d4   : > { %3647 = vrot.lane.b32.xlu0 %v10693_v18, %s9912_s15 }
0x14d8   : > { %3801 = vrot.lane.b32.xlu0 %v10704_v49, %s9913_s23 }
0x153f   : > { %v3566_v47 = vpop.xlane.xlu0 %3565 }
0x1540   : > { %9501 = vrcp.f32 %v3566_v47 }
0x154a   : > { %v9502_v43 = vpop.eup %9501 }
0x154b   : > { %v3563_v13 = vpop.xlane.xlu0 %3562  ;;  %v3570_v14 = vmul.f32 %v9502_v43, %v9498_v10 }
0x154c   : > { %9503 = vrcp.f32 %v3563_v13 }
0x154f   : > { %v3648_v15 = vpop.permute.xlu0 %3647 }
0x1550   : > { %8300 = vmatpush3.msra.mxu1 %v3648_v15 }
0x1551   : > { %8302 = vmatmul.mubr.msk.f32.vlgmr.msra.gmra.mrb[34].mxu1 %vm1128_vm4, %v3570_v14  ;;  %8309 = vmatprep.subr.mxu1 %v9909_v9 }
0x1552   : > { %8311 = vmatprep.mubr.msk.f32.mxu1 %vm9910_vm2, %v9909_v9 }
0x1553   : > { %v3802_v49 = vpop.permute.xlu0 %3801 }
0x1556   : > { %v9504_v19 = vpop.eup %9503 }
0x1557   : > { %v3569_v22 = vmul.f32 %v9504_v19, %v9500_v35  ;;  %8310 = vmatpush3.xpose.msk.msra.mxu1 %vm971_vm3, %v3804_v21 }
0x1558   : > { %8319 = vmatprep.subr.mxu1 %v9909_v9 }
0x1559   : > { %8297 = vmatmul.mubr.msk.f32.vlgmr.msra.gmra.mrb[32].mxu0 %vm1128_vm4, %v3569_v22 }
0x155a   : > { %8305 = vmatpush3.xpose.msk.msra.mxu0 %vm971_vm3, %v3726_v17  ;;  %8312 = vmatmul.mubr.msk.f32.vlgmr.msra.gmra.mrb[36].mxu1 %vm971_vm3, %v3802_v49 }
0x155b   : > { %8306 = vmatprep.mubr.msk.f32.mxu0 %vm9910_vm2, %v9909_v9  ;;  %8314 = vmatprep.subr.mxu0 %v9909_v9 }
0x155c   : > { %8321 = vmatprep.mubr.msk.f32.mxu1 %vm9910_vm2, %v9909_v9 }
0x155d   : > { %8307 = vmatmul.mubr.msk.f32.vlgmr.msra.gmra.mrb[34].mxu0 %vm971_vm3, %v3724_v23 }
0x155e   : > { %8316 = vmatprep.mubr.msk.f32.mxu0 %vm9910_vm2, %v9909_v9 }
0x1624   : > { %v3719_v24 = vpop.f32.mrb[34].mxu1 }
0x1625   : > { %v8303_v25 = vpop.f32.mrb[35].mxu1 }
0x162c   : > { %v3643_v26 = vpop.f32.mrb[32].mxu0 }
0x162d   : > { %v9379_v27 = vpack.i.bf16 %v3719_v24, %v3643_v26  ;;  %v8298_v28 = vpop.f32.mrb[33].mxu0  ;;  %v3875_v30 = vpop.f32.mrb[36].mxu1 }
0x162e   : > { %v3880_v33 = vmul.f32 0.088388346, %v3875_v30  ;;  %v8313_v34 = vpop.f32.mrb[37].mxu1  ;;  %v4235_v30 = vld [vmem:[%s10413_s14] sm:$0xff] }
0x162f   : > { %v4236_v34 = vld [vmem:[%s10413_s14 + $0x8] sm:$0xff] }
0x1630   : > { %v3797_v36 = vpop.f32.mrb[34].mxu0  ;;  %v3884_v37 = vsel %vm1128_vm4, %v3880_v33, -inf }
0x1631   : > { %v3879_v38 = vmul.f32 0.088388346, %v3797_v36  ;;  %3885 = vmax.xlane.f32.xlu0 %v3884_v37  ;;  %v8308_v40 = vpop.f32.mrb[35].mxu0 }
0x1632   : > { %v4239_v40 = vld [vmem:[%s10413_s14 + $0x80] sm:$0xff] }
0x1633   : > { %v3881_v41 = vsel %vm1128_vm4, %v3879_v38, -inf }
0x1634   : > { %3882 = vmax.xlane.f32.xlu1 %v3881_v41  ;;  %v4241_v41 = vld [vmem:[%s10413_s14 + $0xc0] sm:$0xff] }
0x1645   : > { %3903 = vrot.lane.b32.xlu1 %v10707_v51, %s9913_s23 }
0x1649   : > { %9375 = vrot.lane.b32.xlu1 %v9374_v63, %s9913_s23 }
0x164d   : > { %9380 = vrot.lane.b32.xlu1 %v9379_v27, %s9912_s15 }
0x16be   : > { %v3886_v44 = vpop.xlane.xlu0 %3885 }
0x16bf   : > { %v3888_v45 = vsub.f32 %v3880_v33, %v3886_v44  ;;  %v4237_v33 = vld [vmem:[%s10413_s14 + $0x40] sm:$0xff] }
0x16c0   : > { %v9111_v36 = vcombine.high %v4235_v30, %v4237_v33  ;;  %v9112_v37 = vcombine.low %v4235_v30, %v4237_v33  ;;  %v4263_v33 = vld [vmem:[%s10413_s14 + $0x380] sm:$0xff] }
0x16c1   : > { %v3891_v52 = vmul.f32 1.442695, %v3888_v45  ;;  %v3883_v53 = vpop.xlane.xlu1 %3882 }
0x16c2   : > { %v3887_v54 = vsub.f32 %v3879_v38, %v3883_v53  ;;  %v4238_v38 = vld [vmem:[%s10413_s14 + $0x48] sm:$0xff] }
0x16c3   : > { %9505 = vpow2.f32 %v3891_v52  ;;  %v9127_v44 = vcombine.high %v4236_v34, %v4238_v38  ;;  %v9128_v45 = vcombine.low %v4236_v34, %v4238_v38  ;;  %v4240_v52 = vld [vmem:[%s10413_s14 + $0x88] sm:$0xff]  ;;  %v4265_v34 = vld [vmem:[%s10413_s14 + $0x3c0] sm:$0xff] }
0x16c4   : > { %v3889_v55 = vmul.f32 1.442695, %v3887_v54  ;;  %v4242_v53 = vld [vmem:[%s10413_s14 + $0xc8] sm:$0xff] }
0x16c5   : > { %v3904_v56 = vpop.permute.xlu1 %3903  ;;  %v9129_v54 = vcombine.high %v4240_v52, %v4242_v53  ;;  %v4266_v38 = vld [vmem:[%s10413_s14 + $0x3c8] sm:$0xff] }
0x16c6   : > { %9507 = vpow2.f32 %v3889_v55  ;;  %8315 = vmatpush3.msra.mxu0 %v3904_v56  ;;  %v4245_v55 = vld [vmem:[%s10413_s14 + $0x140] sm:$0xff]  ;;  %v4244_v56 = vld [vmem:[%s10413_s14 + $0x108] sm:$0xff] }
0x16c9   : > { %v9376_v11 = vpop.permute.xlu1 %9375 }
0x16ca   : > { %v9378_v35 = vunpack.i.h.bf16 %v9376_v11  ;;  %v9377_v20 = vunpack.i.l.bf16 %v9376_v11  ;;  %v4253_v11 = vld [vmem:[%s10413_s14 + $0x240] sm:$0xff] }
0x16cc   : > { %v4080_v14 = vsel %vm971_vm3, %v10747_v48, %v9378_v35  ;;  %v4079_v19 = vsel %vm971_vm3, %v10745_v12, %v9377_v20  ;;  %v6845_v48 = vld [vmem:[%s10403_s12 + $0x7] ss:$0 sm:$0xff]  ;;  %v4254_v20 = vld [vmem:[%s10413_s14 + $0x248] sm:$0xff] }
0x16cd   : > { %v9506_v16 = vpop.eup %9505  ;;  %v9381_v42 = vpop.permute.xlu1 %9380 }
0x16ce   : > { %v3896_v51 = vsel %vm1128_vm4, %v9506_v16, 0.0  ;;  %v9383_v47 = vunpack.i.h.bf16 %v9381_v42  ;;  %v9382_v13 = vunpack.i.l.bf16 %v9381_v42  ;;  %v4252_v42 = vld [vmem:[%s10413_s14 + $0x208] sm:$0xff] }
0x16cf   : > { %3897 = vadd.xlane.f32.xlu0 %v3896_v51  ;;  %v9114_v51 = vcombine.low %v4239_v40, %v4241_v41 }
0x16d0   : > { %v9508_v32 = vpop.eup %9507  ;;  %v4081_v21 = vsel %vm2327_vm5, %v4079_v19, %v9382_v13  ;;  %v4082_v22 = vsel %vm2327_vm5, %v4080_v14, %v9383_v47  ;;  %v9135_v13 = vcombine.high %v4252_v42, %v4254_v20  ;;  %v4255_v14 = vld [vmem:[%s10413_s14 + $0x280] sm:$0xff] }
0x16d1   : > { %v3893_v57 = vsel %vm1128_vm4, %v9508_v32, 0.0 }
0x16d3   : > { %3894 = vadd.xlane.f32.xlu0 %v3893_v57 }
0x16e9   : > { %3979 = vrot.lane.b32.xlu0 %v10693_v18, %s9913_s23  ;;  %v6928_v18 = vld [vmem:[%s10411_s25] sm:$0xff]  }
0x16ea   : > { %8520 = vmatprep.subr.bf16.mxu0 %v6928_v18 }
0x175c   : > { %v3898_v58 = vpop.xlane.xlu0 %3897 }
0x175d   : > { %9509 = vrcp.f32 %v3898_v58 }
0x1760   : > { %v3895_v59 = vpop.xlane.xlu0 %3894 }
0x1761   : > { %9511 = vrcp.f32 %v3895_v59 }
0x1764   : > { %v3980_v60 = vpop.permute.xlu0 %3979 }
0x1765   : > { %8320 = vmatpush3.msra.mxu1 %v3980_v60 }
0x1766   : > { %8552 = vmatprep.subr.bf16.mxu1 %v9111_v36  ;;  %v4264_v36 = vld [vmem:[%s10413_s14 + $0x388] sm:$0xff] }
0x1767   : > { %v9510_v46 = vpop.eup %9509 }
0x1768   : > { %v3902_v61 = vmul.f32 %v9510_v46, %v9506_v16  ;;  %v4246_v16 = vld [vmem:[%s10413_s14 + $0x148] sm:$0xff] }
0x1769   : > { %v9131_v58 = vcombine.high %v4244_v56, %v4246_v16  ;;  %v9132_v60 = vcombine.low %v4244_v56, %v4246_v16 }
0x176a   : > { %8322 = vmatmul.mubr.msk.f32.vlgmr.msra.gmra.mrb[38].mxu1 %vm1128_vm4, %v3902_v61 }
0x176b   : > { %v9512_v62 = vpop.eup %9511  ;;  %4417 = vmatprep.mubr.f32.mxu1 %v9909_v9  ;;  %8554 = vmatpush1.bf16.msra.mxu1 %v9112_v37  ;;  %v9125_v37 = vcombine.high %v4263_v33, %v4265_v34 }
0x176c   : > { %v3901_v63 = vmul.f32 %v9512_v62, %v9508_v32  ;;  %v9130_v32 = vcombine.low %v4240_v52, %v4242_v53  ;;  %v4644_v52 = vld [vmem:[%s10413_s14 + $0x18] sm:$0xff] }
0x176e   : > { %8317 = vmatmul.mubr.msk.f32.vlgmr.msra.gmra.mrb[36].mxu0 %vm1128_vm4, %v3901_v63 }
0x176f   : > { %8522 = vmatpush3.bf16.msra.mxu0 %v6928_v18 }
0x1770   : > { %8524 = vmatprep.subr.bf16.mxu0 %v7485_v0 }
0x1773   : > { %8526 = vmatpush3.bf16.msra.mxu0 %v7485_v0 }
0x1774   : > { %8528 = vmatprep.subr.bf16.mxu0 %v7486_v1 }
0x1777   : > { %8530 = vmatpush3.bf16.msra.mxu0 %v7486_v1 }
0x1778   : > { %8532 = vmatprep.subr.bf16.mxu0 %v7487_v2 }
0x177b   : > { %8534 = vmatpush3.bf16.msra.mxu0 %v7487_v2 }
0x177c   : > { %8536 = vmatprep.subr.bf16.mxu0 %v7488_v3 }
0x177f   : > { %8538 = vmatpush3.bf16.msra.mxu0 %v7488_v3  ;;  %v4247_v3 = vld [vmem:[%s10413_s14 + $0x180] sm:$0xff] }
0x1780   : > { %8540 = vmatprep.subr.bf16.mxu0 %v7489_v4 }
0x1783   : > { %8542 = vmatpush3.bf16.msra.mxu0 %v7489_v4  ;;  %v4249_v4 = vld [vmem:[%s10413_s14 + $0x1c0] sm:$0xff] }
0x1784   : > { %8544 = vmatprep.subr.bf16.mxu0 %v7490_v5 }
0x1787   : > { %8546 = vmatpush3.bf16.msra.mxu0 %v7490_v5  ;;  %v4248_v5 = vld [vmem:[%s10413_s14 + $0x188] sm:$0xff] }
0x1788   : > { %8548 = vmatprep.subr.bf16.mxu0 %v7491_v50 }
0x178b   : > { %8550 = vmatpush3.bf16.msra.mxu0 %v7491_v50  ;;  %v9117_v50 = vcombine.high %v4247_v3, %v4249_v4 }
0x178c   : > { %8584 = vmatprep.subr.bf16.mxu0 %v9127_v44  ;;  %v9142_v44 = vcombine.low %v4264_v36, %v4266_v38 }
0x183d   : > { %v4051_v6 = vpop.f32.mrb[38].mxu1 }
0x183e   : > { %v8323_v7 = vpop.f32.mrb[39].mxu1 }
0x183f   : > { %v9118_v7 = vcombine.low %v4247_v3, %v4249_v4  ;;  %v4648_v3 = vld [vmem:[%s10413_s14 + $0x98] sm:$0xff] }
0x1840   : > { %v4650_v4 = vld [vmem:[%s10413_s14 + $0xd8] sm:$0xff] }
0x1841   : > { %v3975_v8 = vpop.f32.mrb[36].mxu0 }
0x1842   : > { %v9384_v10 = vpack.i.bf16 %v4051_v6, %v3975_v8  ;;  %v8318_v39 = vpop.f32.mrb[37].mxu0  ;;  %v4250_v6 = vld [vmem:[%s10413_s14 + $0x1c8] sm:$0xff] }
0x1843   : > { %v9133_v8 = vcombine.high %v4248_v5, %v4250_v6  ;;  %v4251_v39 = vld [vmem:[%s10413_s14 + $0x200] sm:$0xff] }
0x1844   : > { %9385 = vrot.lane.b32.xlu1 %v9384_v10, %s9911_s16  ;;  %v9134_v10 = vcombine.low %v4248_v5, %v4250_v6  ;;  %v9119_v35 = vcombine.high %v4251_v39, %v4253_v11  ;;  %v9120_v47 = vcombine.low %v4251_v39, %v4253_v11  ;;  %v4653_v39 = vld [vmem:[%s10413_s14 + $0x150] sm:$0xff]  ;;  %v4652_v11 = vld [vmem:[%s10413_s14 + $0x118] sm:$0xff] }
0x18b6   : > { %v9386_v43 = vpop.permute.xlu1 %9385 }
0x18b7   : > { %v9388_v15 = vunpack.i.h.bf16 %v9386_v43  ;;  %v9387_v17 = vunpack.i.l.bf16 %v9386_v43  ;;  %v9136_v43 = vcombine.low %v4252_v42, %v4254_v20  ;;  %v4654_v42 = vld [vmem:[%s10413_s14 + $0x158] sm:$0xff]  ;;  %v9162_v20 = vcombine.low %v4648_v3, %v4650_v4 }
0x18b9   : > { %v4083_v49 = vsel %vm2330_vm6, %v4081_v21, %v9387_v17  ;;  %v4084_v23 = vsel %vm2330_vm6, %v4082_v22, %v9388_v15  ;;  %v4257_v15 = vld [vmem:[%s10413_s14 + $0x2c0] sm:$0xff]  ;;  %v4256_v17 = vld [vmem:[%s10413_s14 + $0x288] sm:$0xff] }
0x18ba   : > { %8356 = vmatprep.mubr.f32.mxu0 %v4083_v49  ;;  %v9121_v19 = vcombine.high %v4255_v14, %v4257_v15  ;;  %v4258_v21 = vld [vmem:[%s10413_s14 + $0x2c8] sm:$0xff]  ;;  %v9122_v22 = vcombine.low %v4255_v14, %v4257_v15  ;;  %v4657_v14 = vld [vmem:[%s10413_s14 + $0x1d0] sm:$0xff]  ;;  %v4656_v15 = vld [vmem:[%s10413_s14 + $0x198] sm:$0xff] }
0x18bb   : > { %8357 = vmatmul.mubr.f32.vlgmr.msra.gmra.mrb[38].mxu0 %v4084_v23  ;;  %v9137_v49 = vcombine.high %v4256_v17, %v4258_v21  ;;  %v9138_v23 = vcombine.low %v4256_v17, %v4258_v21  ;;  %v4658_v17 = vld [vmem:[%s10413_s14 + $0x1d8] sm:$0xff]  ;;  %v9164_v21 = vcombine.low %v4652_v11, %v4654_v42 }
0x18bc   : > { %4494 = vmatprep.mubr.f32.mxu0 %v9909_v9  ;;  %8586 = vmatpush1.bf16.msra.mxu0 %v9128_v45  ;;  %v4643_v45 = vld [vmem:[%s10413_s14 + $0x10] sm:$0xff] }
0x18bd   : > { %8588 = vmatprep.subr.bf16.mxu0 %v9129_v54 }
0x18c0   : > { %8590 = vmatpush1.bf16.msra.mxu0 %v9130_v32 }
0x18c1   : > { %8592 = vmatprep.subr.bf16.mxu0 %v9131_v58 }
0x18c4   : > { %8594 = vmatpush1.bf16.msra.mxu0 %v9132_v60 }
0x18c5   : > { %8596 = vmatprep.subr.bf16.mxu0 %v9133_v8 }
0x18c8   : > { %8598 = vmatpush1.bf16.msra.mxu0 %v9134_v10  ;;  %v9161_v10 = vcombine.high %v4648_v3, %v4650_v4  ;;  %v7532_v3 = vld [vmem:[%s10417_s27 + $0x148] sm:$0xff]  }
0x18c9   : > { %8600 = vmatprep.subr.bf16.mxu0 %v9135_v13  ;;  %v9163_v13 = vcombine.high %v4652_v11, %v4654_v42  ;;  %v7548_v4 = vld [vmem:[%s10417_s27 + $0x1c8] sm:$0xff]   ;;  %v7534_v11 = vld [vmem:[%s10417_s27 + $0x158] sm:$0xff]  }
0x18ca   : > { %v7550_v42 = vld [vmem:[%s10417_s27 + $0x1d8] sm:$0xff]  }
0x18cc   : > { %8602 = vmatpush1.bf16.msra.mxu0 %v9136_v43  ;;  %v4655_v43 = vld [vmem:[%s10413_s14 + $0x190] sm:$0xff] }
0x18cd   : > { %8604 = vmatprep.subr.bf16.mxu0 %v9137_v49  ;;  %v9165_v49 = vcombine.high %v4656_v15, %v4658_v17 }
0x18d0   : > { %8606 = vmatpush1.bf16.msra.mxu0 %v9138_v23  ;;  %v4659_v23 = vld [vmem:[%s10413_s14 + $0x210] sm:$0xff] }
0x198e   : > { %v8358_v12 = vpop.f32.mrb[38].mxu0 }
0x198f   : > { %v4194_v24 = vadd.f32 %v8358_v12, %v6845_v48  ;;  %v4188_v25 = vpop.f32.mrb[39].mxu0  ;;  %v4261_v12 = vld [vmem:[%s10413_s14 + $0x340] sm:$0xff] }
0x1990   : > { %v4189_v26 = vadd.f32 %v6845_v48, %v4188_v25  ;;  %v4259_v48 = vld [vmem:[%s10413_s14 + $0x300] sm:$0xff] }
0x1991   : > { %v4198_v27 = vadd.f32 %v4194_v24, %v10679_v31  ;;  %v9113_v31 = vcombine.high %v4239_v40, %v4241_v41  ;;  %v4260_v24 = vld [vmem:[%s10413_s14 + $0x308] sm:$0xff]  ;;  %v9123_v25 = vcombine.high %v4259_v48, %v4261_v12  ;;  %v9126_v40 = vcombine.low %v4263_v33, %v4265_v34  ;;  %v4665_v33 = vld [vmem:[%s10413_s14 + $0x2d0] sm:$0xff]  ;;  %v4664_v34 = vld [vmem:[%s10413_s14 + $0x298] sm:$0xff] }
0x1992   : > { %v4197_v28 = vadd.f32 %v4189_v26, %v10676_v29  ;;  %v4243_v29 = vld [vmem:[%s10413_s14 + $0x100] sm:$0xff]  ;;  %v4262_v26 = vld [vmem:[%s10413_s14 + $0x348] sm:$0xff]  ;;  %v9141_v41 = vcombine.high %v4264_v36, %v4266_v38  ;;  %v4666_v36 = vld [vmem:[%s10413_s14 + $0x2d8] sm:$0xff] }
0x1993   : > { %4203 = vadd.xlane.f32.xlu1 %v4198_v27  ;;  %8556 = vmatprep.subr.bf16.mxu1 %v9113_v31  ;;  %v9115_v57 = vcombine.high %v4243_v29, %v4245_v55  ;;  %v9116_v59 = vcombine.low %v4243_v29, %v4245_v55  ;;  %v9140_v30 = vcombine.low %v4260_v24, %v4262_v26  ;;  %v4645_v31 = vld [vmem:[%s10413_s14 + $0x50] sm:$0xff]  ;;  %v4646_v29 = vld [vmem:[%s10413_s14 + $0x58] sm:$0xff] }
0x1994   : > { %4201 = vadd.xlane.f32.xlu0 %v4197_v28  ;;  %8558 = vmatpush1.bf16.msra.mxu1 %v9114_v51  ;;  %v9143_v53 = vcombine.high %v4643_v45, %v4645_v31  ;;  %v9144_v54 = vcombine.low %v4643_v45, %v4645_v31  ;;  %v9159_v55 = vcombine.high %v4644_v52, %v4646_v29  ;;  %v4669_v45 = vld [vmem:[%s10413_s14 + $0x350] sm:$0xff]  ;;  %v4668_v31 = vld [vmem:[%s10413_s14 + $0x318] sm:$0xff] }
0x1995   : > { %8560 = vmatprep.subr.bf16.mxu1 %v9115_v57  ;;  %v9160_v56 = vcombine.low %v4644_v52, %v4646_v29  ;;  %v4670_v52 = vld [vmem:[%s10413_s14 + $0x358] sm:$0xff]  ;;  %v9170_v29 = vcombine.low %v4664_v34, %v4666_v36 }
0x1998   : > { %8562 = vmatpush1.bf16.msra.mxu1 %v9116_v59 }
0x1999   : > { %8564 = vmatprep.subr.bf16.mxu1 %v9117_v50 }
0x199c   : > { %8566 = vmatpush1.bf16.msra.mxu1 %v9118_v7  ;;  %v4651_v7 = vld [vmem:[%s10413_s14 + $0x110] sm:$0xff] }
0x199d   : > { %8568 = vmatprep.subr.bf16.mxu1 %v9119_v35 }
0x19a0   : > { %8570 = vmatpush1.bf16.msra.mxu1 %v9120_v47  ;;  %v9147_v47 = vcombine.high %v4651_v7, %v4653_v39 }
0x19a1   : > { %8572 = vmatprep.subr.bf16.mxu1 %v9121_v19  ;;  %v9148_v19 = vcombine.low %v4651_v7, %v4653_v39  ;;  %v7533_v7 = vld [vmem:[%s10417_s27 + $0x150] sm:$0xff]  }
0x19a2   : > { %v7541_v39 = vld [vmem:[%s10417_s27 + $0x190] sm:$0xff]  }
0x19a4   : > { %8574 = vmatpush1.bf16.msra.mxu1 %v9122_v22  ;;  %v9149_v22 = vcombine.high %v4655_v43, %v4657_v14 }
0x19a5   : > { %8576 = vmatprep.subr.bf16.mxu1 %v9123_v25  ;;  %v9150_v25 = vcombine.low %v4655_v43, %v4657_v14  ;;  %v7543_v43 = vld [vmem:[%s10417_s27 + $0x1a0] sm:$0xff]   ;;  %v7536_v14 = vld [vmem:[%s10417_s27 + $0x168] sm:$0xff]  }
0x1a20   : > { %v4204_v46 = vpop.xlane.xlu1 %4203 }
0x1a21   : > { %v4202_v61 = vpop.xlane.xlu0 %4201  ;;  %v4206_v62 = vmul.f32 0.0078125, %v4204_v46  ;;  %v6846_v46 = vld [vmem:[%s10403_s12 + $0xa] ss:$0 sm:$0xff] }
0x1a22   : > { %v4205_v63 = vmul.f32 0.0078125, %v4202_v61 }
0x1a23   : > { %v10874_v0 = vsub.f32 %v4198_v27, %v4206_v62  ;;  %v9124_v27 = vcombine.low %v4259_v48, %v4261_v12  ;;  %v6847_v62 = vld [vmem:[%s10403_s12 + $0xb] ss:$0 sm:$0xff]  ;;  %v4661_v48 = vld [vmem:[%s10413_s14 + $0x250] sm:$0xff]  ;;  %v4660_v12 = vld [vmem:[%s10413_s14 + $0x218] sm:$0xff] }
0x1a24   : > { %v10872_v18 = vsub.f32 %v4197_v28, %v4205_v63  ;;  %v9139_v28 = vcombine.high %v4260_v24, %v4262_v26  ;;  %v4647_v63 = vld [vmem:[%s10413_s14 + $0x90] sm:$0xff]  ;;  %v4662_v24 = vld [vmem:[%s10413_s14 + $0x258] sm:$0xff]  ;;  %v9166_v26 = vcombine.low %v4656_v15, %v4658_v17  ;;  %v7552_v15 = vld [vmem:[%s10417_s27 + $0x1e8] sm:$0xff]  }
0x1a25   : > { %v4210_v2 = vmul.f32 %v10874_v0, %v10874_v0  ;;  %8578 = vmatpush1.bf16.msra.mxu1 %v9124_v27  ;;  %v9151_v27 = vcombine.high %v4659_v23, %v4661_v48  ;;  %v9168_v38 = vcombine.low %v4660_v12, %v4662_v24  ;;  %v7528_v17 = vld [vmem:[%s10417_s27 + $0x128] sm:$0xff]  }
0x1a26   : > { %v4209_v1 = vmul.f32 %v10872_v18, %v10872_v18  ;;  %8608 = vmatprep.subr.bf16.mxu0 %v9139_v28  ;;  %8580 = vmatprep.subr.bf16.mxu1 %v9125_v37  ;;  %v9167_v28 = vcombine.high %v4660_v12, %v4662_v24  ;;  %v9152_v37 = vcombine.low %v4659_v23, %v4661_v48  ;;  %v7545_v23 = vld [vmem:[%s10417_s27 + $0x1b0] sm:$0xff]   ;;  %v7538_v48 = vld [vmem:[%s10417_s27 + $0x178] sm:$0xff]  }
0x1a27   : > { %8610 = vmatpush1.bf16.msra.mxu0 %v9140_v30  ;;  %v4663_v30 = vld [vmem:[%s10413_s14 + $0x290] sm:$0xff]  ;;  %v7554_v12 = vld [vmem:[%s10417_s27 + $0x1f8] sm:$0xff]  }
0x1a28   : > { %4211 = vadd.xlane.f32.xlu0 %v4209_v1  ;;  %8612 = vmatprep.subr.bf16.mxu0 %v9141_v41  ;;  %v9169_v41 = vcombine.high %v4664_v34, %v4666_v36  ;;  %v7530_v24 = vld [vmem:[%s10417_s27 + $0x138] sm:$0xff]  }
0x1a29   : > { %8582 = vmatpush1.bf16.msra.mxu1 %v9126_v40  ;;  %v9153_v40 = vcombine.high %v4663_v30, %v4665_v33 }
0x1a2a   : > { %8616 = vmatprep.subr.bf16.mxu1 %v9143_v53  ;;  %v9154_v53 = vcombine.low %v4663_v30, %v4665_v33 }
0x1a2b   : > { %8614 = vmatpush1.bf16.msra.mxu0 %v9142_v44  ;;  %v4667_v44 = vld [vmem:[%s10413_s14 + $0x310] sm:$0xff] }
0x1a2c   : > { %4213 = vadd.xlane.f32.xlu0 %v4210_v2  ;;  %8648 = vmatprep.subr.bf16.mxu0 %v9159_v55  ;;  %v4649_v2 = vld [vmem:[%s10413_s14 + $0xd0] sm:$0xff]  ;;  %v9171_v55 = vcombine.high %v4668_v31, %v4670_v52 }
0x1a2d   : > { %v9145_v8 = vcombine.high %v4647_v63, %v4649_v2  ;;  %v9146_v35 = vcombine.low %v4647_v63, %v4649_v2  ;;  %v7547_v63 = vld [vmem:[%s10417_s27 + $0x1c0] sm:$0xff]  }
0x1a2e   : > { %v7539_v2 = vld [vmem:[%s10417_s27 + $0x180] sm:$0xff]  }
0x1ab5   : > { %v4212_v16 = vpop.xlane.xlu0 %4211 }
0x1ab6   : > { %v4215_v51 = vmul.f32 0.0078125, %v4212_v16  ;;  %v4673_v16 = vld [vmem:[%s10413_s14 + $0x3d0] sm:$0xff] }
0x1ab8   : > { %v4217_v32 = vadd.f32 1e-05, %v4215_v51  ;;  %v4672_v51 = vld [vmem:[%s10413_s14 + $0x398] sm:$0xff] }
0x1ab9   : > { %v4214_v57 = vpop.xlane.xlu0 %4213 }
0x1aba   : > { %9513 = vrsqrt.f32 %v4217_v32  ;;  %v4216_v58 = vmul.f32 0.0078125, %v4214_v57  ;;  %v4674_v32 = vld [vmem:[%s10413_s14 + $0x3d8] sm:$0xff]  ;;  %v9156_v57 = vcombine.low %v4667_v44, %v4669_v45 }
0x1abc   : > { %v4218_v59 = vadd.f32 1e-05, %v4216_v58  ;;  %v9172_v58 = vcombine.low %v4668_v31, %v4670_v52 }
0x1abe   : > { %9515 = vrsqrt.f32 %v4218_v59 }
0x1ac4   : > { %v9514_v60 = vpop.eup %9513 }
0x1ac5   : > { %v4221_v61 = vmul.f32 %v9514_v60, %v10872_v18  ;;  %v9173_v60 = vcombine.high %v4672_v51, %v4674_v32 }
0x1ac7   : > { %v4227_v1 = vmul.f32 %v6846_v46, %v4221_v61  ;;  %v9174_v61 = vcombine.low %v4672_v51, %v4674_v32  ;;  %v11014_v51 = vld [vmem:[%s10415_s2] sm:$0xf] }
0x1ac8   : > { %v9516_v5 = vpop.eup %9515 }
0x1ac9   : > { %v10911_v50 = vadd.f32 %v6847_v62, %v4227_v1  ;;  %v4222_v6 = vmul.f32 %v9516_v5, %v10874_v0  ;;  %v7523_v1 = vld [vmem:[%s10417_s27 + $0x100] sm:$0xff]   ;;  %v7524_v5 = vld [vmem:[%s10417_s27 + $0x108] sm:$0xff]  }
0x1acb   : > { %v4228_v18 = vmul.f32 %v6846_v46, %v4222_v6  ;;  %4418 = vmatmul.mubr.f32.vlgmr.msra.gmra.mrb[40].mxu1 %v10911_v50  ;;  %4495 = vmatmul.mubr.f32.vlgmr.msra.gmra.mrb[40].mxu0 %v10911_v50  ;;  %v7540_v6 = vld [vmem:[%s10417_s27 + $0x188] sm:$0xff]  }
0x1acc   : > { %8618 = vmatpush1.bf16.msra.mxu1 %v9144_v54  ;;  %8650 = vmatpush1.bf16.msra.mxu0 %v9160_v56  ;;  %v9155_v54 = vcombine.high %v4667_v44, %v4669_v45  ;;  %v4671_v56 = vld [vmem:[%s10413_s14 + $0x390] sm:$0xff] }
0x1acd   : > { %v10920_v0 = vadd.f32 %v6847_v62, %v4228_v18  ;;  %4423 = vmatprep.mubr.f32.mxu1 %v9909_v9  ;;  %4500 = vmatprep.mubr.f32.mxu0 %v9909_v9  ;;  %v9157_v59 = vcombine.high %v4671_v56, %v4673_v16  ;;  %v9158_v46 = vcombine.low %v4671_v56, %v4673_v16  ;;  %v7531_v62 = vld [vmem:[%s10417_s27 + $0x140] sm:$0xff]   ;;  %v7526_v18 = vld [vmem:[%s10417_s27 + $0x118] sm:$0xff]  }
0x1ace   : > { %8620 = vmatprep.subr.bf16.mxu1 %v9145_v8  ;;  %8652 = vmatprep.subr.bf16.mxu0 %v9161_v10  ;;  %v7549_v8 = vld [vmem:[%s10417_s27 + $0x1d0] sm:$0xff]  }
0x1acf   : > { %4424 = vmatmul.mubr.f32.gmra.mrb[42].mxu1 %v10920_v0  ;;  %4501 = vmatmul.mubr.f32.gmra.mrb[42].mxu0 %v10920_v0  ;;  %v7525_v10 = vld [vmem:[%s10417_s27 + $0x110] sm:$0xff]  }
0x1ad0   : > { %8622 = vmatpush1.bf16.msra.mxu1 %v9146_v35  ;;  %8654 = vmatpush1.bf16.msra.mxu0 %v9162_v20  ;;  %v7542_v35 = vld [vmem:[%s10417_s27 + $0x198] sm:$0xff]   ;;  %v7535_v20 = vld [vmem:[%s10417_s27 + $0x160] sm:$0xff]  }
0x1ad1   : > { %8624 = vmatprep.subr.bf16.mxu1 %v9147_v47  ;;  %8656 = vmatprep.subr.bf16.mxu0 %v9163_v13  ;;  %v7551_v47 = vld [vmem:[%s10417_s27 + $0x1e0] sm:$0xff]  }
0x1ad2   : > { %4825 = vmatprep.mubr.f32.mxu1 %v9909_v9  ;;  %4902 = vmatprep.mubr.f32.mxu0 %v9909_v9  ;;  %v7527_v13 = vld [vmem:[%s10417_s27 + $0x120] sm:$0xff]  }
0x1ad3   : > { %v4739_v45 = vld [vmem:[%s10415_s2 + $0x4] sm:$0xf] }
0x1ad4   : > { %8626 = vmatpush1.bf16.msra.mxu1 %v9148_v19  ;;  %8658 = vmatpush1.bf16.msra.mxu0 %v9164_v21  ;;  %v7544_v19 = vld [vmem:[%s10417_s27 + $0x1a8] sm:$0xff]   ;;  %v7537_v21 = vld [vmem:[%s10417_s27 + $0x170] sm:$0xff]  }
0x1ad5   : > { %8628 = vmatprep.subr.bf16.mxu1 %v9149_v22  ;;  %8660 = vmatprep.subr.bf16.mxu0 %v9165_v49  ;;  %v7553_v22 = vld [vmem:[%s10417_s27 + $0x1f0] sm:$0xff]  }
0x1ad6   : > { %v7529_v49 = vld [vmem:[%s10417_s27 + $0x130] sm:$0xff]  }
0x1ad8   : > { %8630 = vmatpush1.bf16.msra.mxu1 %v9150_v25  ;;  %8662 = vmatpush1.bf16.msra.mxu0 %v9166_v26  ;;  %v7546_v25 = vld [vmem:[%s10417_s27 + $0x1b8] sm:$0xff]   ;;  %v7499_v26 = vld [vmem:[%s10417_s27 + $0x40] sm:$0xff]  }
0x1ad9   : > { %8632 = vmatprep.subr.bf16.mxu1 %v9151_v27  ;;  %8664 = vmatprep.subr.bf16.mxu0 %v9167_v28  ;;  %v7515_v27 = vld [vmem:[%s10417_s27 + $0xc0] sm:$0xff]  }
0x1adc   : > { %8634 = vmatpush1.bf16.msra.mxu1 %v9152_v37  ;;  %8666 = vmatpush1.bf16.msra.mxu0 %v9168_v38 }
0x1add   : > { %8636 = vmatprep.subr.bf16.mxu1 %v9153_v40  ;;  %8668 = vmatprep.subr.bf16.mxu0 %v9169_v41  ;;  %v4333_v41 = vlaneseq }
0x1adf   : > { %v4334_v44 = vshrl.u32 %v4333_v41, 7  ;;  %v7510_v41 = vld [vmem:[%s10417_s27 + $0x98] sm:$0xff]  }
0x1ae0   : > { %8638 = vmatpush1.bf16.msra.mxu1 %v9154_v53  ;;  %8670 = vmatpush1.bf16.msra.mxu0 %v9170_v29 }
0x1ae1   : > { %8640 = vmatprep.subr.bf16.mxu1 %v9155_v54  ;;  %8672 = vmatprep.subr.bf16.mxu0 %v9171_v55  ;;  %v11001_v31 = vsub.s32 0, %v4334_v44  ;;  %v11003_v52 = vsub.s32 2, %v4334_v44  ;;  %v11005_v53 = vsub.s32 1, %v4334_v44  ;;  %v11007_v29 = vsub.s32 3, %v4334_v44  ;;  %v7503_v44 = vld [vmem:[%s10417_s27 + $0x60] sm:$0xff]  }
0x1ae3   : > { %v4744_v54 = vrot.slane %v4739_v45, %v11001_v31  ;;  %v4752_v55 = vrot.slane %v4739_v45, %v11003_v52  ;;  %v4748_v56 = vrot.slane %v4739_v45, %v11005_v53  ;;  %v4756_v16 = vrot.slane %v4739_v45, %v11007_v29  ;;  %v7519_v45 = vld [vmem:[%s10417_s27 + $0xe0] sm:$0xff]  }
0x1ae4   : > { %8642 = vmatpush1.bf16.msra.mxu1 %v9156_v57  ;;  %8674 = vmatpush1.bf16.msra.mxu0 %v9172_v58 }
0x1ae5   : > { %8644 = vmatprep.subr.bf16.mxu1 %v9157_v59  ;;  %8676 = vmatprep.subr.bf16.mxu0 %v9173_v60 }
0x1ae8   : > { %8646 = vmatpush1.bf16.msra.mxu1 %v9158_v46  ;;  %8678 = vmatpush1.bf16.msra.mxu0 %v9174_v61 }
0x1ae9   : > { %8680 = vmatprep.subr.bf16.mxu1 %v7531_v62  ;;  %8712 = vmatprep.subr.bf16.mxu0 %v7547_v63  ;;  %v11018_v63 = vrot.slane %v11014_v51, %v11005_v53 }
0x1aeb   : > { %4826 = vmatmul.mubr.f32.vlgmr.msra.gmra.mrb[44].mxu1 %v10911_v50  ;;  %4903 = vmatmul.mubr.f32.vlgmr.msra.gmra.mrb[44].mxu0 %v10911_v50 }
0x1aec   : > { %4831 = vmatprep.mubr.f32.mxu1 %v9909_v9  ;;  %4908 = vmatprep.mubr.f32.mxu0 %v9909_v9 }
0x1aed   : > { %8682 = vmatpush3.bf16.msra.mxu1 %v7523_v1  ;;  %8714 = vmatpush3.bf16.msra.mxu0 %v7539_v2  ;;  %v11022_v1 = vrot.slane %v11014_v51, %v11007_v29 }
0x1aee   : > { %8684 = vmatprep.subr.bf16.mxu1 %v7532_v3  ;;  %8716 = vmatprep.subr.bf16.mxu0 %v7548_v4 }
0x1aef   : > { %4832 = vmatmul.mubr.f32.gmra.mrb[46].mxu1 %v10920_v0  ;;  %4909 = vmatmul.mubr.f32.gmra.mrb[46].mxu0 %v10920_v0 }
0x1af1   : > { %8686 = vmatpush3.bf16.msra.mxu1 %v7524_v5  ;;  %8718 = vmatpush3.bf16.msra.mxu0 %v7540_v6 }
0x1af2   : > { %8688 = vmatprep.subr.bf16.mxu1 %v7533_v7  ;;  %8720 = vmatprep.subr.bf16.mxu0 %v7549_v8 }
0x1af5   : > { %8690 = vmatpush3.bf16.msra.mxu1 %v7525_v10  ;;  %8722 = vmatpush3.bf16.msra.mxu0 %v7541_v39 }
0x1af6   : > { %8692 = vmatprep.subr.bf16.mxu1 %v7534_v11  ;;  %8724 = vmatprep.subr.bf16.mxu0 %v7550_v42  ;;  %v6960_v42 = vld [vmem:[%s10417_s27] sm:$0xff]  }
0x1af9   : > { %8694 = vmatpush3.bf16.msra.mxu1 %v7526_v18  ;;  %8726 = vmatpush3.bf16.msra.mxu0 %v7542_v35  ;;  %v7507_v18 = vld [vmem:[%s10417_s27 + $0x80] sm:$0xff]  }
0x1afa   : > { %8696 = vmatprep.subr.bf16.mxu1 %v7535_v20  ;;  %8728 = vmatprep.subr.bf16.mxu0 %v7551_v47  ;;  %v7500_v47 = vld [vmem:[%s10417_s27 + $0x48] sm:$0xff]  }
0x1afd   : > { %8698 = vmatpush3.bf16.msra.mxu1 %v7527_v13  ;;  %8730 = vmatpush3.bf16.msra.mxu0 %v7543_v43  ;;  %v7516_v13 = vld [vmem:[%s10417_s27 + $0xc8] sm:$0xff]  }
0x1afe   : > { %8700 = vmatprep.subr.bf16.mxu1 %v7536_v14  ;;  %8732 = vmatprep.subr.bf16.mxu0 %v7552_v15 }
0x1b01   : > { %8702 = vmatpush3.bf16.msra.mxu1 %v7528_v17  ;;  %8734 = vmatpush3.bf16.msra.mxu0 %v7544_v19 }
0x1b02   : > { %8704 = vmatprep.subr.bf16.mxu1 %v7537_v21  ;;  %8736 = vmatprep.subr.bf16.mxu0 %v7553_v22  ;;  %v7492_v22 = vld [vmem:[%s10417_s27 + $0x8] sm:$0xff]  }
0x1b05   : > { %8706 = vmatpush3.bf16.msra.mxu1 %v7529_v49  ;;  %8738 = vmatpush3.bf16.msra.mxu0 %v7545_v23  ;;  %v7508_v49 = vld [vmem:[%s10417_s27 + $0x88] sm:$0xff]  }
0x1b06   : > { %8708 = vmatprep.subr.bf16.mxu1 %v7538_v48  ;;  %8740 = vmatprep.subr.bf16.mxu0 %v7554_v12  ;;  %v7501_v12 = vld [vmem:[%s10417_s27 + $0x50] sm:$0xff]  }
0x1b09   : > { %8710 = vmatpush3.bf16.msra.mxu1 %v7530_v24  ;;  %8742 = vmatpush3.bf16.msra.mxu0 %v7546_v25  ;;  %v7517_v24 = vld [vmem:[%s10417_s27 + $0xd0] sm:$0xff]  }
0x1b0a   : > { %8744 = vmatprep.subr.bf16.mxu1 %v7499_v26  ;;  %8776 = vmatprep.subr.bf16.mxu0 %v7515_v27  ;;  %v7493_v25 = vld [vmem:[%s10417_s27 + $0x10] sm:$0xff]   ;;  %v7502_v27 = vld [vmem:[%s10417_s27 + $0x58] sm:$0xff]  }
0x1b0b   : > { %v7509_v26 = vld [vmem:[%s10417_s27 + $0x90] sm:$0xff]  }
0x1b9e   : > { %v10988_v28 = vpop.f32.mrb[40].mxu1  ;;  %v10990_v30 = vpop.f32.mrb[40].mxu0 }
0x1b9f   : > { %v4421_v33 = vpop.f32.mrb[41].mxu1  ;;  %v4498_v34 = vpop.f32.mrb[41].mxu0 }
0x1ba0   : > { %v4422_v43 = vadd.f32 %v4421_v33, %v11018_v63  ;;  %v4499_v14 = vadd.f32 %v4498_v34, %v11022_v1  ;;  %v7518_v33 = vld [vmem:[%s10417_s27 + $0xd8] sm:$0xff]  }
0x1ba1   : > { %v7494_v34 = vld [vmem:[%s10417_s27 + $0x18] sm:$0xff]  }
0x1ba2   : > { %v10992_v36 = vpop.f32.mrb[42].mxu1  ;;  %v10994_v37 = vpop.f32.mrb[42].mxu0  ;;  %v4508_v23 = vmax.f32 %v4422_v43, 0.0  ;;  %v4510_v48 = vmax.f32 %v4499_v14, 0.0  ;;  %v5358_v43 = vld [vmem:[%s10413_s14 + $0xe8] sm:$0xff] }
0x1ba3   : > { %v10996_v38 = vpop.f32.mrb[43].mxu1  ;;  %v10998_v40 = vpop.f32.mrb[43].mxu0 }
0x1bbe   : > { %v4827_v32 = vpop.f32.mrb[44].mxu1  ;;  %v4904_v57 = vpop.f32.mrb[44].mxu0 }
0x1bbf   : > { %v4828_v58 = vadd.f32 %v4827_v32, %v4744_v54  ;;  %v4905_v59 = vadd.f32 %v4904_v57, %v4752_v55  ;;  %v4829_v60 = vpop.f32.mrb[45].mxu1  ;;  %v4906_v46 = vpop.f32.mrb[45].mxu0  ;;  %v7496_v32 = vld [vmem:[%s10417_s27 + $0x28] sm:$0xff]  }
0x1bc0   : > { %v4830_v61 = vadd.f32 %v4829_v60, %v4748_v56  ;;  %v4907_v62 = vadd.f32 %v4906_v46, %v4756_v16  ;;  %v7512_v57 = vld [vmem:[%s10417_s27 + $0xa8] sm:$0xff]   ;;  %v7497_v60 = vld [vmem:[%s10417_s27 + $0x30] sm:$0xff]  }
0x1bc1   : > { %v4915_v6 = vmax.f32 %v4828_v58, 0.0  ;;  %v4917_v7 = vmax.f32 %v4905_v59, 0.0  ;;  %v7505_v58 = vld [vmem:[%s10417_s27 + $0x70] sm:$0xff]  }
0x1bc2   : > { %v4916_v2 = vmax.f32 %v4830_v61, 0.0  ;;  %v4918_v3 = vmax.f32 %v4907_v62, 0.0  ;;  %v4833_v4 = vpop.f32.mrb[46].mxu1  ;;  %v4910_v5 = vpop.f32.mrb[46].mxu0  ;;  %v7521_v59 = vld [vmem:[%s10417_s27 + $0xf0] sm:$0xff]   ;;  %v4336_v61 = vrot.slane %v11014_v51, %v11001_v31  ;;  %v4344_v62 = vrot.slane %v11014_v51, %v11003_v52 }
0x1bc3   : > { %v4834_v8 = vadd.f32 %v4833_v4, %v4744_v54  ;;  %v4911_v10 = vadd.f32 %v4910_v5, %v4752_v55  ;;  %v4835_v39 = vpop.f32.mrb[47].mxu1  ;;  %v4912_v11 = vpop.f32.mrb[47].mxu0  ;;  %v7495_v54 = vld [vmem:[%s10417_s27 + $0x20] sm:$0xff]   ;;  %v7513_v46 = vld [vmem:[%s10417_s27 + $0xb0] sm:$0xff]   ;;  %v7522_v5 = vld [vmem:[%s10417_s27 + $0xf8] sm:$0xff]  }
0x1bc4   : > { %v4836_v35 = vadd.f32 %v4835_v39, %v4748_v56  ;;  %v4913_v20 = vadd.f32 %v4912_v11, %v4756_v16  ;;  %5115 = vmatprep.mubr.f32.mxu1 %v4916_v2  ;;  %5190 = vmatprep.mubr.f32.mxu0 %v4918_v3  ;;  %v7511_v55 = vld [vmem:[%s10417_s27 + $0xa0] sm:$0xff]   ;;  %v7504_v56 = vld [vmem:[%s10417_s27 + $0x68] sm:$0xff]   ;;  %v7506_v2 = vld [vmem:[%s10417_s27 + $0x78] sm:$0xff]   ;;  %v4497_v51 = vadd.f32 %v10990_v30, %v4344_v62 }
0x1bc5   : > { %5116 = vmatmul.mubr.f32.vlgmr.msra.gmra.mrb[48].mxu1 %v4915_v6  ;;  %5191 = vmatmul.mubr.f32.vlgmr.msra.gmra.mrb[48].mxu0 %v4917_v7  ;;  %v4919_v19 = vmax.f32 %v4834_v8, 0.0  ;;  %v4921_v21 = vmax.f32 %v4911_v10, 0.0  ;;  %v7520_v16 = vld [vmem:[%s10417_s27 + $0xe8] sm:$0xff]   ;;  %v5351_v3 = vld [vmem:[%s10413_s14 + $0x20] sm:$0xff]  ;;  %v4420_v10 = vadd.f32 %v10988_v28, %v4336_v61  ;;  %v7498_v39 = vld [vmem:[%s10417_s27 + $0x38] sm:$0xff]  }
0x1bc6   : > { %v4920_v15 = vmax.f32 %v4836_v35, 0.0  ;;  %v4922_v17 = vmax.f32 %v4913_v20, 0.0  ;;  %8746 = vmatpush3.bf16.msra.mxu1 %v6960_v42  ;;  %8778 = vmatpush3.bf16.msra.mxu0 %v7507_v18  ;;  %v5353_v4 = vld [vmem:[%s10413_s14 + $0x60] sm:$0xff]  ;;  %v5352_v6 = vld [vmem:[%s10413_s14 + $0x28] sm:$0xff]  ;;  %v7514_v11 = vld [vmem:[%s10417_s27 + $0xb8] sm:$0xff]   ;;  %v4428_v18 = vadd.f32 %v10996_v38, %v11018_v63  ;;  %v4505_v35 = vadd.f32 %v10998_v40, %v11022_v1 }
0x1bc7   : > { %8748 = vmatprep.subr.bf16.mxu1 %v7500_v47  ;;  %8780 = vmatprep.subr.bf16.mxu0 %v7516_v13  ;;  %v5354_v7 = vld [vmem:[%s10413_s14 + $0x68] sm:$0xff]  ;;  %v9175_v8 = vcombine.high %v5351_v3, %v5353_v4  ;;  %v5355_v20 = vld [vmem:[%s10413_s14 + $0xa0] sm:$0xff]  ;;  %v9176_v28 = vcombine.low %v5351_v3, %v5353_v4  ;;  %v4507_v14 = vmax.f32 %v4420_v10, 0.0  ;;  %v4503_v38 = vadd.f32 %v10994_v37, %v4344_v62 }
0x1bc8   : > { %5120 = vmatprep.mubr.f32.mxu1 %v4920_v15  ;;  %5195 = vmatprep.mubr.f32.mxu0 %v4922_v17  ;;  %v9191_v42 = vcombine.high %v5352_v6, %v5354_v7  ;;  %v5357_v47 = vld [vmem:[%s10413_s14 + $0xe0] sm:$0xff]  ;;  %v5356_v13 = vld [vmem:[%s10413_s14 + $0xa8] sm:$0xff]  ;;  %v9192_v30 = vcombine.low %v5352_v6, %v5354_v7  ;;  %v4509_v15 = vmax.f32 %v4497_v51, 0.0  ;;  %v4426_v17 = vadd.f32 %v10992_v36, %v4336_v61 }
0x1bc9   : > { %5121 = vmatmul.mubr.f32.gmra.mrb[50].mxu1 %v4919_v19  ;;  %5196 = vmatmul.mubr.f32.gmra.mrb[50].mxu0 %v4921_v21  ;;  %v4512_v40 = vmax.f32 %v4428_v18, 0.0  ;;  %v4514_v63 = vmax.f32 %v4505_v35, 0.0  ;;  %v9177_v1 = vcombine.high %v5355_v20, %v5357_v47  ;;  %v9193_v19 = vcombine.high %v5356_v13, %v5358_v43  ;;  %v5359_v21 = vld [vmem:[%s10413_s14 + $0x120] sm:$0xff]  ;;  %v5372_v62 = vld [vmem:[%s10413_s14 + $0x2a8] sm:$0xff] }
0x1bca   : > { %8750 = vmatpush3.bf16.msra.mxu1 %v7492_v22  ;;  %8782 = vmatpush3.bf16.msra.mxu0 %v7508_v49  ;;  %v5361_v22 = vld [vmem:[%s10413_s14 + $0x160] sm:$0xff]  ;;  %v5360_v49 = vld [vmem:[%s10413_s14 + $0x128] sm:$0xff]  ;;  %v4511_v36 = vmax.f32 %v4426_v17, 0.0  ;;  %v4513_v37 = vmax.f32 %v4503_v38, 0.0 }
0x1bcb   : > { %5265 = vmatprep.mubr.f32.mxu1 %v4508_v23  ;;  %5340 = vmatprep.mubr.f32.mxu0 %v4510_v48  ;;  %v5362_v23 = vld [vmem:[%s10413_s14 + $0x168] sm:$0xff]  ;;  %v9178_v48 = vcombine.low %v5355_v20, %v5357_v47  ;;  %v5373_v61 = vld [vmem:[%s10413_s14 + $0x2e0] sm:$0xff] }
0x1bcc   : > { %8752 = vmatprep.subr.bf16.mxu1 %v7501_v12  ;;  %8784 = vmatprep.subr.bf16.mxu0 %v7517_v24  ;;  %v9194_v12 = vcombine.low %v5356_v13, %v5358_v43  ;;  %v9179_v24 = vcombine.high %v5359_v21, %v5361_v22  ;;  %v5375_v7 = vld [vmem:[%s10413_s14 + $0x320] sm:$0xff]  ;;  %v5376_v10 = vld [vmem:[%s10413_s14 + $0x328] sm:$0xff] }
0x1bcd   : > { %v5378_v51 = vld [vmem:[%s10413_s14 + $0x368] sm:$0xff]  ;;  %v5379_v35 = vld [vmem:[%s10413_s14 + $0x3a0] sm:$0xff] }
0x1bce   : > { %8754 = vmatpush3.bf16.msra.mxu1 %v7493_v25  ;;  %8786 = vmatpush3.bf16.msra.mxu0 %v7509_v26  ;;  %v9195_v25 = vcombine.high %v5360_v49, %v5362_v23  ;;  %v5363_v26 = vld [vmem:[%s10413_s14 + $0x1a0] sm:$0xff]  ;;  %v9203_v18 = vcombine.high %v5376_v10, %v5378_v51  ;;  %v5380_v47 = vld [vmem:[%s10413_s14 + $0x3a8] sm:$0xff] }
0x1bcf   : > { %8756 = vmatprep.subr.bf16.mxu1 %v7502_v27  ;;  %8788 = vmatprep.subr.bf16.mxu0 %v7518_v33  ;;  %v5365_v27 = vld [vmem:[%s10413_s14 + $0x1e0] sm:$0xff]  ;;  %v5364_v33 = vld [vmem:[%s10413_s14 + $0x1a8] sm:$0xff] }
0x1bd0   : > { %v5381_v20 = vld [vmem:[%s10413_s14 + $0x3e0] sm:$0xff]  ;;  %v5382_v13 = vld [vmem:[%s10413_s14 + $0x3e8] sm:$0xff] }
0x1bd1   : > { %v9206_v17 = vcombine.low %v5380_v47, %v5382_v13  ;;  %v7563_v38 = vld [vmem:[%s10417_s27 + $0x240] sm:$0xff]  }
0x1bd2   : > { %8758 = vmatpush3.bf16.msra.mxu1 %v7494_v34  ;;  %8790 = vmatpush3.bf16.msra.mxu0 %v7510_v41  ;;  %v5366_v34 = vld [vmem:[%s10413_s14 + $0x1e8] sm:$0xff]  ;;  %v9180_v41 = vcombine.low %v5359_v21, %v5361_v22 }
0x1bd3   : > { %8760 = vmatprep.subr.bf16.mxu1 %v7503_v44  ;;  %8792 = vmatprep.subr.bf16.mxu0 %v7519_v45  ;;  %v9196_v44 = vcombine.low %v5360_v49, %v5362_v23  ;;  %v9181_v45 = vcombine.high %v5363_v26, %v5365_v27  ;;  %v7580_v21 = vld [vmem:[%s10417_s27 + $0x2c8] sm:$0xff]   ;;  %v7565_v23 = vld [vmem:[%s10417_s27 + $0x250] sm:$0xff]  }
0x1bd4   : > { %v7556_v22 = vld [vmem:[%s10417_s27 + $0x208] sm:$0xff]  }
0x1bd5   : > { %v7572_v49 = vld [vmem:[%s10417_s27 + $0x288] sm:$0xff]  }
0x1bd6   : > { %8762 = vmatpush3.bf16.msra.mxu1 %v7495_v54  ;;  %8794 = vmatpush3.bf16.msra.mxu0 %v7511_v55  ;;  %v9197_v54 = vcombine.high %v5364_v33, %v5366_v34  ;;  %v5367_v55 = vld [vmem:[%s10413_s14 + $0x220] sm:$0xff] }
0x1bd7   : > { %8764 = vmatprep.subr.bf16.mxu1 %v7504_v56  ;;  %8796 = vmatprep.subr.bf16.mxu0 %v7520_v16  ;;  %v5369_v56 = vld [vmem:[%s10413_s14 + $0x260] sm:$0xff]  ;;  %v5368_v16 = vld [vmem:[%s10413_s14 + $0x228] sm:$0xff] }
0x1bd8   : > { %v9184_v3 = vcombine.low %v5367_v55, %v5369_v56 }
0x1bda   : > { %8766 = vmatpush3.bf16.msra.mxu1 %v7496_v32  ;;  %8798 = vmatpush3.bf16.msra.mxu0 %v7512_v57  ;;  %v5370_v32 = vld [vmem:[%s10413_s14 + $0x268] sm:$0xff]  ;;  %v9182_v57 = vcombine.low %v5363_v26, %v5365_v27  ;;  %v7574_v26 = vld [vmem:[%s10417_s27 + $0x298] sm:$0xff]   ;;  %v7567_v27 = vld [vmem:[%s10417_s27 + $0x260] sm:$0xff]  }
0x1bdb   : > { %8768 = vmatprep.subr.bf16.mxu1 %v7505_v58  ;;  %8800 = vmatprep.subr.bf16.mxu0 %v7521_v59  ;;  %v9198_v58 = vcombine.low %v5364_v33, %v5366_v34  ;;  %v9183_v59 = vcombine.high %v5367_v55, %v5369_v56  ;;  %v9200_v4 = vcombine.low %v5368_v16, %v5370_v32  ;;  %v7583_v33 = vld [vmem:[%s10417_s27 + $0x2e0] sm:$0xff]   ;;  %v7576_v55 = vld [vmem:[%s10417_s27 + $0x2a8] sm:$0xff]   ;;  %v7569_v56 = vld [vmem:[%s10417_s27 + $0x270] sm:$0xff]  }
0x1bdc   : > { %v7559_v34 = vld [vmem:[%s10417_s27 + $0x220] sm:$0xff]  }
0x1bde   : > { %8770 = vmatpush3.bf16.msra.mxu1 %v7497_v60  ;;  %8802 = vmatpush3.bf16.msra.mxu0 %v7513_v46  ;;  %v9199_v60 = vcombine.high %v5368_v16, %v5370_v32  ;;  %v5371_v46 = vld [vmem:[%s10413_s14 + $0x2a0] sm:$0xff]  ;;  %v7585_v16 = vld [vmem:[%s10417_s27 + $0x2f0] sm:$0xff]  }
0x1bdf   : > { %8772 = vmatprep.subr.bf16.mxu1 %v7506_v2  ;;  %8804 = vmatprep.subr.bf16.mxu0 %v7522_v5  ;;  %v5374_v2 = vld [vmem:[%s10413_s14 + $0x2e8] sm:$0xff]  ;;  %v9185_v5 = vcombine.high %v5371_v46, %v5373_v61  ;;  %v7561_v32 = vld [vmem:[%s10417_s27 + $0x230] sm:$0xff]  }
0x1be0   : > { %v9201_v6 = vcombine.high %v5372_v62, %v5374_v2 }
0x1be2   : > { %8774 = vmatpush3.bf16.msra.mxu1 %v7498_v39  ;;  %8806 = vmatpush3.bf16.msra.mxu0 %v7514_v11  ;;  %v9186_v39 = vcombine.low %v5371_v46, %v5373_v61  ;;  %v9202_v11 = vcombine.low %v5372_v62, %v5374_v2  ;;  %v7578_v46 = vld [vmem:[%s10417_s27 + $0x2b8] sm:$0xff]   ;;  %v11141_v61 = vld [vmem:[%s10413_s14 + $0x30] sm:$0xff] }
0x1be3   : > { %8808 = vmatprep.subr.bf16.mxu1 %v9175_v8  ;;  %8840 = vmatprep.subr.bf16.mxu0 %v9191_v42  ;;  %v5377_v8 = vld [vmem:[%s10413_s14 + $0x360] sm:$0xff]  ;;  %v11144_v62 = vld [vmem:[%s10413_s14 + $0x70] sm:$0xff]  ;;  %v11147_v2 = vld [vmem:[%s10413_s14 + $0x38] sm:$0xff] }
0x1be4   : > { %v9187_v42 = vcombine.high %v5375_v7, %v5377_v8  ;;  %v9188_v43 = vcombine.low %v5375_v7, %v5377_v8 }
0x1be5   : > { %5266 = vmatmul.mubr.f32.vlgmr.msra.gmra.mrb[52].mxu1 %v4507_v14  ;;  %5341 = vmatmul.mubr.f32.vlgmr.msra.gmra.mrb[52].mxu0 %v4509_v15  ;;  %v9205_v14 = vcombine.high %v5380_v47, %v5382_v13  ;;  %v9190_v15 = vcombine.low %v5379_v35, %v5381_v20 }
0x1be6   : > { %5270 = vmatprep.mubr.f32.mxu1 %v4512_v40  ;;  %5345 = vmatprep.mubr.f32.mxu0 %v4514_v63  ;;  %v7579_v40 = vld [vmem:[%s10417_s27 + $0x2c0] sm:$0xff]  }
0x1be7   : > { %8810 = vmatpush1.bf16.msra.mxu1 %v9176_v28  ;;  %8842 = vmatpush1.bf16.msra.mxu0 %v9192_v30  ;;  %v9204_v28 = vcombine.low %v5376_v10, %v5378_v51  ;;  %v9189_v30 = vcombine.high %v5379_v35, %v5381_v20  ;;  %v7555_v63 = vld [vmem:[%s10417_s27 + $0x200] sm:$0xff]  }
0x1be8   : > { %8812 = vmatprep.subr.bf16.mxu1 %v9177_v1  ;;  %8844 = vmatprep.subr.bf16.mxu0 %v9193_v19  ;;  %v7571_v1 = vld [vmem:[%s10417_s27 + $0x280] sm:$0xff]   ;;  %v7564_v19 = vld [vmem:[%s10417_s27 + $0x248] sm:$0xff]  }
0x1be9   : > { %5271 = vmatmul.mubr.f32.gmra.mrb[54].mxu1 %v4511_v36  ;;  %5346 = vmatmul.mubr.f32.gmra.mrb[54].mxu0 %v4513_v37  ;;  %v7581_v36 = vld [vmem:[%s10417_s27 + $0x2d0] sm:$0xff]  }
0x1bea   : > { %5533 = vmatprep.mubr.f32.mxu1 %v9909_v9  ;;  %5610 = vmatprep.mubr.f32.mxu0 %v9909_v9  ;;  %v7557_v37 = vld [vmem:[%s10417_s27 + $0x210] sm:$0xff]  }
0x1beb   : > { %8814 = vmatpush1.bf16.msra.mxu1 %v9178_v48  ;;  %8846 = vmatpush1.bf16.msra.mxu0 %v9194_v12  ;;  %v7573_v48 = vld [vmem:[%s10417_s27 + $0x290] sm:$0xff]   ;;  %v7566_v12 = vld [vmem:[%s10417_s27 + $0x258] sm:$0xff]  }
0x1bec   : > { %8816 = vmatprep.subr.bf16.mxu1 %v9179_v24  ;;  %8848 = vmatprep.subr.bf16.mxu0 %v9195_v25  ;;  %v7582_v24 = vld [vmem:[%s10417_s27 + $0x2d8] sm:$0xff]  }
0x1bed   : > { %v7558_v25 = vld [vmem:[%s10417_s27 + $0x218] sm:$0xff]  }
0x1bef   : > { %8818 = vmatpush1.bf16.msra.mxu1 %v9180_v41  ;;  %8850 = vmatpush1.bf16.msra.mxu0 %v9196_v44  ;;  %v7575_v41 = vld [vmem:[%s10417_s27 + $0x2a0] sm:$0xff]   ;;  %v7568_v44 = vld [vmem:[%s10417_s27 + $0x268] sm:$0xff]  }
0x1bf0   : > { %8820 = vmatprep.subr.bf16.mxu1 %v9181_v45  ;;  %8852 = vmatprep.subr.bf16.mxu0 %v9197_v54  ;;  %v7584_v45 = vld [vmem:[%s10417_s27 + $0x2e8] sm:$0xff]  }
0x1bf1   : > { %v7560_v54 = vld [vmem:[%s10417_s27 + $0x228] sm:$0xff]  }
0x1bf3   : > { %8822 = vmatpush1.bf16.msra.mxu1 %v9182_v57  ;;  %8854 = vmatpush1.bf16.msra.mxu0 %v9198_v58  ;;  %v7577_v57 = vld [vmem:[%s10417_s27 + $0x2b0] sm:$0xff]   ;;  %v7570_v58 = vld [vmem:[%s10417_s27 + $0x278] sm:$0xff]  }
0x1bf4   : > { %8824 = vmatprep.subr.bf16.mxu1 %v9183_v59  ;;  %8856 = vmatprep.subr.bf16.mxu0 %v9199_v60  ;;  %v7586_v59 = vld [vmem:[%s10417_s27 + $0x2f8] sm:$0xff]  }
0x1bf5   : > { %v7562_v60 = vld [vmem:[%s10417_s27 + $0x238] sm:$0xff]  }
0x1bf7   : > { %8826 = vmatpush1.bf16.msra.mxu1 %v9184_v3  ;;  %8858 = vmatpush1.bf16.msra.mxu0 %v9200_v4  ;;  %v9207_v3 = vcombine.high %v11141_v61, %v11144_v62  ;;  %v11152_v4 = vld [vmem:[%s10413_s14 + $0x78] sm:$0xff] }
0x1bf8   : > { %8828 = vmatprep.subr.bf16.mxu1 %v9185_v5  ;;  %8860 = vmatprep.subr.bf16.mxu0 %v9201_v6  ;;  %v9208_v5 = vcombine.low %v11141_v61, %v11144_v62  ;;  %v9223_v6 = vcombine.high %v11147_v2, %v11152_v4  ;;  %v9224_v7 = vcombine.low %v11147_v2, %v11152_v4  ;;  %v5925_v61 = vld [vmem:[%s10413_s14 + $0x1f0] sm:$0xff]  ;;  %v5924_v62 = vld [vmem:[%s10413_s14 + $0x1b8] sm:$0xff] }
0x1bfb   : > { %8830 = vmatpush1.bf16.msra.mxu1 %v9186_v39  ;;  %8862 = vmatpush1.bf16.msra.mxu0 %v9202_v11 }
0x1bfc   : > { %8832 = vmatprep.subr.bf16.mxu1 %v9187_v42  ;;  %8864 = vmatprep.subr.bf16.mxu0 %v9203_v18 }
0x1bff   : > { %8834 = vmatpush1.bf16.msra.mxu1 %v9188_v43  ;;  %8866 = vmatpush1.bf16.msra.mxu0 %v9204_v28 }
0x1c00   : > { %8836 = vmatprep.subr.bf16.mxu1 %v9189_v30  ;;  %8868 = vmatprep.subr.bf16.mxu0 %v9205_v14 }
0x1c03   : > { %8838 = vmatpush1.bf16.msra.mxu1 %v9190_v15  ;;  %8870 = vmatpush1.bf16.msra.mxu0 %v9206_v17 }
0x1c04   : > { %8872 = vmatprep.subr.bf16.mxu1 %v7563_v38  ;;  %8904 = vmatprep.subr.bf16.mxu0 %v7579_v40 }
0x1c06   : > { %5534 = vmatmul.mubr.f32.vlgmr.msra.gmra.mrb[56].mxu1 %v10911_v50  ;;  %5611 = vmatmul.mubr.f32.vlgmr.msra.gmra.mrb[56].mxu0 %v10911_v50 }
0x1c07   : > { %5539 = vmatprep.mubr.f32.mxu1 %v9909_v9  ;;  %5616 = vmatprep.mubr.f32.mxu0 %v9909_v9 }
0x1c08   : > { %8874 = vmatpush3.bf16.msra.mxu1 %v7555_v63  ;;  %8906 = vmatpush3.bf16.msra.mxu0 %v7571_v1 }
0x1c09   : > { %8876 = vmatprep.subr.bf16.mxu1 %v7564_v19  ;;  %8908 = vmatprep.subr.bf16.mxu0 %v7580_v21 }
0x1c0a   : > { %5540 = vmatmul.mubr.f32.gmra.mrb[58].mxu1 %v10920_v0  ;;  %5617 = vmatmul.mubr.f32.gmra.mrb[58].mxu0 %v10920_v0 }
0x1c0c   : > { %8878 = vmatpush3.bf16.msra.mxu1 %v7556_v22  ;;  %8910 = vmatpush3.bf16.msra.mxu0 %v7572_v49 }
0x1c0d   : > { %8880 = vmatprep.subr.bf16.mxu1 %v7565_v23  ;;  %8912 = vmatprep.subr.bf16.mxu0 %v7581_v36 }
0x1c10   : > { %8882 = vmatpush3.bf16.msra.mxu1 %v7557_v37  ;;  %8914 = vmatpush3.bf16.msra.mxu0 %v7573_v48 }
0x1c11   : > { %8884 = vmatprep.subr.bf16.mxu1 %v7566_v12  ;;  %8916 = vmatprep.subr.bf16.mxu0 %v7582_v24  ;;  %v5447_v24 = vld [vmem:[%s10415_s2 + $0x8] sm:$0xf] }
0x1c14   : > { %8886 = vmatpush3.bf16.msra.mxu1 %v7558_v25  ;;  %8918 = vmatpush3.bf16.msra.mxu0 %v7574_v26  ;;  %v5452_v25 = vrot.slane %v5447_v24, %v11001_v31  ;;  %v5460_v26 = vrot.slane %v5447_v24, %v11003_v52 }
0x1c15   : > { %8888 = vmatprep.subr.bf16.mxu1 %v7567_v27  ;;  %8920 = vmatprep.subr.bf16.mxu0 %v7583_v33  ;;  %v5456_v27 = vrot.slane %v5447_v24, %v11005_v53  ;;  %v5464_v33 = vrot.slane %v5447_v24, %v11007_v29 }
0x1c18   : > { %8890 = vmatpush3.bf16.msra.mxu1 %v7559_v34  ;;  %8922 = vmatpush3.bf16.msra.mxu0 %v7575_v41 }
0x1c19   : > { %8892 = vmatprep.subr.bf16.mxu1 %v7568_v44  ;;  %8924 = vmatprep.subr.bf16.mxu0 %v7584_v45  ;;  %v5915_v44 = vld [vmem:[%s10413_s14 + $0xb0] sm:$0xff] }
0x1c1c   : > { %8894 = vmatpush3.bf16.msra.mxu1 %v7560_v54  ;;  %8926 = vmatpush3.bf16.msra.mxu0 %v7576_v55 }
0x1c1d   : > { %8896 = vmatprep.subr.bf16.mxu1 %v7569_v56  ;;  %8928 = vmatprep.subr.bf16.mxu0 %v7585_v16  ;;  %v5917_v16 = vld [vmem:[%s10413_s14 + $0xf0] sm:$0xff] }
0x1c20   : > { %8898 = vmatpush3.bf16.msra.mxu1 %v7561_v32  ;;  %8930 = vmatpush3.bf16.msra.mxu0 %v7577_v57  ;;  %v5916_v32 = vld [vmem:[%s10413_s14 + $0xb8] sm:$0xff] }
0x1c21   : > { %8900 = vmatprep.subr.bf16.mxu1 %v7570_v58  ;;  %8932 = vmatprep.subr.bf16.mxu0 %v7586_v59  ;;  %v5918_v57 = vld [vmem:[%s10413_s14 + $0xf8] sm:$0xff] }
0x1c24   : > { %8902 = vmatpush3.bf16.msra.mxu1 %v7562_v60  ;;  %8934 = vmatpush3.bf16.msra.mxu0 %v7578_v46 }
0x1c25   : > { %8936 = vmatprep.subr.bf16.mxu1 %v9207_v3  ;;  %8968 = vmatprep.subr.bf16.mxu0 %v9223_v6 }
0x1c98   : > { %v7787_v8 = vpop.f32.mrb[48].mxu1  ;;  %v7825_v10 = vpop.f32.mrb[48].mxu0 }
0x1c99   : > { %v7788_v51 = vpop.f32.mrb[49].mxu1  ;;  %v7826_v39 = vpop.f32.mrb[49].mxu0 }
0x1c9a   : > { %v7789_v11 = vadd.f32 %v7788_v51, %v7787_v8  ;;  %v7827_v42 = vadd.f32 %v7826_v39, %v7825_v10  ;;  %v9209_v8 = vcombine.high %v5915_v44, %v5917_v16  ;;  %v9225_v10 = vcombine.high %v5916_v32, %v5918_v57 }
0x1c9c   : > { %v5193_v18 = vadd.f32 %v7827_v42, %v7789_v11  ;;  %v7790_v35 = vpop.f32.mrb[50].mxu1  ;;  %v7828_v20 = vpop.f32.mrb[50].mxu0 }
0x1c9d   : > { %v7791_v47 = vpop.f32.mrb[51].mxu1  ;;  %v7829_v13 = vpop.f32.mrb[51].mxu0 }
0x1c9e   : > { %v7792_v43 = vadd.f32 %v7791_v47, %v7790_v35  ;;  %v7830_v28 = vadd.f32 %v7829_v13, %v7828_v20  ;;  %v5919_v20 = vld [vmem:[%s10413_s14 + $0x130] sm:$0xff] }
0x1ca0   : > { %v5198_v30 = vadd.f32 %v7830_v28, %v7792_v43  ;;  %v5921_v43 = vld [vmem:[%s10413_s14 + $0x170] sm:$0xff]  ;;  %v5920_v28 = vld [vmem:[%s10413_s14 + $0x138] sm:$0xff] }
0x1ca1   : > { %v9212_v2 = vcombine.low %v5919_v20, %v5921_v43 }
0x1cb8   : > { %v7863_v14 = vpop.f32.mrb[52].mxu1  ;;  %v7901_v15 = vpop.f32.mrb[52].mxu0 }
0x1cb9   : > { %v7864_v17 = vpop.f32.mrb[53].mxu1  ;;  %v7902_v38 = vpop.f32.mrb[53].mxu0 }
0x1cba   : > { %v7865_v40 = vadd.f32 %v7864_v17, %v7863_v14  ;;  %v7903_v63 = vadd.f32 %v7902_v38, %v7901_v15  ;;  %v9210_v17 = vcombine.low %v5915_v44, %v5917_v16  ;;  %v9226_v38 = vcombine.low %v5916_v32, %v5918_v57  ;;  %v5934_v44 = vld [vmem:[%s10413_s14 + $0x2f8] sm:$0xff]  ;;  %v5935_v16 = vld [vmem:[%s10413_s14 + $0x330] sm:$0xff] }
0x1cbb   : > { %v5937_v32 = vld [vmem:[%s10413_s14 + $0x370] sm:$0xff]  ;;  %v5936_v57 = vld [vmem:[%s10413_s14 + $0x338] sm:$0xff] }
0x1cbc   : > { %v5268_v1 = vadd.f32 %v7865_v40, %v5193_v18  ;;  %v7866_v19 = vpop.f32.mrb[54].mxu1  ;;  %v7904_v21 = vpop.f32.mrb[54].mxu0 }
0x1cbd   : > { %v7867_v22 = vpop.f32.mrb[55].mxu1  ;;  %v7905_v49 = vpop.f32.mrb[55].mxu0 }
0x1cbe   : > { %v11160_v23 = vadd.f32 %v7903_v63, %v5268_v1  ;;  %v7868_v36 = vadd.f32 %v7867_v22, %v7866_v19  ;;  %v7906_v37 = vadd.f32 %v7905_v49, %v7904_v21  ;;  %v9211_v1 = vcombine.high %v5919_v20, %v5921_v43  ;;  %v5923_v21 = vld [vmem:[%s10413_s14 + $0x1b0] sm:$0xff]  ;;  %v7587_v43 = vld [vmem:[%s10417_s27 + $0x300] sm:$0xff]  }
0x1cbf   : > { %v5927_v49 = vld [vmem:[%s10413_s14 + $0x230] sm:$0xff]  ;;  %v9214_v24 = vcombine.low %v5923_v21, %v5925_v61 }
0x1cc0   : > { %v5273_v48 = vadd.f32 %v7868_v36, %v5198_v30  ;;  %v5922_v30 = vld [vmem:[%s10413_s14 + $0x178] sm:$0xff]  ;;  %v5929_v36 = vld [vmem:[%s10413_s14 + $0x270] sm:$0xff] }
0x1cc1   : > { %v9227_v19 = vcombine.high %v5920_v28, %v5922_v30  ;;  %v9228_v4 = vcombine.low %v5920_v28, %v5922_v30  ;;  %v7603_v28 = vld [vmem:[%s10417_s27 + $0x380] sm:$0xff]   ;;  %v7612_v30 = vld [vmem:[%s10417_s27 + $0x3c8] sm:$0xff]  }
0x1cc2   : > { %v11162_v12 = vadd.f32 %v7906_v37, %v5273_v48  ;;  %v5928_v37 = vld [vmem:[%s10413_s14 + $0x238] sm:$0xff] }
0x1cc3   : > { %v5930_v48 = vld [vmem:[%s10413_s14 + $0x278] sm:$0xff] }
0x1cd9   : > { %v5535_v34 = vpop.f32.mrb[56].mxu1  ;;  %v5612_v41 = vpop.f32.mrb[56].mxu0 }
0x1cda   : > { %v5536_v45 = vadd.f32 %v5535_v34, %v5452_v25  ;;  %v5613_v54 = vadd.f32 %v5612_v41, %v5460_v26  ;;  %v5537_v55 = vpop.f32.mrb[57].mxu1  ;;  %v5614_v56 = vpop.f32.mrb[57].mxu0  ;;  %v5933_v34 = vld [vmem:[%s10413_s14 + $0x2f0] sm:$0xff]  ;;  %v5932_v41 = vld [vmem:[%s10413_s14 + $0x2b8] sm:$0xff] }
0x1cdb   : > { %v5538_v58 = vadd.f32 %v5537_v55, %v5456_v27  ;;  %v5615_v59 = vadd.f32 %v5614_v56, %v5464_v33  ;;  %v9233_v56 = vcombine.high %v5932_v41, %v5934_v44 }
0x1cdc   : > { %v5623_v51 = vmax.f32 %v5536_v45, 0.0  ;;  %v5625_v39 = vmax.f32 %v5613_v54, 0.0  ;;  %v9216_v45 = vcombine.low %v5927_v49, %v5929_v36  ;;  %v9232_v54 = vcombine.low %v5928_v37, %v5930_v48 }
0x1cdd   : > { %v5624_v60 = vmax.f32 %v5538_v58, 0.0  ;;  %v5626_v46 = vmax.f32 %v5615_v59, 0.0  ;;  %v5541_v3 = vpop.f32.mrb[58].mxu1  ;;  %v5618_v6 = vpop.f32.mrb[58].mxu0  ;;  %v5938_v58 = vld [vmem:[%s10413_s14 + $0x378] sm:$0xff] }
0x1cde   : > { %v5542_v11 = vadd.f32 %v5541_v3, %v5452_v25  ;;  %v5619_v42 = vadd.f32 %v5618_v6, %v5460_v26  ;;  %v5543_v18 = vpop.f32.mrb[59].mxu1  ;;  %v5620_v35 = vpop.f32.mrb[59].mxu0  ;;  %v9215_v26 = vcombine.high %v5927_v49, %v5929_v36  ;;  %v9235_v3 = vcombine.high %v5936_v57, %v5938_v58  ;;  %v5939_v6 = vld [vmem:[%s10413_s14 + $0x3b0] sm:$0xff]  ;;  %v7592_v49 = vld [vmem:[%s10417_s27 + $0x328] sm:$0xff]  }
0x1cdf   : > { %v5544_v47 = vadd.f32 %v5543_v18, %v5456_v27  ;;  %v5621_v13 = vadd.f32 %v5620_v35, %v5464_v33  ;;  %5823 = vmatprep.mubr.f32.mxu1 %v5624_v60  ;;  %5898 = vmatprep.mubr.f32.mxu0 %v5626_v46  ;;  %v9231_v27 = vcombine.high %v5928_v37, %v5930_v48  ;;  %v5931_v33 = vld [vmem:[%s10413_s14 + $0x2b0] sm:$0xff]  ;;  %v7608_v36 = vld [vmem:[%s10417_s27 + $0x3a8] sm:$0xff]  }
0x1ce0   : > { %5824 = vmatmul.mubr.f32.vlgmr.msra.gmra.mrb[60].mxu1 %v5623_v51  ;;  %5899 = vmatmul.mubr.f32.vlgmr.msra.gmra.mrb[60].mxu0 %v5625_v39  ;;  %v5627_v40 = vmax.f32 %v5542_v11, 0.0  ;;  %v5629_v63 = vmax.f32 %v5619_v42, 0.0  ;;  %v9217_v55 = vcombine.high %v5931_v33, %v5933_v34  ;;  %v9218_v59 = vcombine.low %v5931_v33, %v5933_v34  ;;  %v5942_v51 = vld [vmem:[%s10413_s14 + $0x3f8] sm:$0xff]  ;;  %v7601_v37 = vld [vmem:[%s10417_s27 + $0x370] sm:$0xff]  }
0x1ce1   : > { %v5628_v14 = vmax.f32 %v5544_v47, 0.0  ;;  %v5630_v15 = vmax.f32 %v5621_v13, 0.0  ;;  %8938 = vmatpush1.bf16.msra.mxu1 %v9208_v5  ;;  %8970 = vmatpush1.bf16.msra.mxu0 %v9224_v7  ;;  %v5926_v5 = vld [vmem:[%s10413_s14 + $0x1f8] sm:$0xff]  ;;  %v9213_v7 = vcombine.high %v5923_v21, %v5925_v61  ;;  %v9234_v60 = vcombine.low %v5932_v41, %v5934_v44  ;;  %v7595_v47 = vld [vmem:[%s10417_s27 + $0x340] sm:$0xff]   ;;  %v7617_v48 = vld [vmem:[%s10417_s27 + $0x3f0] sm:$0xff]  }
0x1ce2   : > { %8940 = vmatprep.subr.bf16.mxu1 %v9209_v8  ;;  %8972 = vmatprep.subr.bf16.mxu0 %v9225_v10  ;;  %v9229_v22 = vcombine.high %v5924_v62, %v5926_v5  ;;  %v9230_v25 = vcombine.low %v5924_v62, %v5926_v5  ;;  %v9219_v46 = vcombine.high %v5935_v16, %v5937_v32  ;;  %v5941_v8 = vld [vmem:[%s10413_s14 + $0x3f0] sm:$0xff]  ;;  %v5940_v10 = vld [vmem:[%s10413_s14 + $0x3b8] sm:$0xff]  ;;  %v7611_v13 = vld [vmem:[%s10417_s27 + $0x3c0] sm:$0xff]  }
0x1ce3   : > { %5828 = vmatprep.mubr.f32.mxu1 %v5628_v14  ;;  %5903 = vmatprep.mubr.f32.mxu0 %v5630_v15  ;;  %v9220_v39 = vcombine.low %v5935_v16, %v5937_v32  ;;  %v9236_v11 = vcombine.low %v5936_v57, %v5938_v58  ;;  %v9221_v42 = vcombine.high %v5939_v6, %v5941_v8  ;;  %v7588_v14 = vld [vmem:[%s10417_s27 + $0x308] sm:$0xff]   ;;  %v7590_v21 = vld [vmem:[%s10417_s27 + $0x318] sm:$0xff]   ;;  %v7599_v62 = vld [vmem:[%s10417_s27 + $0x360] sm:$0xff]  }
0x1ce4   : > { %5829 = vmatmul.mubr.f32.gmra.mrb[62].mxu1 %v5627_v40  ;;  %5904 = vmatmul.mubr.f32.gmra.mrb[62].mxu0 %v5629_v63  ;;  %v9237_v18 = vcombine.high %v5940_v10, %v5942_v51  ;;  %v9222_v35 = vcombine.low %v5939_v6, %v5941_v8  ;;  %v9238_v20 = vcombine.low %v5940_v10, %v5942_v51  ;;  %v7604_v15 = vld [vmem:[%s10417_s27 + $0x388] sm:$0xff]   ;;  %v7589_v40 = vld [vmem:[%s10417_s27 + $0x310] sm:$0xff]   ;;  %v7606_v61 = vld [vmem:[%s10417_s27 + $0x398] sm:$0xff]  }
0x1ce5   : > { %8942 = vmatpush1.bf16.msra.mxu1 %v9210_v17  ;;  %8974 = vmatpush1.bf16.msra.mxu0 %v9226_v38  ;;  %v7597_v17 = vld [vmem:[%s10417_s27 + $0x350] sm:$0xff]   ;;  %v7615_v5 = vld [vmem:[%s10417_s27 + $0x3e0] sm:$0xff]   ;;  %v7594_v33 = vld [vmem:[%s10417_s27 + $0x338] sm:$0xff]  }
0x1ce6   : > { %8944 = vmatprep.subr.bf16.mxu1 %v9211_v1  ;;  %8976 = vmatprep.subr.bf16.mxu0 %v9227_v19  ;;  %v7613_v38 = vld [vmem:[%s10417_s27 + $0x3d0] sm:$0xff]   ;;  %v7598_v1 = vld [vmem:[%s10417_s27 + $0x358] sm:$0xff]  }
0x1ce7   : > { %6093 = vmatprep.mubr.f32.mxu1 %v9909_v9  ;;  %6170 = vmatprep.mubr.f32.mxu0 %v9909_v9  ;;  %v7605_v63 = vld [vmem:[%s10417_s27 + $0x390] sm:$0xff]   ;;  %v7614_v19 = vld [vmem:[%s10417_s27 + $0x3d8] sm:$0xff]  }
0x1ce8   : > { %v7610_v34 = vld [vmem:[%s10417_s27 + $0x3b8] sm:$0xff]  }
0x1ce9   : > { %8946 = vmatpush1.bf16.msra.mxu1 %v9212_v2  ;;  %8978 = vmatpush1.bf16.msra.mxu0 %v9228_v4  ;;  %v7591_v2 = vld [vmem:[%s10417_s27 + $0x320] sm:$0xff]   ;;  %v6007_v10 = vld [vmem:[%s10415_s2 + $0xc] sm:$0xf] }
0x1cea   : > { %8948 = vmatprep.subr.bf16.mxu1 %v9213_v7  ;;  %8980 = vmatprep.subr.bf16.mxu0 %v9229_v22  ;;  %v7607_v4 = vld [vmem:[%s10417_s27 + $0x3a0] sm:$0xff]   ;;  %v7600_v7 = vld [vmem:[%s10417_s27 + $0x368] sm:$0xff]   ;;  %v6012_v51 = vrot.slane %v6007_v10, %v11001_v31 }
0x1ceb   : > { %v7616_v22 = vld [vmem:[%s10417_s27 + $0x3e8] sm:$0xff]  }
0x1ced   : > { %8950 = vmatpush1.bf16.msra.mxu1 %v9214_v24  ;;  %8982 = vmatpush1.bf16.msra.mxu0 %v9230_v25  ;;  %v7593_v24 = vld [vmem:[%s10417_s27 + $0x330] sm:$0xff]  }
0x1cee   : > { %8952 = vmatprep.subr.bf16.mxu1 %v9215_v26  ;;  %8984 = vmatprep.subr.bf16.mxu0 %v9231_v27  ;;  %v7609_v25 = vld [vmem:[%s10417_s27 + $0x3b0] sm:$0xff]   ;;  %v7602_v26 = vld [vmem:[%s10417_s27 + $0x378] sm:$0xff]  }
0x1cef   : > { %v7618_v27 = vld [vmem:[%s10417_s27 + $0x3f8] sm:$0xff]  }
0x1cf1   : > { %8954 = vmatpush1.bf16.msra.mxu1 %v9216_v45  ;;  %8986 = vmatpush1.bf16.msra.mxu0 %v9232_v54 }
0x1cf2   : > { %8956 = vmatprep.subr.bf16.mxu1 %v9217_v55  ;;  %8988 = vmatprep.subr.bf16.mxu0 %v9233_v56 }
0x1cf5   : > { %8958 = vmatpush1.bf16.msra.mxu1 %v9218_v59  ;;  %8990 = vmatpush1.bf16.msra.mxu0 %v9234_v60 }
0x1cf6   : > { %8960 = vmatprep.subr.bf16.mxu1 %v9219_v46  ;;  %8992 = vmatprep.subr.bf16.mxu0 %v9235_v3 }
0x1cf9   : > { %8962 = vmatpush1.bf16.msra.mxu1 %v9220_v39  ;;  %8994 = vmatpush1.bf16.msra.mxu0 %v9236_v11  ;;  %v6020_v39 = vrot.slane %v6007_v10, %v11003_v52  ;;  %v6016_v11 = vrot.slane %v6007_v10, %v11005_v53 }
0x1cfa   : > { %8964 = vmatprep.subr.bf16.mxu1 %v9221_v42  ;;  %8996 = vmatprep.subr.bf16.mxu0 %v9237_v18  ;;  %v6024_v42 = vrot.slane %v6007_v10, %v11007_v29 }
0x1cfd   : > { %8966 = vmatpush1.bf16.msra.mxu1 %v9222_v35  ;;  %8998 = vmatpush1.bf16.msra.mxu0 %v9238_v20 }
0x1cfe   : > { %9000 = vmatprep.subr.bf16.mxu1 %v7595_v47  ;;  %9032 = vmatprep.subr.bf16.mxu0 %v7611_v13 }
0x1d00   : > { %6094 = vmatmul.mubr.f32.vlgmr.msra.gmra.mrb[64].mxu1 %v10911_v50  ;;  %6171 = vmatmul.mubr.f32.vlgmr.msra.gmra.mrb[64].mxu0 %v10911_v50 }
0x1d01   : > { %6099 = vmatprep.mubr.f32.mxu1 %v9909_v9  ;;  %6176 = vmatprep.mubr.f32.mxu0 %v9909_v9  ;;  %v7596_v9 = vld [vmem:[%s10417_s27 + $0x348] sm:$0xff]  }
0x1d02   : > { %9002 = vmatpush3.bf16.msra.mxu1 %v7587_v43  ;;  %9034 = vmatpush3.bf16.msra.mxu0 %v7603_v28 }
0x1d03   : > { %9004 = vmatprep.subr.bf16.mxu1 %v7596_v9  ;;  %9036 = vmatprep.subr.bf16.mxu0 %v7612_v30 }
0x1d04   : > { %6100 = vmatmul.mubr.f32.gmra.mrb[66].mxu1 %v10920_v0  ;;  %6177 = vmatmul.mubr.f32.gmra.mrb[66].mxu0 %v10920_v0 }
0x1d06   : > { %9006 = vmatpush3.bf16.msra.mxu1 %v7588_v14  ;;  %9038 = vmatpush3.bf16.msra.mxu0 %v7604_v15 }
0x1d07   : > { %9008 = vmatprep.subr.bf16.mxu1 %v7597_v17  ;;  %9040 = vmatprep.subr.bf16.mxu0 %v7613_v38 }
0x1d0a   : > { %9010 = vmatpush3.bf16.msra.mxu1 %v7589_v40  ;;  %9042 = vmatpush3.bf16.msra.mxu0 %v7605_v63 }
0x1d0b   : > { %9012 = vmatprep.subr.bf16.mxu1 %v7598_v1  ;;  %9044 = vmatprep.subr.bf16.mxu0 %v7614_v19 }
0x1d0e   : > { %9014 = vmatpush3.bf16.msra.mxu1 %v7590_v21  ;;  %9046 = vmatpush3.bf16.msra.mxu0 %v7606_v61 }
0x1d0f   : > { %9016 = vmatprep.subr.bf16.mxu1 %v7599_v62  ;;  %9048 = vmatprep.subr.bf16.mxu0 %v7615_v5 }
0x1d12   : > { %9018 = vmatpush3.bf16.msra.mxu1 %v7591_v2  ;;  %9050 = vmatpush3.bf16.msra.mxu0 %v7607_v4 }
0x1d13   : > { %9020 = vmatprep.subr.bf16.mxu1 %v7600_v7  ;;  %9052 = vmatprep.subr.bf16.mxu0 %v7616_v22 }
0x1d16   : > { %9022 = vmatpush3.bf16.msra.mxu1 %v7592_v49  ;;  %9054 = vmatpush3.bf16.msra.mxu0 %v7608_v36 }
0x1d17   : > { %9024 = vmatprep.subr.bf16.mxu1 %v7601_v37  ;;  %9056 = vmatprep.subr.bf16.mxu0 %v7617_v48 }
0x1d1a   : > { %9026 = vmatpush3.bf16.msra.mxu1 %v7593_v24  ;;  %9058 = vmatpush3.bf16.msra.mxu0 %v7609_v25  ;;  %v6848_v24 = vld [vmem:[%s10403_s12 + $0xe] ss:$0 sm:$0xff] }
0x1d1b   : > { %9028 = vmatprep.subr.bf16.mxu1 %v7602_v26  ;;  %9060 = vmatprep.subr.bf16.mxu0 %v7618_v27 }
0x1d1e   : > { %9030 = vmatpush3.bf16.msra.mxu1 %v7594_v33  ;;  %9062 = vmatpush3.bf16.msra.mxu0 %v7610_v34 }
0x1db3   : > { %v7939_v41 = vpop.f32.mrb[60].mxu1  ;;  %v7977_v44 = vpop.f32.mrb[60].mxu0 }
0x1db4   : > { %v7940_v45 = vpop.f32.mrb[61].mxu1  ;;  %v7978_v54 = vpop.f32.mrb[61].mxu0 }
0x1db5   : > { %v7941_v55 = vadd.f32 %v7940_v45, %v7939_v41  ;;  %v7979_v56 = vadd.f32 %v7978_v54, %v7977_v44 }
0x1db7   : > { %v5901_v16 = vadd.f32 %v7979_v56, %v7941_v55  ;;  %v7942_v32 = vpop.f32.mrb[62].mxu1  ;;  %v7980_v57 = vpop.f32.mrb[62].mxu0 }
0x1db8   : > { %v7943_v58 = vpop.f32.mrb[63].mxu1  ;;  %v7981_v59 = vpop.f32.mrb[63].mxu0 }
0x1db9   : > { %v5909_v60 = vadd.f32 %v5901_v16, %v11160_v23  ;;  %v7944_v46 = vadd.f32 %v7943_v58, %v7942_v32  ;;  %v7982_v3 = vadd.f32 %v7981_v59, %v7980_v57 }
0x1dbb   : > { %v5906_v6 = vadd.f32 %v7982_v3, %v7944_v46 }
0x1dbd   : > { %v5910_v8 = vadd.f32 %v5906_v6, %v11162_v12 }
0x1dd3   : > { %v6095_v18 = vpop.f32.mrb[64].mxu1  ;;  %v6172_v35 = vpop.f32.mrb[64].mxu0 }
0x1dd4   : > { %v6096_v20 = vadd.f32 %v6095_v18, %v6012_v51  ;;  %v6173_v47 = vadd.f32 %v6172_v35, %v6020_v39  ;;  %v6097_v13 = vpop.f32.mrb[65].mxu1  ;;  %v6174_v23 = vpop.f32.mrb[65].mxu0 }
0x1dd5   : > { %v6098_v43 = vadd.f32 %v6097_v13, %v6016_v11  ;;  %v6175_v28 = vadd.f32 %v6174_v23, %v6024_v42 }
0x1dd6   : > { %v6183_v15 = vmax.f32 %v6096_v20, 0.0  ;;  %v6185_v31 = vmax.f32 %v6173_v47, 0.0 }
0x1dd7   : > { %v6184_v9 = vmax.f32 %v6098_v43, 0.0  ;;  %v6186_v30 = vmax.f32 %v6175_v28, 0.0  ;;  %v6101_v12 = vpop.f32.mrb[66].mxu1  ;;  %v6178_v14 = vpop.f32.mrb[66].mxu0 }
0x1dd8   : > { %v6102_v17 = vadd.f32 %v6101_v12, %v6012_v51  ;;  %v6179_v52 = vadd.f32 %v6178_v14, %v6020_v39  ;;  %v6103_v38 = vpop.f32.mrb[67].mxu1  ;;  %v6180_v53 = vpop.f32.mrb[67].mxu0  ;;  %v6849_v51 = vld [vmem:[%s10403_s12 + $0xc] ss:$0 sm:$0xff] }
0x1dd9   : > { %v6104_v40 = vadd.f32 %v6103_v38, %v6016_v11  ;;  %v6181_v29 = vadd.f32 %v6180_v53, %v6024_v42  ;;  %6383 = vmatprep.mubr.f32.mxu1 %v6184_v9  ;;  %6458 = vmatprep.mubr.f32.mxu0 %v6186_v30  ;;  %v6850_v11 = vld [vmem:[%s10403_s12 + $0xd] ss:$0 sm:$0xff] }
0x1dda   : > { %6384 = vmatmul.mubr.f32.vlgmr.msra.gmra.mrb[68].mxu1 %v6183_v15  ;;  %6459 = vmatmul.mubr.f32.vlgmr.msra.gmra.mrb[68].mxu0 %v6185_v31  ;;  %v6187_v19 = vmax.f32 %v6102_v17, 0.0  ;;  %v6189_v21 = vmax.f32 %v6179_v52, 0.0 }
0x1ddb   : > { %v6188_v63 = vmax.f32 %v6104_v40, 0.0  ;;  %v6190_v1 = vmax.f32 %v6181_v29, 0.0 }
0x1ddd   : > { %6388 = vmatprep.mubr.f32.mxu1 %v6188_v63  ;;  %6463 = vmatprep.mubr.f32.mxu0 %v6190_v1 }
0x1dde   : > { %6389 = vmatmul.mubr.f32.gmra.mrb[70].mxu1 %v6187_v19  ;;  %6464 = vmatmul.mubr.f32.gmra.mrb[70].mxu0 %v6189_v21 }
0x1ead   : > { %v8015_v61 = vpop.f32.mrb[68].mxu1  ;;  %v8053_v62 = vpop.f32.mrb[68].mxu0 }
0x1eae   : > { %v8016_v5 = vpop.f32.mrb[69].mxu1  ;;  %v8054_v2 = vpop.f32.mrb[69].mxu0 }
0x1eaf   : > { %v8017_v4 = vadd.f32 %v8016_v5, %v8015_v61  ;;  %v8055_v7 = vadd.f32 %v8054_v2, %v8053_v62 }
0x1eb1   : > { %v6461_v22 = vadd.f32 %v8055_v7, %v8017_v4  ;;  %v8018_v49 = vpop.f32.mrb[70].mxu1  ;;  %v8056_v36 = vpop.f32.mrb[70].mxu0 }
0x1eb2   : > { %v8019_v37 = vpop.f32.mrb[71].mxu1  ;;  %v8057_v48 = vpop.f32.mrb[71].mxu0 }
0x1eb3   : > { %v6469_v25 = vadd.f32 %v6461_v22, %v5909_v60  ;;  %v8020_v26 = vadd.f32 %v8019_v37, %v8018_v49  ;;  %v8058_v27 = vadd.f32 %v8057_v48, %v8056_v36 }
0x1eb5   : > { %v6466_v33 = vadd.f32 %v8058_v27, %v8020_v26  ;;  %v6476_v34 = vadd.f32 %v6848_v24, %v6469_v25 }
0x1eb7   : > { %v6470_v41 = vadd.f32 %v6466_v33, %v5910_v8  ;;  %v6478_v44 = vadd.f32 %v6476_v34, %v10911_v50 }
0x1eb9   : > { %6482 = vadd.xlane.f32.xlu0 %v6478_v44  ;;  %v6477_v45 = vadd.f32 %v6848_v24, %v6470_v41 }
0x1ebb   : > { %v6479_v54 = vadd.f32 %v6477_v45, %v10920_v0 }
0x1ebd   : > { %6484 = vadd.xlane.f32.xlu1 %v6479_v54 }
0x1f46   : > { %v6483_v55 = vpop.xlane.xlu0 %6482 }
0x1f47   : > { %v6486_v56 = vmul.f32 0.0078125, %v6483_v55 }
0x1f49   : > { %v6488_v16 = vsub.f32 %v6478_v44, %v6486_v56 }
0x1f4a   : > { %v6485_v32 = vpop.xlane.xlu1 %6484 }
0x1f4b   : > { %v6487_v57 = vmul.f32 0.0078125, %v6485_v32  ;;  %v6490_v58 = vmul.f32 %v6488_v16, %v6488_v16 }
0x1f4d   : > { %v6489_v59 = vsub.f32 %v6479_v54, %v6487_v57  ;;  %6492 = vadd.xlane.f32.xlu0 %v6490_v58 }
0x1f4f   : > { %v6491_v60 = vmul.f32 %v6489_v59, %v6489_v59 }
0x1f51   : > { %6494 = vadd.xlane.f32.xlu1 %v6491_v60 }
0x1fda   : > { %v6493_v46 = vpop.xlane.xlu0 %6492 }
0x1fdb   : > { %v6496_v3 = vmul.f32 0.0078125, %v6493_v46 }
0x1fdd   : > { %v6498_v50 = vadd.f32 1e-05, %v6496_v3 }
0x1fde   : > { %v6495_v6 = vpop.xlane.xlu1 %6494 }
0x1fdf   : > { %9517 = vrsqrt.f32 %v6498_v50  ;;  %v6497_v0 = vmul.f32 0.0078125, %v6495_v6 }
0x1fe1   : > { %v6499_v8 = vadd.f32 1e-05, %v6497_v0 }
0x1fe3   : > { %9519 = vrsqrt.f32 %v6499_v8 }
0x1fe9   : > { %v9518_v10 = vpop.eup %9517 }
0x1fea   : > { %v6502_v39 = vmul.f32 %v9518_v10, %v6488_v16 }
0x1fec   : > { %v6508_v42 = vmul.f32 %v6849_v51, %v6502_v39 }
0x1fed   : > { %v9520_v18 = vpop.eup %9519 }
0x1fee   : > { %v6503_v35 = vmul.f32 %v9520_v18, %v6489_v59  ;;  %v6514_v20 = vadd.f32 %v6850_v11, %v6508_v42 }
0x1ff0   : > { %v6509_v47 = vmul.f32 %v6849_v51, %v6503_v35  ;;  %6516 = vst [vmem:[#allocation16] sm:$0xff] %v6514_v20 }
0x1ff2   : > { %v6515_v13 = vadd.f32 %v6850_v11, %v6509_v47 }
0x1ff4   : > { %6517 = vst [vmem:[#allocation16 + $0x8] sm:$0xff] %v6515_v13 }
0x1ff5   : > { %9830 = shalt.err (!%p9827_p6)
}
0x1ff6   : > { %s11374_s24 = sld [smem:[#allocation31_spill]] }
0x1ffc   : > { %s9831_s20 = scalar_lea.hbm %s11374_s24, 256 }
0x1ffd   : > { %p9832_p3 = scmp.ne.s32.totalorder %s11374_s24, %s9831_s20  ;;  %p9837_p11 = scmp.lt.u32.totalorder %s9831_s20, %s11374_s24 }
0x1fff   : > { %p9833_p7 = pnand %p9832_p3, %p9307_p1 }
0x2001   : > { %p9834_p5 = pneg %p9833_p7 }
0x2003   : > { %p9839_p13 = pnand %p9837_p11, %p9834_p5 }
0x2005   : > { %9842 = shalt.err (!%p9839_p13)
}
0x2006   : > { %s9915_s29 = smov 128   ;;  %s9916_s26 = smov 8  }
0x2007   : > { %9267 = dma.vmem_to_hbm [thread:$0]  (%p9307_p1), %s6525_s0, 256, %s11374_s24, [#allocation5], %s9915_s29, %s9915_s29, %s9916_s26  }
0x2008   : > { %9872 = dma.done.wait (%p9307_p1), [#allocation5], 256  }
0x2009   : > { %9874 = vsyncadd (%p9307_p1), [#allocation5], 4294967040 }
0x200a PF: > { %s11375_s20 = sld [smem:[#allocation22_spill]]  ;;  %s11376_s11 = sld [smem:[#allocation21_spill]] }
0x200b   : > { %s11377_s19 = sld [smem:[#allocation23_spill]]  ;;  %s11378_s17 = smov %s9881_s18 }
0x2010   : > { %p21_p10 = scmp.ge.s32.totalorder %s11375_s20, 4   ;;  %s11379_s18 = smov %s11376_s11 }
0x2012   :  { %23 = sbr.rel (!%p21_p10) target bundleno = 12 (0xc), region = 192 }
0x2019   :  { %6540 = vsyncpa [#allocation4], 1 }
0x201a   :  { %6542 = vsyncpa [#allocation4 + $0x1], 1 }
0x201b   :  { %6543 = vsyncpa [#allocation7], 1 }
0x201c   :  { %6544 = vsyncpa [#allocation5], 1 }
0x201d   :  { %6546 = vsyncpa [#allocation5 + $0x1], 1 }

</bundles_post_ra>
